<compile_context>
chip_gen: v7x
topology: tpu7x:2x2x1
jax: 0.10.0
libtpu: 0.0.40
codegen_flags: <defaults>
</compile_context>

<pallas_src>
import functools

import jax
import jax.numpy as jnp
from jax.experimental import pallas as pl
from jax.experimental.pallas import tpu as pltpu


# ----------------------------------------------------------------------------
# small helpers
# ----------------------------------------------------------------------------

def _sigmoid(x):
    return 1.0 / (1.0 + jnp.exp(-x))


def _softplus(x):
    # numerically stable softplus
    return jnp.maximum(x, 0.0) + jnp.log(1.0 + jnp.exp(-jnp.abs(x)))


def _layernorm(x, g, b, eps=1e-5):
    mu = jnp.mean(x, axis=-1, keepdims=True)
    var = jnp.mean((x - mu) ** 2, axis=-1, keepdims=True)
    return (x - mu) * jax.lax.rsqrt(var + eps) * g + b


def _rep_spec(a):
    """Full-array block whose block index is (0,...,0) at every grid step."""
    return pl.BlockSpec(a.shape, lambda *_, nd=a.ndim: (0,) * nd)


def _row_tile(n, max_tile=512):
    if n >= max_tile:
        return max_tile
    return max(8, -(-n // 8) * 8)


def _pad_rows(a, n_pad):
    n = a.shape[0]
    if n_pad == n:
        return a
    return jnp.pad(a, ((0, n_pad - n), (0, 0)))


def _bf16(x):
    return x.astype(jnp.bfloat16)


# ----------------------------------------------------------------------------
# Pallas kernels (fused stages)
# ----------------------------------------------------------------------------

def _encoder_kernel(x_ref, lpe_ref, rwse_ref, w1_ref, b1_ref, g1_ref, be1_ref,
                    w2_ref, b2_ref, o_ref):
    # Linear -> LayerNorm -> ReLU -> Linear, then PE concat fused into the
    # output slab [tile, hid + pe_dim] (single lane-dense-ish store, no XLA
    # concat / extra HBM round-trip of x_enc).
    h = (jnp.dot(_bf16(x_ref[...]), w1_ref[...],
                 preferred_element_type=jnp.float32) + b1_ref[...])
    h = jnp.maximum(_layernorm(h, g1_ref[...], be1_ref[...]), 0.0)
    enc = (jnp.dot(_bf16(h), w2_ref[...],
                   preferred_element_type=jnp.float32) + b2_ref[...])
    o_ref[...] = jnp.concatenate([enc, lpe_ref[...], rwse_ref[...]], axis=1)


def _tok_mamba_kernel(x_ref, theta_ref, w_in_x_ref, w_in_z_ref, w_conv_ref,
                      b_conv_ref, w_x_ref, w_dt_ref, b_dt_ref, a_t_ref,
                      d_ref, w_out_ref, g_ref, beta_ref, o_ref, *,
                      g_tile, n_max_pad, inv_n, seq_len, d_inner, d_state,
                      d_conv):
    # g_tile graphs per grid step.  x_ref is the dense batch flattened to 2D:
    # graph g occupies rows [g*n_max_pad, (g+1)*n_max_pad).
    x2d = x_ref[...]                                          # [G*Nmax, Dc] f32

    # --- theta linear + top-1 (k=1) token selection per graph ---------------
    # theta matmul stays f32 so argmax tie-breaking matches the reference.
    alpha = jnp.dot(x2d, theta_ref[...],
                    preferred_element_type=jnp.float32)       # [G*Nmax, K]
    tok_blocks, last_rows = [], []
    for g in range(g_tile):
        lo = g * n_max_pad
        a_g = alpha[lo:lo + n_max_pad, :]                     # [Nmax, K]
        x_g = x2d[lo:lo + n_max_pad, :]                       # [Nmax, Dc]
        col_max = jnp.max(a_g, axis=0, keepdims=True)
        row_iota = jax.lax.broadcasted_iota(jnp.int32, a_g.shape, 0)
        idx = jnp.min(jnp.where(a_g >= col_max, row_iota,
                                jnp.int32(n_max_pad + 1)),
                      axis=0, keepdims=True)                  # first arg-max
        onehot = (row_iota == idx).astype(jnp.float32)        # [Nmax, K]
        # Padding rows (score exactly 0) participate like the reference; the
        # mean divides by the true N_max (inv_n), matching to_dense_batch+mean.
        tok_g = jnp.sum(onehot[:, :, None] * x_g[:, None, :], axis=0) * inv_n
        tok_blocks.append(tok_g)                              # [K, Dc]
        last_rows.append(tok_g[seq_len - 1:seq_len, :])       # [1, Dc]
    tokens = jnp.concatenate(tok_blocks, axis=0)              # [G*K, Dc]
    tok_last = jnp.concatenate(last_rows, axis=0)             # [G, Dc]

    # --- Mamba block: projections batched over all graphs (bf16 on MXU) -----
    xin = jnp.dot(_bf16(tokens), w_in_x_ref[...],
                  preferred_element_type=jnp.float32)         # [G*K, d_inner]
    # Only the last token's output is consumed downstream -> z only there.
    z_last = jnp.dot(_bf16(tok_last), w_in_z_ref[...],
                     preferred_element_type=jnp.float32)      # [G, d_inner]

    # causal depthwise conv1d (per graph, static shifted-row construction)
    w_conv = w_conv_ref[...]                                  # [d_conv, d_inner]
    b_conv = b_conv_ref[...]                                  # [1, d_inner]
    rows = []
    for g in range(g_tile):
        base = g * seq_len
        for t in range(seq_len):
            acc = b_conv
            for j in range(d_conv):
                s = t + j - (d_conv - 1)
                if s >= 0:
                    acc = acc + w_conv[j:j + 1, :] * xin[base + s:base + s + 1, :]
            rows.append(acc)
    xc = jnp.concatenate(rows, axis=0)                        # [G*K, d_inner]
    xs = xc * _sigmoid(xc)                                    # SiLU, f32

    # x-projection, columns laid out [B(d_state) | C(d_state) | dt(dt_rank)]
    xdb = jnp.dot(_bf16(xs), w_x_ref[...],
                  preferred_element_type=jnp.float32)         # [G*K, 2S+R]
    b_all = xdb[:, :d_state]                                  # [G*K, d_state]
    c_all = xdb[:, d_state:2 * d_state]                       # [G*K, d_state]
    dt_lr = xdb[:, 2 * d_state:]                              # [G*K, dt_rank]
    dt = _softplus(jnp.dot(dt_lr, w_dt_ref[...],
                           preferred_element_type=jnp.float32)
                   + b_dt_ref[...])                           # [G*K, d_inner]

    # --- selective scan ------------------------------------------------------
    # State kept transposed (hT: [d_state, d_inner]) so dt rows broadcast
    # naturally over sublanes and A^T (= (-exp(A_log))^T, host-precomputed) is
    # consumed directly; only one [d_state, d_inner] tile is live per step.
    a_t = a_t_ref[...]                                        # [d_state, d_inner]
    b_allT = jnp.transpose(b_all)                             # [d_state, G*K]
    du = dt * xs                                              # [G*K, d_inner]
    y_rows, xs_rows = [], []
    for g in range(g_tile):
        hT = jnp.zeros((d_state, d_inner), jnp.float32)
        for t in range(seq_len):
            i = g * seq_len + t
            dA = jnp.exp(dt[i:i + 1, :] * a_t)                # [d_state, d_inner]
            hT = dA * hT + b_allT[:, i:i + 1] * du[i:i + 1, :]
        ilast = g * seq_len + seq_len - 1
        # C . h as an MXU matvec -> already a lane-major [1, d_inner] row.
        y_rows.append(jnp.dot(c_all[ilast:ilast + 1, :], hT,
                              preferred_element_type=jnp.float32))
        xs_rows.append(xs[ilast:ilast + 1, :])
    y_last = jnp.concatenate(y_rows, axis=0)                  # [G, d_inner]
    xs_last = jnp.concatenate(xs_rows, axis=0)                # [G, d_inner]
    y_last = y_last + d_ref[...] * xs_last
    y_last = y_last * (z_last * _sigmoid(z_last))             # gate
    out = jnp.dot(_bf16(y_last), w_out_ref[...],
                  preferred_element_type=jnp.float32)         # [G, d_model]
    o_ref[...] = _layernorm(out, g_ref[...], beta_ref[...])   # fused post-LN


def _merge_kernel(xc_ref, xm_ref, wa_ref, wb_ref, b_ref, o_ref):
    # merge Linear over concat([x_orig, x_m_last]) without materializing the
    # concat; wa is zero-padded over the PE columns so the full [enc|lpe|rwse]
    # slab can be fed directly (xc @ wa_pad == x_orig @ wa).
    o_ref[...] = (jnp.dot(_bf16(xc_ref[...]), wa_ref[...],
                          preferred_element_type=jnp.float32)
                  + jnp.dot(_bf16(xm_ref[...]), wb_ref[...],
                            preferred_element_type=jnp.float32)
                  + b_ref[...])


def _pool_dec_kernel(pool_ref, cnt_ref, wg_ref, bg_ref,
                     w1_ref, b1_ref, g1_ref, be1_ref, w2_ref, b2_ref, o_ref):
    # GIN linear folded through the (affine) global-add-pool:
    #   sum_i (agg_i @ W + b) == (sum_i agg_i) @ W + n_g * b
    # then decoder MLP (Linear, LN, ReLU, Linear).  Only [B, hid] data in VMEM.
    xg = (jnp.dot(_bf16(pool_ref[...]), wg_ref[...],
                  preferred_element_type=jnp.float32)
          + cnt_ref[...] * bg_ref[...])                       # [B, hid]
    h = (jnp.dot(_bf16(xg), w1_ref[...],
                 preferred_element_type=jnp.float32) + b1_ref[...])
    h = jnp.maximum(_layernorm(h, g1_ref[...], be1_ref[...]), 0.0)
    o_ref[...] = (jnp.dot(_bf16(h), w2_ref[...],
                          preferred_element_type=jnp.float32) + b2_ref[...])


# ----------------------------------------------------------------------------
# pallas_call wrappers
# ----------------------------------------------------------------------------

def pallas_encoder_pe(x, lpe, rwse, p):
    n = x.shape[0]
    hid = p['w2t'].shape[1]
    d_cat = hid + lpe.shape[1] + rwse.shape[1]
    tile = _row_tile(n)
    n_pad = -(-n // tile) * tile
    xp, lp, rp = _pad_rows(x, n_pad), _pad_rows(lpe, n_pad), _pad_rows(rwse, n_pad)
    weights = [p['w1t'], p['b1'], p['g1'], p['be1'], p['w2t'], p['b2']]
    out = pl.pallas_call(
        _encoder_kernel,
        out_shape=jax.ShapeDtypeStruct((n_pad, d_cat), jnp.float32),
        grid=(n_pad // tile,),
        in_specs=[pl.BlockSpec((tile, x.shape[1]), lambda i: (i, 0)),
                  pl.BlockSpec((tile, lpe.shape[1]), lambda i: (i, 0)),
                  pl.BlockSpec((tile, rwse.shape[1]), lambda i: (i, 0))]
                 + [_rep_spec(w) for w in weights],
        out_specs=pl.BlockSpec((tile, d_cat), lambda i: (i, 0)),
        compiler_params=pltpu.CompilerParams(
            dimension_semantics=("parallel",)),
    )(xp, lp, rp, *weights)
    return out[:n]


def pallas_tokens_mamba(x_flat, params, meta, *, num_graphs_pad, g_tile,
                        n_max_pad, inv_n, seq_len):
    d_cat = x_flat.shape[1]
    mp, lnp = params['mamba'], params['ln_mamba']
    kern = functools.partial(
        _tok_mamba_kernel, g_tile=g_tile, n_max_pad=n_max_pad, inv_n=inv_n,
        seq_len=seq_len, d_inner=meta['d_inner'], d_state=meta['d_state'],
        d_conv=meta['d_conv'])
    weights = [params['theta_wt'], mp['w_in_x_t'], mp['w_in_z_t'], mp['w_conv'],
               mp['b_conv'], mp['w_x_t'], mp['w_dt_t'], mp['b_dt'], mp['a_t'],
               mp['d'], mp['w_out_t'], lnp['g'], lnp['b']]
    return pl.pallas_call(
        kern,
        out_shape=jax.ShapeDtypeStruct((num_graphs_pad, d_cat), jnp.float32),
        grid=(num_graphs_pad // g_tile,),
        in_specs=[pl.BlockSpec((g_tile * n_max_pad, d_cat), lambda i: (i, 0))]
                 + [_rep_spec(w) for w in weights],
        out_specs=pl.BlockSpec((g_tile, d_cat), lambda i: (i, 0)),
        compiler_params=pltpu.CompilerParams(
            dimension_semantics=("parallel",)),
    )(x_flat, *weights)


def pallas_merge(xc, x_m_last, p):
    n = xc.shape[0]
    hid = p['w_a_t'].shape[1]
    tile = _row_tile(n)
    n_pad = -(-n // tile) * tile
    xcp = _pad_rows(xc, n_pad)
    xmp = _pad_rows(x_m_last, n_pad)
    out = pl.pallas_call(
        _merge_kernel,
        out_shape=jax.ShapeDtypeStruct((n_pad, hid), jnp.float32),
        grid=(n_pad // tile,),
        in_specs=[pl.BlockSpec((tile, xcp.shape[1]), lambda i: (i, 0)),
                  pl.BlockSpec((tile, xmp.shape[1]), lambda i: (i, 0)),
                  _rep_spec(p['w_a_t']), _rep_spec(p['w_b_t']),
                  _rep_spec(p['b'])],
        out_specs=pl.BlockSpec((tile, hid), lambda i: (i, 0)),
        compiler_params=pltpu.CompilerParams(
            dimension_semantics=("parallel",)),
    )(xcp, xmp, p['w_a_t'], p['w_b_t'], p['b'])
    return out[:n]


def pallas_pool_dec(pooled, counts, gin_p, dec_p):
    num_graphs = pooled.shape[0]
    cout = dec_p['w2t'].shape[1]
    args = [pooled, counts, gin_p['w_t'], gin_p['b'],
            dec_p['w1t'], dec_p['b1'], dec_p['g1'], dec_p['be1'],
            dec_p['w2t'], dec_p['b2']]
    return pl.pallas_call(
        _pool_dec_kernel,
        out_shape=jax.ShapeDtypeStruct((num_graphs, cout), jnp.float32),
        in_specs=[_rep_spec(a) for a in args],
        out_specs=pl.BlockSpec((num_graphs, cout), lambda *_: (0, 0)),
    )(*args)


# ----------------------------------------------------------------------------
# JAX glue (data-dependent scatter/gather) and the full forward pass
# ----------------------------------------------------------------------------

def dense_batch(x, batch, num_graphs_pad, n_max_pad):
    # TODO(synk): to_dense_batch is a data-dependent scatter; done as JAX glue.
    n = x.shape[0]
    counts = jnp.zeros((num_graphs_pad,), jnp.int32).at[batch].add(1)
    offsets = jnp.concatenate(
        [jnp.zeros((1,), jnp.int32), jnp.cumsum(counts)[:-1]])
    pos = jnp.arange(n, dtype=jnp.int32) - offsets[batch]
    return (jnp.zeros((num_graphs_pad, n_max_pad, x.shape[1]), x.dtype)
            .at[batch, pos].set(x))


def gamba_forward(params, meta, x, src, dst, batch, lpe, rwse,
                  num_graphs, n_max):
    hid = params['enc']['w2t'].shape[1]
    seq_len = params['theta_wt'].shape[1]

    # 1+2) encoder MLP fused with the positional-encoding concat -> [N, d_cat]
    xc = pallas_encoder_pe(x, lpe, rwse, params['enc'])
    d_cat = xc.shape[1]

    # to_dense_batch (data-dependent scatter -> JAX glue); pad graph/node dims
    # for TPU tiling.  Extra zero rows behave identically to real padding rows
    # and the token mean still divides by the true n_max.
    g_tile = num_graphs if num_graphs <= 8 else 8
    num_graphs_pad = -(-num_graphs // g_tile) * g_tile
    n_max_pad = max(8, -(-n_max // 8) * 8)
    x_dense = dense_batch(xc, batch, num_graphs_pad, n_max_pad)
    x_flat = x_dense.reshape(num_graphs_pad * n_max_pad, d_cat)

    # 3+4) theta + top-1 tokens + Mamba + post-LN fused; only the last virtual
    #      token per graph is consumed downstream, so only it is produced.
    x_m_g = pallas_tokens_mamba(
        x_flat, params, meta, num_graphs_pad=num_graphs_pad, g_tile=g_tile,
        n_max_pad=n_max_pad, inv_n=1.0 / n_max,
        seq_len=seq_len)[:num_graphs]                          # [B, d_cat]

    # 5) x_m = x_mamba[batch][:, -1, :]
    # TODO(synk): per-node gather by graph id kept as JAX glue (data-dependent).
    x_m_last = x_m_g[batch]                                    # [N, d_cat]

    # 6) merge MLP (depth 1 -> single Linear); zero-padded split weights let the
    #    full xc slab stand in for x_orig without a host concat.
    x_h = pallas_merge(xc, x_m_last, params['merge'])          # [N, hid]

    # 7) output GIN aggregation: (1 + eps) * x_i + sum_{j->i} x_j, eps = 0
    # TODO(synk): edge scatter-add is data-dependent; done as JAX glue (O(E)).
    agg = x_h + jnp.zeros_like(x_h).at[dst].add(x_h[src])

    # 8) global add pool as a segment-sum (no dense [B, N] matrix); the GIN
    #    linear is folded through the pool inside the decoder kernel.
    pooled = jnp.zeros((num_graphs, hid), jnp.float32).at[batch].add(agg)
    counts = jnp.zeros((num_graphs,), jnp.float32).at[batch].add(1.0)[:, None]
    return pallas_pool_dec(pooled, counts, params['out_gin'], params['dec'])


# ----------------------------------------------------------------------------
# Deterministic parameter construction
#   - matmul weights stored pre-transposed [in, out] and pre-cast to bf16
#   - A = -exp(A_log) hoisted (and transposed) on the host
# ----------------------------------------------------------------------------

def init_params(key, cfg):
    hid, cin, cout = cfg['hidden'], cfg['in'], cfg['out']
    pe_dim, k_tok = cfg['pe_dim'], cfg['K']
    d_cat = hid + pe_dim
    d_inner, d_state, d_conv = 2 * d_cat, 128, 4
    dt_rank = -(-d_cat // 16)
    keys = iter(jax.random.split(key, 32))

    def w(shape):
        return (jax.random.normal(next(keys), shape, jnp.float32)
                / jnp.sqrt(jnp.float32(shape[0])))

    wb = lambda s: w(s).astype(jnp.bfloat16)        # MXU-operand weights as bf16
    zeros = lambda s: jnp.zeros(s, jnp.float32)
    ones = lambda s: jnp.ones(s, jnp.float32)

    # merge "A" weight zero-padded over the PE columns: xc @ w_a_pad == x_orig @ w_a
    w_a_pad = jnp.concatenate(
        [w((hid, hid)), jnp.zeros((pe_dim, hid), jnp.float32)],
        axis=0).astype(jnp.bfloat16)

    a_log = jnp.log(jnp.tile(
        jnp.arange(1, d_state + 1, dtype=jnp.float32)[None, :], (d_inner, 1)))

    params = {
        'enc': dict(w1t=wb((cin, hid)), b1=zeros((1, hid)), g1=ones((1, hid)),
                    be1=zeros((1, hid)), w2t=wb((hid, hid)), b2=zeros((1, hid))),
        'theta_wt': w((d_cat, k_tok)),               # f32: argmax tie stability
        'mamba': dict(
            w_in_x_t=wb((d_cat, d_inner)),           # in_proj, x half (no bias)
            w_in_z_t=wb((d_cat, d_inner)),           # in_proj, z half
            w_conv=w((d_conv, d_inner)),
            b_conv=zeros((1, d_inner)),
            # x-projection columns ordered [B(d_state) | C(d_state) | dt(dt_rank)]
            w_x_t=wb((d_inner, 2 * d_state + dt_rank)),
            w_dt_t=w((dt_rank, d_inner)),
            b_dt=jnp.full((1, d_inner), -2.0, jnp.float32),
            a_t=jnp.transpose(-jnp.exp(a_log)),      # [d_state, d_inner], hoisted
            d=ones((1, d_inner)),
            w_out_t=wb((d_inner, d_cat))),
        'ln_mamba': dict(g=ones((1, d_cat)), b=zeros((1, d_cat))),
        'merge': dict(w_a_t=w_a_pad, w_b_t=wb((d_cat, hid)), b=zeros((1, hid))),
        'out_gin': dict(w_t=wb((hid, hid)), b=zeros((1, hid))),
        'dec': dict(w1t=wb((hid, hid)), b1=zeros((1, hid)), g1=ones((1, hid)),
                    be1=zeros((1, hid)), w2t=wb((hid, cout)), b2=zeros((1, cout))),
    }
    meta = dict(d_inner=d_inner, d_state=d_state, dt_rank=dt_rank,
                d_conv=d_conv)
    return params, meta


# ----------------------------------------------------------------------------
# Driver
# ----------------------------------------------------------------------------

if __name__ == "__main__":
    in_channels, hidden_channels, out_channels = 8, 32, 6
    lap_pe, rw_len = 4, 4
    num_virtual_tokens = 4
    graph_sizes = [10, 6]
    num_graphs = len(graph_sizes)
    n_max = max(graph_sizes)
    n_nodes = sum(graph_sizes)

    key = jax.random.PRNGKey(0)
    kx, klpe, krw, kp = jax.random.split(key, 4)
    x = jax.random.normal(kx, (n_nodes, in_channels), jnp.float32)
    lpe = jax.random.normal(klpe, (n_nodes, lap_pe), jnp.float32)
    rwse = jax.random.normal(krw, (n_nodes, rw_len), jnp.float32)

    batch = jnp.concatenate(
        [jnp.full((s,), g, jnp.int32) for g, s in enumerate(graph_sizes)])

    # deterministic bidirectional ring graphs (no self-loops)
    src_list, dst_list, off = [], [], 0
    for s in graph_sizes:
        for i in range(s):
            a, b = off + i, off + (i + 1) % s
            src_list += [a, b]
            dst_list += [b, a]
        off += s
    src = jnp.array(src_list, jnp.int32)
    dst = jnp.array(dst_list, jnp.int32)

    cfg = {'hidden': hidden_channels, 'in': in_channels, 'out': out_channels,
           'pe_dim': lap_pe + rw_len, 'K': num_virtual_tokens}
    params, meta = init_params(kp, cfg)

    # jit the whole forward so the small JAX glue ops fuse around the pallas calls
    forward = jax.jit(lambda x_, src_, dst_, batch_, lpe_, rwse_: gamba_forward(
        params, meta, x_, src_, dst_, batch_, lpe_, rwse_, num_graphs, n_max))

    out = forward(x, src, dst, batch, lpe, rwse)
    out = jax.block_until_ready(out)
    assert out.shape == (num_graphs, out_channels)
    assert bool(jnp.all(jnp.isfinite(out)))
    print("KERNEL_OK")
</pallas_src>

<mosaic_0001>
module attributes {stable_mosaic.version = 11 : i64} {
  func.func private @main(%arg0: i32) attributes {dimension_semantics = [#tpu.dimension_semantics<core_parallel>], iteration_bounds = array<i64: 2>, tpu.core_type = #tpu.core_type<sc_scalar_subcore>, window_params = []} {
    return
  }
}

module attributes {stable_mosaic.version = 11 : i64} {
  func.func private @main(%arg0: i32) attributes {dimension_semantics = [#tpu.dimension_semantics<core_parallel>], iteration_bounds = array<i64: 2>, tpu.core_type = #tpu.core_type<sc_scalar_subcore>, window_params = []} {
    return
  }
}

module attributes {stable_mosaic.version = 11 : i64} {
  func.func @_encoder_kernel(%arg0: i32, %arg1: memref<16x8xf32, #tpu.memory_space<vmem>>, %arg2: memref<16x4xf32, #tpu.memory_space<vmem>>, %arg3: memref<16x4xf32, #tpu.memory_space<vmem>>, %arg4: memref<8x32xbf16, #tpu.memory_space<vmem>>, %arg5: memref<1x32xf32, #tpu.memory_space<vmem>>, %arg6: memref<1x32xf32, #tpu.memory_space<vmem>>, %arg7: memref<1x32xf32, #tpu.memory_space<vmem>>, %arg8: memref<32x32xbf16, #tpu.memory_space<vmem>>, %arg9: memref<1x32xf32, #tpu.memory_space<vmem>>, %arg10: memref<16x40xf32, #tpu.memory_space<vmem>>) attributes {dimension_semantics = [#tpu.dimension_semantics<parallel>], iteration_bounds = array<i64: 1>, scalar_prefetch = 0 : i64, scratch_operands = 0 : i64, tpu.core_type = #tpu.core_type<tc>, window_params = [{transform_indices = @transform_0, window_bounds = array<i64: 16, 8>}, {transform_indices = @transform_1, window_bounds = array<i64: 16, 4>}, {transform_indices = @transform_2, window_bounds = array<i64: 16, 4>}, {pipeline_mode = #tpu.pipeline_mode<synchronous>, transform_indices = @transform_3, window_bounds = array<i64: 8, 32>}, {pipeline_mode = #tpu.pipeline_mode<synchronous>, transform_indices = @transform_4, window_bounds = array<i64: 1, 32>}, {pipeline_mode = #tpu.pipeline_mode<synchronous>, transform_indices = @transform_5, window_bounds = array<i64: 1, 32>}, {pipeline_mode = #tpu.pipeline_mode<synchronous>, transform_indices = @transform_6, window_bounds = array<i64: 1, 32>}, {pipeline_mode = #tpu.pipeline_mode<synchronous>, transform_indices = @transform_7, window_bounds = array<i64: 32, 32>}, {pipeline_mode = #tpu.pipeline_mode<synchronous>, transform_indices = @transform_8, window_bounds = array<i64: 1, 32>}, {transform_indices = @transform_9, window_bounds = array<i64: 16, 40>}]} {
    %c0 = arith.constant 0 : index
    %c0_0 = arith.constant 0 : index
    %0 = vector.load %arg1[%c0, %c0_0] : memref<16x8xf32, #tpu.memory_space<vmem>>, vector<16x8xf32>
    %1 = arith.truncf %0 : vector<16x8xf32> to vector<16x8xbf16>
    %c0_1 = arith.constant 0 : index
    %c0_2 = arith.constant 0 : index
    %2 = vector.load %arg4[%c0_1, %c0_2] : memref<8x32xbf16, #tpu.memory_space<vmem>>, vector<8x32xbf16>
    %cst = arith.constant dense<0.000000e+00> : vector<16x32xf32>
    %3 = tpu.matmul %1, %2, %cst {dimension_numbers = #tpu.dot_dimension_numbers<[1], [0], [0], [1], [0, 0, 1, 1], [], []>} : vector<16x8xbf16>, vector<8x32xbf16>, vector<16x32xf32> -> vector<16x32xf32>
    %c0_3 = arith.constant 0 : index
    %c0_4 = arith.constant 0 : index
    %4 = vector.load %arg5[%c0_3, %c0_4] : memref<1x32xf32, #tpu.memory_space<vmem>>, vector<1x32xf32>
    %5 = vector.broadcast %4 : vector<1x32xf32> to vector<16x32xf32>
    %6 = arith.addf %3, %5 : vector<16x32xf32>
    %c0_5 = arith.constant 0 : index
    %c0_6 = arith.constant 0 : index
    %7 = vector.load %arg6[%c0_5, %c0_6] : memref<1x32xf32, #tpu.memory_space<vmem>>, vector<1x32xf32>
    %c0_7 = arith.constant 0 : index
    %c0_8 = arith.constant 0 : index
    %8 = vector.load %arg7[%c0_7, %c0_8] : memref<1x32xf32, #tpu.memory_space<vmem>>, vector<1x32xf32>
    %cst_9 = arith.constant dense<0.000000e+00> : vector<16xf32>
    %9 = vector.multi_reduction <add>, %6, %cst_9 [1] : vector<16x32xf32> to vector<16xf32>
    %10 = vector.shape_cast %9 : vector<16xf32> to vector<16x1xf32>
    %cst_10 = arith.constant 3.200000e+01 : f32
    %11 = vector.broadcast %cst_10 : f32 to vector<16x1xf32>
    %12 = arith.divf %10, %11 : vector<16x1xf32>
    %13 = vector.broadcast %12 : vector<16x1xf32> to vector<16x32xf32>
    %14 = arith.subf %6, %13 : vector<16x32xf32>
    %15 = arith.mulf %14, %14 : vector<16x32xf32>
    %cst_11 = arith.constant dense<0.000000e+00> : vector<16xf32>
    %16 = vector.multi_reduction <add>, %15, %cst_11 [1] : vector<16x32xf32> to vector<16xf32>
    %17 = vector.shape_cast %16 : vector<16xf32> to vector<16x1xf32>
    %cst_12 = arith.constant 3.200000e+01 : f32
    %18 = vector.broadcast %cst_12 : f32 to vector<16x1xf32>
    %19 = arith.divf %17, %18 : vector<16x1xf32>
    %20 = vector.broadcast %12 : vector<16x1xf32> to vector<16x32xf32>
    %21 = arith.subf %6, %20 : vector<16x32xf32>
    %cst_13 = arith.constant 9.99999974E-6 : f32
    %22 = vector.broadcast %cst_13 : f32 to vector<16x1xf32>
    %23 = arith.addf %19, %22 : vector<16x1xf32>
    %24 = math.rsqrt %23 : vector<16x1xf32>
    %25 = vector.broadcast %24 : vector<16x1xf32> to vector<16x32xf32>
    %26 = arith.mulf %21, %25 : vector<16x32xf32>
    %27 = vector.broadcast %7 : vector<1x32xf32> to vector<16x32xf32>
    %28 = arith.mulf %26, %27 : vector<16x32xf32>
    %29 = vector.broadcast %8 : vector<1x32xf32> to vector<16x32xf32>
    %30 = arith.addf %28, %29 : vector<16x32xf32>
    %cst_14 = arith.constant 0.000000e+00 : f32
    %31 = vector.broadcast %cst_14 : f32 to vector<16x32xf32>
    %32 = arith.maximumf %30, %31 : vector<16x32xf32>
    %33 = arith.truncf %32 : vector<16x32xf32> to vector<16x32xbf16>
    %c0_15 = arith.constant 0 : index
    %c0_16 = arith.constant 0 : index
    %34 = vector.load %arg8[%c0_15, %c0_16] : memref<32x32xbf16, #tpu.memory_space<vmem>>, vector<32x32xbf16>
    %cst_17 = arith.constant dense<0.000000e+00> : vector<16x32xf32>
    %35 = tpu.matmul %33, %34, %cst_17 {dimension_numbers = #tpu.dot_dimension_numbers<[1], [0], [0], [1], [0, 0, 1, 1], [], []>} : vector<16x32xbf16>, vector<32x32xbf16>, vector<16x32xf32> -> vector<16x32xf32>
    %c0_18 = arith.constant 0 : index
    %c0_19 = arith.constant 0 : index
    %36 = vector.load %arg9[%c0_18, %c0_19] : memref<1x32xf32, #tpu.memory_space<vmem>>, vector<1x32xf32>
    %37 = vector.broadcast %36 : vector<1x32xf32> to vector<16x32xf32>
    %38 = arith.addf %35, %37 : vector<16x32xf32>
    %c0_20 = arith.constant 0 : index
    %c0_21 = arith.constant 0 : index
    %39 = vector.load %arg2[%c0_20, %c0_21] : memref<16x4xf32, #tpu.memory_space<vmem>>, vector<16x4xf32>
    %c0_22 = arith.constant 0 : index
    %c0_23 = arith.constant 0 : index
    %40 = vector.load %arg3[%c0_22, %c0_23] : memref<16x4xf32, #tpu.memory_space<vmem>>, vector<16x4xf32>
    %41 = tpu.concatenate %38, %39, %40 in 1 : vector<16x32xf32>, vector<16x4xf32>, vector<16x4xf32> -> vector<16x40xf32>
    %c0_24 = arith.constant 0 : index
    %c0_25 = arith.constant 0 : index
    %42 = vector.load %arg10[%c0_24, %c0_25] : memref<16x40xf32, #tpu.memory_space<vmem>>, vector<16x40xf32>
    tpu.vector_store %arg10[%c0_24, %c0_25], %41 {strides = array<i32>} : memref<16x40xf32, #tpu.memory_space<vmem>>, vector<16x40xf32>,
    return
  }
  func.func @transform_0(%arg0: i32) -> (i32, i32) {
    %c0_i32 = arith.constant 0 : i32
    %c0_i32_0 = arith.constant 0 : i32
    return %arg0, %c0_i32 : i32, i32
  }
  func.func @transform_1(%arg0: i32) -> (i32, i32) {
    %c0_i32 = arith.constant 0 : i32
    %c0_i32_0 = arith.constant 0 : i32
    return %arg0, %c0_i32 : i32, i32
  }
  func.func @transform_2(%arg0: i32) -> (i32, i32) {
    %c0_i32 = arith.constant 0 : i32
    %c0_i32_0 = arith.constant 0 : i32
    return %arg0, %c0_i32 : i32, i32
  }
  func.func @transform_3(%arg0: i32) -> (i32, i32) {
    %c0_i32 = arith.constant 0 : i32
    %c0_i32_0 = arith.constant 0 : i32
    %c0_i32_1 = arith.constant 0 : i32
    return %c0_i32, %c0_i32_0 : i32, i32
  }
  func.func @transform_4(%arg0: i32) -> (i32, i32) {
    %c0_i32 = arith.constant 0 : i32
    %c0_i32_0 = arith.constant 0 : i32
    %c0_i32_1 = arith.constant 0 : i32
    return %c0_i32, %c0_i32_0 : i32, i32
  }
  func.func @transform_5(%arg0: i32) -> (i32, i32) {
    %c0_i32 = arith.constant 0 : i32
    %c0_i32_0 = arith.constant 0 : i32
    %c0_i32_1 = arith.constant 0 : i32
    return %c0_i32, %c0_i32_0 : i32, i32
  }
  func.func @transform_6(%arg0: i32) -> (i32, i32) {
    %c0_i32 = arith.constant 0 : i32
    %c0_i32_0 = arith.constant 0 : i32
    %c0_i32_1 = arith.constant 0 : i32
    return %c0_i32, %c0_i32_0 : i32, i32
  }
  func.func @transform_7(%arg0: i32) -> (i32, i32) {
    %c0_i32 = arith.constant 0 : i32
    %c0_i32_0 = arith.constant 0 : i32
    %c0_i32_1 = arith.constant 0 : i32
    return %c0_i32, %c0_i32_0 : i32, i32
  }
  func.func @transform_8(%arg0: i32) -> (i32, i32) {
    %c0_i32 = arith.constant 0 : i32
    %c0_i32_0 = arith.constant 0 : i32
    %c0_i32_1 = arith.constant 0 : i32
    return %c0_i32, %c0_i32_0 : i32, i32
  }
  func.func @transform_9(%arg0: i32) -> (i32, i32) {
    %c0_i32 = arith.constant 0 : i32
    %c0_i32_0 = arith.constant 0 : i32
    return %arg0, %c0_i32 : i32, i32
  }
}

module attributes {stable_mosaic.version = 11 : i64} {
  func.func @_tok_mamba_kernel(%arg0: i32, %arg1: memref<32x40xf32, #tpu.memory_space<vmem>>, %arg2: memref<40x4xf32, #tpu.memory_space<vmem>>, %arg3: memref<40x80xbf16, #tpu.memory_space<vmem>>, %arg4: memref<40x80xbf16, #tpu.memory_space<vmem>>, %arg5: memref<4x80xf32, #tpu.memory_space<vmem>>, %arg6: memref<1x80xf32, #tpu.memory_space<vmem>>, %arg7: memref<80x259xbf16, #tpu.memory_space<vmem>>, %arg8: memref<3x80xf32, #tpu.memory_space<vmem>>, %arg9: memref<1x80xf32, #tpu.memory_space<vmem>>, %arg10: memref<128x80xf32, #tpu.memory_space<vmem>>, %arg11: memref<1x80xf32, #tpu.memory_space<vmem>>, %arg12: memref<80x40xbf16, #tpu.memory_space<vmem>>, %arg13: memref<1x40xf32, #tpu.memory_space<vmem>>, %arg14: memref<1x40xf32, #tpu.memory_space<vmem>>, %arg15: memref<2x40xf32, #tpu.memory_space<vmem>>) attributes {dimension_semantics = [#tpu.dimension_semantics<parallel>], iteration_bounds = array<i64: 1>, scalar_prefetch = 0 : i64, scratch_operands = 0 : i64, tpu.core_type = #tpu.core_type<tc>, window_params = [{transform_indices = @transform_0, window_bounds = array<i64: 32, 40>}, {pipeline_mode = #tpu.pipeline_mode<synchronous>, transform_indices = @transform_1, window_bounds = array<i64: 40, 4>}, {pipeline_mode = #tpu.pipeline_mode<synchronous>, transform_indices = @transform_2, window_bounds = array<i64: 40, 80>}, {pipeline_mode = #tpu.pipeline_mode<synchronous>, transform_indices = @transform_3, window_bounds = array<i64: 40, 80>}, {pipeline_mode = #tpu.pipeline_mode<synchronous>, transform_indices = @transform_4, window_bounds = array<i64: 4, 80>}, {pipeline_mode = #tpu.pipeline_mode<synchronous>, transform_indices = @transform_5, window_bounds = array<i64: 1, 80>}, {pipeline_mode = #tpu.pipeline_mode<synchronous>, transform_indices = @transform_6, window_bounds = array<i64: 80, 259>}, {pipeline_mode = #tpu.pipeline_mode<synchronous>, transform_indices = @transform_7, window_bounds = array<i64: 3, 80>}, {pipeline_mode = #tpu.pipeline_mode<synchronous>, transform_indices = @transform_8, window_bounds = array<i64: 1, 80>}, {pipeline_mode = #tpu.pipeline_mode<synchronous>, transform_indices = @transform_9, window_bounds = array<i64: 128, 80>}, {pipeline_mode = #tpu.pipeline_mode<synchronous>, transform_indices = @transform_10, window_bounds = array<i64: 1, 80>}, {pipeline_mode = #tpu.pipeline_mode<synchronous>, transform_indices = @transform_11, window_bounds = array<i64: 80, 40>}, {pipeline_mode = #tpu.pipeline_mode<synchronous>, transform_indices = @transform_12, window_bounds = array<i64: 1, 40>}, {pipeline_mode = #tpu.pipeline_mode<synchronous>, transform_indices = @transform_13, window_bounds = array<i64: 1, 40>}, {transform_indices = @transform_14, window_bounds = array<i64: 2, 40>}]} {
    %c0 = arith.constant 0 : index
    %c0_0 = arith.constant 0 : index
    %0 = vector.load %arg1[%c0, %c0_0] : memref<32x40xf32, #tpu.memory_space<vmem>>, vector<32x40xf32>
    %c0_1 = arith.constant 0 : index
    %c0_2 = arith.constant 0 : index
    %1 = vector.load %arg2[%c0_1, %c0_2] : memref<40x4xf32, #tpu.memory_space<vmem>>, vector<40x4xf32>
    %cst = arith.constant dense<0.000000e+00> : vector<32x4xf32>
    %2 = tpu.matmul %0, %1, %cst {dimension_numbers = #tpu.dot_dimension_numbers<[1], [0], [0], [1], [0, 0, 1, 1], [], []>} : vector<32x40xf32>, vector<40x4xf32>, vector<32x4xf32> -> vector<32x4xf32>
    %3 = vector.extract_strided_slice %2 {offsets = [0, 0], sizes = [16, 4], strides = [1, 1]} : vector<32x4xf32> to vector<16x4xf32>
    %4 = vector.extract_strided_slice %0 {offsets = [0, 0], sizes = [16, 40], strides = [1, 1]} : vector<32x40xf32> to vector<16x40xf32>
    %cst_3 = arith.constant dense<0xFF800000> : vector<4xf32>
    %5 = vector.multi_reduction <maximumf>, %3, %cst_3 [0] : vector<16x4xf32> to vector<4xf32>
    %6 = vector.shape_cast %5 : vector<4xf32> to vector<1x4xf32>
    %7 = tpu.iota {dimensions = array<i32: 0>} : vector<16x4xi32>
    %8 = vector.broadcast %6 : vector<1x4xf32> to vector<16x4xf32>
    %9 = arith.cmpf oge, %3, %8 : vector<16x4xf32>
    %c17_i32 = arith.constant 17 : i32
    %10 = vector.broadcast %c17_i32 : i32 to vector<16x4xi32>
    %11 = arith.select %9, %7, %10 : vector<16x4xi1>, vector<16x4xi32>
    %cst_4 = arith.constant dense<2147483647> : vector<4xi32>
    %12 = vector.multi_reduction <minsi>, %11, %cst_4 [0] : vector<16x4xi32> to vector<4xi32>
    %13 = vector.shape_cast %12 : vector<4xi32> to vector<1x4xi32>
    %14 = vector.broadcast %13 : vector<1x4xi32> to vector<16x4xi32>
    %15 = arith.cmpi eq, %7, %14 : vector<16x4xi32>
    %16 = arith.extui %15 : vector<16x4xi1> to vector<16x4xi32>
    %17 = arith.sitofp %16 : vector<16x4xi32> to vector<16x4xf32>
    %18 = vector.shape_cast %17 : vector<16x4xf32> to vector<16x4x1xf32>
    %19 = vector.shape_cast %4 : vector<16x40xf32> to vector<16x1x40xf32>
    %20 = vector.broadcast %18 : vector<16x4x1xf32> to vector<16x4x40xf32>
    %21 = vector.broadcast %19 : vector<16x1x40xf32> to vector<16x4x40xf32>
    %22 = arith.mulf %20, %21 : vector<16x4x40xf32>
    %cst_5 = arith.constant dense<0.000000e+00> : vector<4x40xf32>
    %23 = vector.multi_reduction <add>, %22, %cst_5 [0] : vector<16x4x40xf32> to vector<4x40xf32>
    %cst_6 = arith.constant 1.000000e-01 : f32
    %24 = vector.broadcast %cst_6 : f32 to vector<4x40xf32>
    %25 = arith.mulf %23, %24 : vector<4x40xf32>
    %26 = vector.extract_strided_slice %25 {offsets = [3, 0], sizes = [1, 40], strides = [1, 1]} : vector<4x40xf32> to vector<1x40xf32>
    %27 = vector.extract_strided_slice %2 {offsets = [16, 0], sizes = [16, 4], strides = [1, 1]} : vector<32x4xf32> to vector<16x4xf32>
    %28 = vector.extract_strided_slice %0 {offsets = [16, 0], sizes = [16, 40], strides = [1, 1]} : vector<32x40xf32> to vector<16x40xf32>
    %cst_7 = arith.constant dense<0xFF800000> : vector<4xf32>
    %29 = vector.multi_reduction <maximumf>, %27, %cst_7 [0] : vector<16x4xf32> to vector<4xf32>
    %30 = vector.shape_cast %29 : vector<4xf32> to vector<1x4xf32>
    %31 = tpu.iota {dimensions = array<i32: 0>} : vector<16x4xi32>
    %32 = vector.broadcast %30 : vector<1x4xf32> to vector<16x4xf32>
    %33 = arith.cmpf oge, %27, %32 : vector<16x4xf32>
    %c17_i32_8 = arith.constant 17 : i32
    %34 = vector.broadcast %c17_i32_8 : i32 to vector<16x4xi32>
    %35 = arith.select %33, %31, %34 : vector<16x4xi1>, vector<16x4xi32>
    %cst_9 = arith.constant dense<2147483647> : vector<4xi32>
    %36 = vector.multi_reduction <minsi>, %35, %cst_9 [0] : vector<16x4xi32> to vector<4xi32>
    %37 = vector.shape_cast %36 : vector<4xi32> to vector<1x4xi32>
    %38 = vector.broadcast %37 : vector<1x4xi32> to vector<16x4xi32>
    %39 = arith.cmpi eq, %31, %38 : vector<16x4xi32>
    %40 = arith.extui %39 : vector<16x4xi1> to vector<16x4xi32>
    %41 = arith.sitofp %40 : vector<16x4xi32> to vector<16x4xf32>
    %42 = vector.shape_cast %41 : vector<16x4xf32> to vector<16x4x1xf32>
    %43 = vector.shape_cast %28 : vector<16x40xf32> to vector<16x1x40xf32>
    %44 = vector.broadcast %42 : vector<16x4x1xf32> to vector<16x4x40xf32>
    %45 = vector.broadcast %43 : vector<16x1x40xf32> to vector<16x4x40xf32>
    %46 = arith.mulf %44, %45 : vector<16x4x40xf32>
    %cst_10 = arith.constant dense<0.000000e+00> : vector<4x40xf32>
    %47 = vector.multi_reduction <add>, %46, %cst_10 [0] : vector<16x4x40xf32> to vector<4x40xf32>
    %cst_11 = arith.constant 1.000000e-01 : f32
    %48 = vector.broadcast %cst_11 : f32 to vector<4x40xf32>
    %49 = arith.mulf %47, %48 : vector<4x40xf32>
    %50 = vector.extract_strided_slice %49 {offsets = [3, 0], sizes = [1, 40], strides = [1, 1]} : vector<4x40xf32> to vector<1x40xf32>
    %51 = tpu.concatenate %25, %49 in 0 : vector<4x40xf32>, vector<4x40xf32> -> vector<8x40xf32>
    %52 = tpu.concatenate %26, %50 in 0 : vector<1x40xf32>, vector<1x40xf32> -> vector<2x40xf32>
    %53 = arith.truncf %51 : vector<8x40xf32> to vector<8x40xbf16>
    %c0_12 = arith.constant 0 : index
    %c0_13 = arith.constant 0 : index
    %54 = vector.load %arg3[%c0_12, %c0_13] : memref<40x80xbf16, #tpu.memory_space<vmem>>, vector<40x80xbf16>
    %cst_14 = arith.constant dense<0.000000e+00> : vector<8x80xf32>
    %55 = tpu.matmul %53, %54, %cst_14 {dimension_numbers = #tpu.dot_dimension_numbers<[1], [0], [0], [1], [0, 0, 1, 1], [], []>} : vector<8x40xbf16>, vector<40x80xbf16>, vector<8x80xf32> -> vector<8x80xf32>
    %56 = arith.truncf %52 : vector<2x40xf32> to vector<2x40xbf16>
    %c0_15 = arith.constant 0 : index
    %c0_16 = arith.constant 0 : index
    %57 = vector.load %arg4[%c0_15, %c0_16] : memref<40x80xbf16, #tpu.memory_space<vmem>>, vector<40x80xbf16>
    %cst_17 = arith.constant dense<0.000000e+00> : vector<2x80xf32>
    %58 = tpu.matmul %56, %57, %cst_17 {dimension_numbers = #tpu.dot_dimension_numbers<[1], [0], [0], [1], [0, 0, 1, 1], [], []>} : vector<2x40xbf16>, vector<40x80xbf16>, vector<2x80xf32> -> vector<2x80xf32>
    %c0_18 = arith.constant 0 : index
    %c0_19 = arith.constant 0 : index
    %59 = vector.load %arg5[%c0_18, %c0_19] : memref<4x80xf32, #tpu.memory_space<vmem>>, vector<4x80xf32>
    %c0_20 = arith.constant 0 : index
    %c0_21 = arith.constant 0 : index
    %60 = vector.load %arg6[%c0_20, %c0_21] : memref<1x80xf32, #tpu.memory_space<vmem>>, vector<1x80xf32>
    %61 = vector.extract_strided_slice %59 {offsets = [3, 0], sizes = [1, 80], strides = [1, 1]} : vector<4x80xf32> to vector<1x80xf32>
    %62 = vector.extract_strided_slice %55 {offsets = [0, 0], sizes = [1, 80], strides = [1, 1]} : vector<8x80xf32> to vector<1x80xf32>
    %63 = arith.mulf %61, %62 : vector<1x80xf32>
    %64 = arith.addf %60, %63 : vector<1x80xf32>
    %65 = vector.extract_strided_slice %59 {offsets = [2, 0], sizes = [1, 80], strides = [1, 1]} : vector<4x80xf32> to vector<1x80xf32>
    %66 = vector.extract_strided_slice %55 {offsets = [0, 0], sizes = [1, 80], strides = [1, 1]} : vector<8x80xf32> to vector<1x80xf32>
    %67 = arith.mulf %65, %66 : vector<1x80xf32>
    %68 = arith.addf %60, %67 : vector<1x80xf32>
    %69 = vector.extract_strided_slice %59 {offsets = [3, 0], sizes = [1, 80], strides = [1, 1]} : vector<4x80xf32> to vector<1x80xf32>
    %70 = vector.extract_strided_slice %55 {offsets = [1, 0], sizes = [1, 80], strides = [1, 1]} : vector<8x80xf32> to vector<1x80xf32>
    %71 = arith.mulf %69, %70 : vector<1x80xf32>
    %72 = arith.addf %68, %71 : vector<1x80xf32>
    %73 = vector.extract_strided_slice %59 {offsets = [1, 0], sizes = [1, 80], strides = [1, 1]} : vector<4x80xf32> to vector<1x80xf32>
    %74 = vector.extract_strided_slice %55 {offsets = [0, 0], sizes = [1, 80], strides = [1, 1]} : vector<8x80xf32> to vector<1x80xf32>
    %75 = arith.mulf %73, %74 : vector<1x80xf32>
    %76 = arith.addf %60, %75 : vector<1x80xf32>
    %77 = vector.extract_strided_slice %59 {offsets = [2, 0], sizes = [1, 80], strides = [1, 1]} : vector<4x80xf32> to vector<1x80xf32>
    %78 = vector.extract_strided_slice %55 {offsets = [1, 0], sizes = [1, 80], strides = [1, 1]} : vector<8x80xf32> to vector<1x80xf32>
    %79 = arith.mulf %77, %78 : vector<1x80xf32>
    %80 = arith.addf %76, %79 : vector<1x80xf32>
    %81 = vector.extract_strided_slice %59 {offsets = [3, 0], sizes = [1, 80], strides = [1, 1]} : vector<4x80xf32> to vector<1x80xf32>
    %82 = vector.extract_strided_slice %55 {offsets = [2, 0], sizes = [1, 80], strides = [1, 1]} : vector<8x80xf32> to vector<1x80xf32>
    %83 = arith.mulf %81, %82 : vector<1x80xf32>
    %84 = arith.addf %80, %83 : vector<1x80xf32>
    %85 = vector.extract_strided_slice %59 {offsets = [0, 0], sizes = [1, 80], strides = [1, 1]} : vector<4x80xf32> to vector<1x80xf32>
    %86 = vector.extract_strided_slice %55 {offsets = [0, 0], sizes = [1, 80], strides = [1, 1]} : vector<8x80xf32> to vector<1x80xf32>
    %87 = arith.mulf %85, %86 : vector<1x80xf32>
    %88 = arith.addf %60, %87 : vector<1x80xf32>
    %89 = vector.extract_strided_slice %59 {offsets = [1, 0], sizes = [1, 80], strides = [1, 1]} : vector<4x80xf32> to vector<1x80xf32>
    %90 = vector.extract_strided_slice %55 {offsets = [1, 0], sizes = [1, 80], strides = [1, 1]} : vector<8x80xf32> to vector<1x80xf32>
    %91 = arith.mulf %89, %90 : vector<1x80xf32>
    %92 = arith.addf %88, %91 : vector<1x80xf32>
    %93 = vector.extract_strided_slice %59 {offsets = [2, 0], sizes = [1, 80], strides = [1, 1]} : vector<4x80xf32> to vector<1x80xf32>
    %94 = vector.extract_strided_slice %55 {offsets = [2, 0], sizes = [1, 80], strides = [1, 1]} : vector<8x80xf32> to vector<1x80xf32>
    %95 = arith.mulf %93, %94 : vector<1x80xf32>
    %96 = arith.addf %92, %95 : vector<1x80xf32>
    %97 = vector.extract_strided_slice %59 {offsets = [3, 0], sizes = [1, 80], strides = [1, 1]} : vector<4x80xf32> to vector<1x80xf32>
    %98 = vector.extract_strided_slice %55 {offsets = [3, 0], sizes = [1, 80], strides = [1, 1]} : vector<8x80xf32> to vector<1x80xf32>
    %99 = arith.mulf %97, %98 : vector<1x80xf32>
    %100 = arith.addf %96, %99 : vector<1x80xf32>
    %101 = vector.extract_strided_slice %59 {offsets = [3, 0], sizes = [1, 80], strides = [1, 1]} : vector<4x80xf32> to vector<1x80xf32>
    %102 = vector.extract_strided_slice %55 {offsets = [4, 0], sizes = [1, 80], strides = [1, 1]} : vector<8x80xf32> to vector<1x80xf32>
    %103 = arith.mulf %101, %102 : vector<1x80xf32>
    %104 = arith.addf %60, %103 : vector<1x80xf32>
    %105 = vector.extract_strided_slice %59 {offsets = [2, 0], sizes = [1, 80], strides = [1, 1]} : vector<4x80xf32> to vector<1x80xf32>
    %106 = vector.extract_strided_slice %55 {offsets = [4, 0], sizes = [1, 80], strides = [1, 1]} : vector<8x80xf32> to vector<1x80xf32>
    %107 = arith.mulf %105, %106 : vector<1x80xf32>
    %108 = arith.addf %60, %107 : vector<1x80xf32>
    %109 = vector.extract_strided_slice %59 {offsets = [3, 0], sizes = [1, 80], strides = [1, 1]} : vector<4x80xf32> to vector<1x80xf32>
    %110 = vector.extract_strided_slice %55 {offsets = [5, 0], sizes = [1, 80], strides = [1, 1]} : vector<8x80xf32> to vector<1x80xf32>
    %111 = arith.mulf %109, %110 : vector<1x80xf32>
    %112 = arith.addf %108, %111 : vector<1x80xf32>
    %113 = vector.extract_strided_slice %59 {offsets = [1, 0], sizes = [1, 80], strides = [1, 1]} : vector<4x80xf32> to vector<1x80xf32>
    %114 = vector.extract_strided_slice %55 {offsets = [4, 0], sizes = [1, 80], strides = [1, 1]} : vector<8x80xf32> to vector<1x80xf32>
    %115 = arith.mulf %113, %114 : vector<1x80xf32>
    %116 = arith.addf %60, %115 : vector<1x80xf32>
    %117 = vector.extract_strided_slice %59 {offsets = [2, 0], sizes = [1, 80], strides = [1, 1]} : vector<4x80xf32> to vector<1x80xf32>
    %118 = vector.extract_strided_slice %55 {offsets = [5, 0], sizes = [1, 80], strides = [1, 1]} : vector<8x80xf32> to vector<1x80xf32>
    %119 = arith.mulf %117, %118 : vector<1x80xf32>
    %120 = arith.addf %116, %119 : vector<1x80xf32>
    %121 = vector.extract_strided_slice %59 {offsets = [3, 0], sizes = [1, 80], strides = [1, 1]} : vector<4x80xf32> to vector<1x80xf32>
    %122 = vector.extract_strided_slice %55 {offsets = [6, 0], sizes = [1, 80], strides = [1, 1]} : vector<8x80xf32> to vector<1x80xf32>
    %123 = arith.mulf %121, %122 : vector<1x80xf32>
    %124 = arith.addf %120, %123 : vector<1x80xf32>
    %125 = vector.extract_strided_slice %59 {offsets = [0, 0], sizes = [1, 80], strides = [1, 1]} : vector<4x80xf32> to vector<1x80xf32>
    %126 = vector.extract_strided_slice %55 {offsets = [4, 0], sizes = [1, 80], strides = [1, 1]} : vector<8x80xf32> to vector<1x80xf32>
    %127 = arith.mulf %125, %126 : vector<1x80xf32>
    %128 = arith.addf %60, %127 : vector<1x80xf32>
    %129 = vector.extract_strided_slice %59 {offsets = [1, 0], sizes = [1, 80], strides = [1, 1]} : vector<4x80xf32> to vector<1x80xf32>
    %130 = vector.extract_strided_slice %55 {offsets = [5, 0], sizes = [1, 80], strides = [1, 1]} : vector<8x80xf32> to vector<1x80xf32>
    %131 = arith.mulf %129, %130 : vector<1x80xf32>
    %132 = arith.addf %128, %131 : vector<1x80xf32>
    %133 = vector.extract_strided_slice %59 {offsets = [2, 0], sizes = [1, 80], strides = [1, 1]} : vector<4x80xf32> to vector<1x80xf32>
    %134 = vector.extract_strided_slice %55 {offsets = [6, 0], sizes = [1, 80], strides = [1, 1]} : vector<8x80xf32> to vector<1x80xf32>
    %135 = arith.mulf %133, %134 : vector<1x80xf32>
    %136 = arith.addf %132, %135 : vector<1x80xf32>
    %137 = vector.extract_strided_slice %59 {offsets = [3, 0], sizes = [1, 80], strides = [1, 1]} : vector<4x80xf32> to vector<1x80xf32>
    %138 = vector.extract_strided_slice %55 {offsets = [7, 0], sizes = [1, 80], strides = [1, 1]} : vector<8x80xf32> to vector<1x80xf32>
    %139 = arith.mulf %137, %138 : vector<1x80xf32>
    %140 = arith.addf %136, %139 : vector<1x80xf32>
    %141 = tpu.concatenate %64, %72, %84, %100, %104, %112, %124, %140 in 0 : vector<1x80xf32>, vector<1x80xf32>, vector<1x80xf32>, vector<1x80xf32>, vector<1x80xf32>, vector<1x80xf32>, vector<1x80xf32>, vector<1x80xf32> -> vector<8x80xf32>
    %cst_22 = arith.constant 0.000000e+00 : f32
    %142 = vector.broadcast %cst_22 : f32 to vector<8x80xf32>
    %143 = arith.subf %142, %141 : vector<8x80xf32>
    %144 = math.exp %143 : vector<8x80xf32>
    %cst_23 = arith.constant 1.000000e+00 : f32
    %145 = vector.broadcast %cst_23 : f32 to vector<8x80xf32>
    %146 = arith.addf %145, %144 : vector<8x80xf32>
    %cst_24 = arith.constant 1.000000e+00 : f32
    %147 = vector.broadcast %cst_24 : f32 to vector<8x80xf32>
    %148 = arith.divf %147, %146 : vector<8x80xf32>
    %149 = arith.mulf %141, %148 : vector<8x80xf32>
    %150 = arith.truncf %149 : vector<8x80xf32> to vector<8x80xbf16>
    %c0_25 = arith.constant 0 : index
    %c0_26 = arith.constant 0 : index
    %151 = vector.load %arg7[%c0_25, %c0_26] : memref<80x259xbf16, #tpu.memory_space<vmem>>, vector<80x259xbf16>
    %cst_27 = arith.constant dense<0.000000e+00> : vector<8x259xf32>
    %152 = tpu.matmul %150, %151, %cst_27 {dimension_numbers = #tpu.dot_dimension_numbers<[1], [0], [0], [1], [0, 0, 1, 1], [], []>} : vector<8x80xbf16>, vector<80x259xbf16>, vector<8x259xf32> -> vector<8x259xf32>
    %153 = vector.extract_strided_slice %152 {offsets = [0, 0], sizes = [8, 128], strides = [1, 1]} : vector<8x259xf32> to vector<8x128xf32>
    %154 = vector.extract_strided_slice %152 {offsets = [0, 128], sizes = [8, 128], strides = [1, 1]} : vector<8x259xf32> to vector<8x128xf32>
    %155 = vector.extract_strided_slice %152 {offsets = [0, 256], sizes = [8, 3], strides = [1, 1]} : vector<8x259xf32> to vector<8x3xf32>
    %c0_28 = arith.constant 0 : index
    %c0_29 = arith.constant 0 : index
    %156 = vector.load %arg8[%c0_28, %c0_29] : memref<3x80xf32, #tpu.memory_space<vmem>>, vector<3x80xf32>
    %cst_30 = arith.constant dense<0.000000e+00> : vector<8x80xf32>
    %157 = tpu.matmul %155, %156, %cst_30 {dimension_numbers = #tpu.dot_dimension_numbers<[1], [0], [0], [1], [0, 0, 1, 1], [], []>} : vector<8x3xf32>, vector<3x80xf32>, vector<8x80xf32> -> vector<8x80xf32>
    %c0_31 = arith.constant 0 : index
    %c0_32 = arith.constant 0 : index
    %158 = vector.load %arg9[%c0_31, %c0_32] : memref<1x80xf32, #tpu.memory_space<vmem>>, vector<1x80xf32>
    %159 = vector.broadcast %158 : vector<1x80xf32> to vector<8x80xf32>
    %160 = arith.addf %157, %159 : vector<8x80xf32>
    %cst_33 = arith.constant 0.000000e+00 : f32
    %161 = vector.broadcast %cst_33 : f32 to vector<8x80xf32>
    %162 = arith.maximumf %160, %161 : vector<8x80xf32>
    %163 = math.absf %160 : vector<8x80xf32>
    %cst_34 = arith.constant 0.000000e+00 : f32
    %164 = vector.broadcast %cst_34 : f32 to vector<8x80xf32>
    %165 = arith.subf %164, %163 : vector<8x80xf32>
    %166 = math.exp %165 : vector<8x80xf32>
    %cst_35 = arith.constant 1.000000e+00 : f32
    %167 = vector.broadcast %cst_35 : f32 to vector<8x80xf32>
    %168 = arith.addf %167, %166 : vector<8x80xf32>
    %169 = math.log %168 : vector<8x80xf32>
    %170 = arith.addf %162, %169 : vector<8x80xf32>
    %c0_36 = arith.constant 0 : index
    %c0_37 = arith.constant 0 : index
    %171 = vector.load %arg10[%c0_36, %c0_37] : memref<128x80xf32, #tpu.memory_space<vmem>>, vector<128x80xf32>
    %172 = tpu.transpose %153, [1, 0] : vector<8x128xf32> -> vector<128x8xf32>
    %173 = arith.mulf %170, %149 : vector<8x80xf32>
    %cst_38 = arith.constant 0.000000e+00 : f32
    %174 = vector.broadcast %cst_38 : f32 to vector<128x80xf32>
    %175 = vector.extract_strided_slice %170 {offsets = [0, 0], sizes = [1, 80], strides = [1, 1]} : vector<8x80xf32> to vector<1x80xf32>
    %176 = vector.broadcast %175 : vector<1x80xf32> to vector<128x80xf32>
    %177 = arith.mulf %176, %171 : vector<128x80xf32>
    %178 = math.exp %177 : vector<128x80xf32>
    %179 = arith.mulf %178, %174 : vector<128x80xf32>
    %180 = vector.extract_strided_slice %172 {offsets = [0, 0], sizes = [128, 1], strides = [1, 1]} : vector<128x8xf32> to vector<128x1xf32>
    %181 = vector.extract_strided_slice %173 {offsets = [0, 0], sizes = [1, 80], strides = [1, 1]} : vector<8x80xf32> to vector<1x80xf32>
    %182 = vector.broadcast %180 : vector<128x1xf32> to vector<128x80xf32>
    %183 = vector.broadcast %181 : vector<1x80xf32> to vector<128x80xf32>
    %184 = arith.mulf %182, %183 : vector<128x80xf32>
    %185 = arith.addf %179, %184 : vector<128x80xf32>
    %186 = vector.extract_strided_slice %170 {offsets = [1, 0], sizes = [1, 80], strides = [1, 1]} : vector<8x80xf32> to vector<1x80xf32>
    %187 = vector.broadcast %186 : vector<1x80xf32> to vector<128x80xf32>
    %188 = arith.mulf %187, %171 : vector<128x80xf32>
    %189 = math.exp %188 : vector<128x80xf32>
    %190 = arith.mulf %189, %185 : vector<128x80xf32>
    %191 = vector.extract_strided_slice %172 {offsets = [0, 1], sizes = [128, 1], strides = [1, 1]} : vector<128x8xf32> to vector<128x1xf32>
    %192 = vector.extract_strided_slice %173 {offsets = [1, 0], sizes = [1, 80], strides = [1, 1]} : vector<8x80xf32> to vector<1x80xf32>
    %193 = vector.broadcast %191 : vector<128x1xf32> to vector<128x80xf32>
    %194 = vector.broadcast %192 : vector<1x80xf32> to vector<128x80xf32>
    %195 = arith.mulf %193, %194 : vector<128x80xf32>
    %196 = arith.addf %190, %195 : vector<128x80xf32>
    %197 = vector.extract_strided_slice %170 {offsets = [2, 0], sizes = [1, 80], strides = [1, 1]} : vector<8x80xf32> to vector<1x80xf32>
    %198 = vector.broadcast %197 : vector<1x80xf32> to vector<128x80xf32>
    %199 = arith.mulf %198, %171 : vector<128x80xf32>
    %200 = math.exp %199 : vector<128x80xf32>
    %201 = arith.mulf %200, %196 : vector<128x80xf32>
    %202 = vector.extract_strided_slice %172 {offsets = [0, 2], sizes = [128, 1], strides = [1, 1]} : vector<128x8xf32> to vector<128x1xf32>
    %203 = vector.extract_strided_slice %173 {offsets = [2, 0], sizes = [1, 80], strides = [1, 1]} : vector<8x80xf32> to vector<1x80xf32>
    %204 = vector.broadcast %202 : vector<128x1xf32> to vector<128x80xf32>
    %205 = vector.broadcast %203 : vector<1x80xf32> to vector<128x80xf32>
    %206 = arith.mulf %204, %205 : vector<128x80xf32>
    %207 = arith.addf %201, %206 : vector<128x80xf32>
    %208 = vector.extract_strided_slice %170 {offsets = [3, 0], sizes = [1, 80], strides = [1, 1]} : vector<8x80xf32> to vector<1x80xf32>
    %209 = vector.broadcast %208 : vector<1x80xf32> to vector<128x80xf32>
    %210 = arith.mulf %209, %171 : vector<128x80xf32>
    %211 = math.exp %210 : vector<128x80xf32>
    %212 = arith.mulf %211, %207 : vector<128x80xf32>
    %213 = vector.extract_strided_slice %172 {offsets = [0, 3], sizes = [128, 1], strides = [1, 1]} : vector<128x8xf32> to vector<128x1xf32>
    %214 = vector.extract_strided_slice %173 {offsets = [3, 0], sizes = [1, 80], strides = [1, 1]} : vector<8x80xf32> to vector<1x80xf32>
    %215 = vector.broadcast %213 : vector<128x1xf32> to vector<128x80xf32>
    %216 = vector.broadcast %214 : vector<1x80xf32> to vector<128x80xf32>
    %217 = arith.mulf %215, %216 : vector<128x80xf32>
    %218 = arith.addf %212, %217 : vector<128x80xf32>
    %219 = vector.extract_strided_slice %154 {offsets = [3, 0], sizes = [1, 128], strides = [1, 1]} : vector<8x128xf32> to vector<1x128xf32>
    %cst_39 = arith.constant dense<0.000000e+00> : vector<1x80xf32>
    %220 = tpu.matmul %219, %218, %cst_39 {dimension_numbers = #tpu.dot_dimension_numbers<[1], [0], [0], [1], [0, 0, 1, 1], [], []>} : vector<1x128xf32>, vector<128x80xf32>, vector<1x80xf32> -> vector<1x80xf32>
    %221 = vector.extract_strided_slice %149 {offsets = [3, 0], sizes = [1, 80], strides = [1, 1]} : vector<8x80xf32> to vector<1x80xf32>
    %cst_40 = arith.constant 0.000000e+00 : f32
    %222 = vector.broadcast %cst_40 : f32 to vector<128x80xf32>
    %223 = vector.extract_strided_slice %170 {offsets = [4, 0], sizes = [1, 80], strides = [1, 1]} : vector<8x80xf32> to vector<1x80xf32>
    %224 = vector.broadcast %223 : vector<1x80xf32> to vector<128x80xf32>
    %225 = arith.mulf %224, %171 : vector<128x80xf32>
    %226 = math.exp %225 : vector<128x80xf32>
    %227 = arith.mulf %226, %222 : vector<128x80xf32>
    %228 = vector.extract_strided_slice %172 {offsets = [0, 4], sizes = [128, 1], strides = [1, 1]} : vector<128x8xf32> to vector<128x1xf32>
    %229 = vector.extract_strided_slice %173 {offsets = [4, 0], sizes = [1, 80], strides = [1, 1]} : vector<8x80xf32> to vector<1x80xf32>
    %230 = vector.broadcast %228 : vector<128x1xf32> to vector<128x80xf32>
    %231 = vector.broadcast %229 : vector<1x80xf32> to vector<128x80xf32>
    %232 = arith.mulf %230, %231 : vector<128x80xf32>
    %233 = arith.addf %227, %232 : vector<128x80xf32>
    %234 = vector.extract_strided_slice %170 {offsets = [5, 0], sizes = [1, 80], strides = [1, 1]} : vector<8x80xf32> to vector<1x80xf32>
    %235 = vector.broadcast %234 : vector<1x80xf32> to vector<128x80xf32>
    %236 = arith.mulf %235, %171 : vector<128x80xf32>
    %237 = math.exp %236 : vector<128x80xf32>
    %238 = arith.mulf %237, %233 : vector<128x80xf32>
    %239 = vector.extract_strided_slice %172 {offsets = [0, 5], sizes = [128, 1], strides = [1, 1]} : vector<128x8xf32> to vector<128x1xf32>
    %240 = vector.extract_strided_slice %173 {offsets = [5, 0], sizes = [1, 80], strides = [1, 1]} : vector<8x80xf32> to vector<1x80xf32>
    %241 = vector.broadcast %239 : vector<128x1xf32> to vector<128x80xf32>
    %242 = vector.broadcast %240 : vector<1x80xf32> to vector<128x80xf32>
    %243 = arith.mulf %241, %242 : vector<128x80xf32>
    %244 = arith.addf %238, %243 : vector<128x80xf32>
    %245 = vector.extract_strided_slice %170 {offsets = [6, 0], sizes = [1, 80], strides = [1, 1]} : vector<8x80xf32> to vector<1x80xf32>
    %246 = vector.broadcast %245 : vector<1x80xf32> to vector<128x80xf32>
    %247 = arith.mulf %246, %171 : vector<128x80xf32>
    %248 = math.exp %247 : vector<128x80xf32>
    %249 = arith.mulf %248, %244 : vector<128x80xf32>
    %250 = vector.extract_strided_slice %172 {offsets = [0, 6], sizes = [128, 1], strides = [1, 1]} : vector<128x8xf32> to vector<128x1xf32>
    %251 = vector.extract_strided_slice %173 {offsets = [6, 0], sizes = [1, 80], strides = [1, 1]} : vector<8x80xf32> to vector<1x80xf32>
    %252 = vector.broadcast %250 : vector<128x1xf32> to vector<128x80xf32>
    %253 = vector.broadcast %251 : vector<1x80xf32> to vector<128x80xf32>
    %254 = arith.mulf %252, %253 : vector<128x80xf32>
    %255 = arith.addf %249, %254 : vector<128x80xf32>
    %256 = vector.extract_strided_slice %170 {offsets = [7, 0], sizes = [1, 80], strides = [1, 1]} : vector<8x80xf32> to vector<1x80xf32>
    %257 = vector.broadcast %256 : vector<1x80xf32> to vector<128x80xf32>
    %258 = arith.mulf %257, %171 : vector<128x80xf32>
    %259 = math.exp %258 : vector<128x80xf32>
    %260 = arith.mulf %259, %255 : vector<128x80xf32>
    %261 = vector.extract_strided_slice %172 {offsets = [0, 7], sizes = [128, 1], strides = [1, 1]} : vector<128x8xf32> to vector<128x1xf32>
    %262 = vector.extract_strided_slice %173 {offsets = [7, 0], sizes = [1, 80], strides = [1, 1]} : vector<8x80xf32> to vector<1x80xf32>
    %263 = vector.broadcast %261 : vector<128x1xf32> to vector<128x80xf32>
    %264 = vector.broadcast %262 : vector<1x80xf32> to vector<128x80xf32>
    %265 = arith.mulf %263, %264 : vector<128x80xf32>
    %266 = arith.addf %260, %265 : vector<128x80xf32>
    %267 = vector.extract_strided_slice %154 {offsets = [7, 0], sizes = [1, 128], strides = [1, 1]} : vector<8x128xf32> to vector<1x128xf32>
    %cst_41 = arith.constant dense<0.000000e+00> : vector<1x80xf32>
    %268 = tpu.matmul %267, %266, %cst_41 {dimension_numbers = #tpu.dot_dimension_numbers<[1], [0], [0], [1], [0, 0, 1, 1], [], []>} : vector<1x128xf32>, vector<128x80xf32>, vector<1x80xf32> -> vector<1x80xf32>
    %269 = vector.extract_strided_slice %149 {offsets = [7, 0], sizes = [1, 80], strides = [1, 1]} : vector<8x80xf32> to vector<1x80xf32>
    %270 = tpu.concatenate %220, %268 in 0 : vector<1x80xf32>, vector<1x80xf32> -> vector<2x80xf32>
    %271 = tpu.concatenate %221, %269 in 0 : vector<1x80xf32>, vector<1x80xf32> -> vector<2x80xf32>
    %c0_42 = arith.constant 0 : index
    %c0_43 = arith.constant 0 : index
    %272 = vector.load %arg11[%c0_42, %c0_43] : memref<1x80xf32, #tpu.memory_space<vmem>>, vector<1x80xf32>
    %273 = vector.broadcast %272 : vector<1x80xf32> to vector<2x80xf32>
    %274 = arith.mulf %273, %271 : vector<2x80xf32>
    %275 = arith.addf %270, %274 : vector<2x80xf32>
    %cst_44 = arith.constant 0.000000e+00 : f32
    %276 = vector.broadcast %cst_44 : f32 to vector<2x80xf32>
    %277 = arith.subf %276, %58 : vector<2x80xf32>
    %278 = math.exp %277 : vector<2x80xf32>
    %cst_45 = arith.constant 1.000000e+00 : f32
    %279 = vector.broadcast %cst_45 : f32 to vector<2x80xf32>
    %280 = arith.addf %279, %278 : vector<2x80xf32>
    %cst_46 = arith.constant 1.000000e+00 : f32
    %281 = vector.broadcast %cst_46 : f32 to vector<2x80xf32>
    %282 = arith.divf %281, %280 : vector<2x80xf32>
    %283 = arith.mulf %58, %282 : vector<2x80xf32>
    %284 = arith.mulf %275, %283 : vector<2x80xf32>
    %285 = arith.truncf %284 : vector<2x80xf32> to vector<2x80xbf16>
    %c0_47 = arith.constant 0 : index
    %c0_48 = arith.constant 0 : index
    %286 = vector.load %arg12[%c0_47, %c0_48] : memref<80x40xbf16, #tpu.memory_space<vmem>>, vector<80x40xbf16>
    %cst_49 = arith.constant dense<0.000000e+00> : vector<2x40xf32>
    %287 = tpu.matmul %285, %286, %cst_49 {dimension_numbers = #tpu.dot_dimension_numbers<[1], [0], [0], [1], [0, 0, 1, 1], [], []>} : vector<2x80xbf16>, vector<80x40xbf16>, vector<2x40xf32> -> vector<2x40xf32>
    %c0_50 = arith.constant 0 : index
    %c0_51 = arith.constant 0 : index
    %288 = vector.load %arg13[%c0_50, %c0_51] : memref<1x40xf32, #tpu.memory_space<vmem>>, vector<1x40xf32>
    %c0_52 = arith.constant 0 : index
    %c0_53 = arith.constant 0 : index
    %289 = vector.load %arg14[%c0_52, %c0_53] : memref<1x40xf32, #tpu.memory_space<vmem>>, vector<1x40xf32>
    %cst_54 = arith.constant dense<0.000000e+00> : vector<2xf32>
    %290 = vector.multi_reduction <add>, %287, %cst_54 [1] : vector<2x40xf32> to vector<2xf32>
    %291 = vector.shape_cast %290 : vector<2xf32> to vector<2x1xf32>
    %cst_55 = arith.constant 4.000000e+01 : f32
    %292 = vector.broadcast %cst_55 : f32 to vector<2x1xf32>
    %293 = arith.divf %291, %292 : vector<2x1xf32>
    %294 = vector.broadcast %293 : vector<2x1xf32> to vector<2x40xf32>
    %295 = arith.subf %287, %294 : vector<2x40xf32>
    %296 = arith.mulf %295, %295 : vector<2x40xf32>
    %cst_56 = arith.constant dense<0.000000e+00> : vector<2xf32>
    %297 = vector.multi_reduction <add>, %296, %cst_56 [1] : vector<2x40xf32> to vector<2xf32>
    %298 = vector.shape_cast %297 : vector<2xf32> to vector<2x1xf32>
    %cst_57 = arith.constant 4.000000e+01 : f32
    %299 = vector.broadcast %cst_57 : f32 to vector<2x1xf32>
    %300 = arith.divf %298, %299 : vector<2x1xf32>
    %301 = vector.broadcast %293 : vector<2x1xf32> to vector<2x40xf32>
    %302 = arith.subf %287, %301 : vector<2x40xf32>
    %cst_58 = arith.constant 9.99999974E-6 : f32
    %303 = vector.broadcast %cst_58 : f32 to vector<2x1xf32>
    %304 = arith.addf %300, %303 : vector<2x1xf32>
    %305 = math.rsqrt %304 : vector<2x1xf32>
    %306 = vector.broadcast %305 : vector<2x1xf32> to vector<2x40xf32>
    %307 = arith.mulf %302, %306 : vector<2x40xf32>
    %308 = vector.broadcast %288 : vector<1x40xf32> to vector<2x40xf32>
    %309 = arith.mulf %307, %308 : vector<2x40xf32>
    %310 = vector.broadcast %289 : vector<1x40xf32> to vector<2x40xf32>
    %311 = arith.addf %309, %310 : vector<2x40xf32>
    %c0_59 = arith.constant 0 : index
    %c0_60 = arith.constant 0 : index
    %312 = vector.load %arg15[%c0_59, %c0_60] : memref<2x40xf32, #tpu.memory_space<vmem>>, vector<2x40xf32>
    tpu.vector_store %arg15[%c0_59, %c0_60], %311 {strides = array<i32>} : memref<2x40xf32, #tpu.memory_space<vmem>>, vector<2x40xf32>,
    return
  }
  func.func @transform_0(%arg0: i32) -> (i32, i32) {
    %c0_i32 = arith.constant 0 : i32
    %c0_i32_0 = arith.constant 0 : i32
    return %arg0, %c0_i32 : i32, i32
  }
  func.func @transform_1(%arg0: i32) -> (i32, i32) {
    %c0_i32 = arith.constant 0 : i32
    %c0_i32_0 = arith.constant 0 : i32
    %c0_i32_1 = arith.constant 0 : i32
    return %c0_i32, %c0_i32_0 : i32, i32
  }
  func.func @transform_2(%arg0: i32) -> (i32, i32) {
    %c0_i32 = arith.constant 0 : i32
    %c0_i32_0 = arith.constant 0 : i32
    %c0_i32_1 = arith.constant 0 : i32
    return %c0_i32, %c0_i32_0 : i32, i32
  }
  func.func @transform_3(%arg0: i32) -> (i32, i32) {
    %c0_i32 = arith.constant 0 : i32
    %c0_i32_0 = arith.constant 0 : i32
    %c0_i32_1 = arith.constant 0 : i32
    return %c0_i32, %c0_i32_0 : i32, i32
  }
  func.func @transform_4(%arg0: i32) -> (i32, i32) {
    %c0_i32 = arith.constant 0 : i32
    %c0_i32_0 = arith.constant 0 : i32
    %c0_i32_1 = arith.constant 0 : i32
    return %c0_i32, %c0_i32_0 : i32, i32
  }
  func.func @transform_5(%arg0: i32) -> (i32, i32) {
    %c0_i32 = arith.constant 0 : i32
    %c0_i32_0 = arith.constant 0 : i32
    %c0_i32_1 = arith.constant 0 : i32
    return %c0_i32, %c0_i32_0 : i32, i32
  }
  func.func @transform_6(%arg0: i32) -> (i32, i32) {
    %c0_i32 = arith.constant 0 : i32
    %c0_i32_0 = arith.constant 0 : i32
    %c0_i32_1 = arith.constant 0 : i32
    return %c0_i32, %c0_i32_0 : i32, i32
  }
  func.func @transform_7(%arg0: i32) -> (i32, i32) {
    %c0_i32 = arith.constant 0 : i32
    %c0_i32_0 = arith.constant 0 : i32
    %c0_i32_1 = arith.constant 0 : i32
    return %c0_i32, %c0_i32_0 : i32, i32
  }
  func.func @transform_8(%arg0: i32) -> (i32, i32) {
    %c0_i32 = arith.constant 0 : i32
    %c0_i32_0 = arith.constant 0 : i32
    %c0_i32_1 = arith.constant 0 : i32
    return %c0_i32, %c0_i32_0 : i32, i32
  }
  func.func @transform_9(%arg0: i32) -> (i32, i32) {
    %c0_i32 = arith.constant 0 : i32
    %c0_i32_0 = arith.constant 0 : i32
    %c0_i32_1 = arith.constant 0 : i32
    return %c0_i32, %c0_i32_0 : i32, i32
  }
  func.func @transform_10(%arg0: i32) -> (i32, i32) {
    %c0_i32 = arith.constant 0 : i32
    %c0_i32_0 = arith.constant 0 : i32
    %c0_i32_1 = arith.constant 0 : i32
    return %c0_i32, %c0_i32_0 : i32, i32
  }
  func.func @transform_11(%arg0: i32) -> (i32, i32) {
    %c0_i32 = arith.constant 0 : i32
    %c0_i32_0 = arith.constant 0 : i32
    %c0_i32_1 = arith.constant 0 : i32
    return %c0_i32, %c0_i32_0 : i32, i32
  }
  func.func @transform_12(%arg0: i32) -> (i32, i32) {
    %c0_i32 = arith.constant 0 : i32
    %c0_i32_0 = arith.constant 0 : i32
    %c0_i32_1 = arith.constant 0 : i32
    return %c0_i32, %c0_i32_0 : i32, i32
  }
  func.func @transform_13(%arg0: i32) -> (i32, i32) {
    %c0_i32 = arith.constant 0 : i32
    %c0_i32_0 = arith.constant 0 : i32
    %c0_i32_1 = arith.constant 0 : i32
    return %c0_i32, %c0_i32_0 : i32, i32
  }
  func.func @transform_14(%arg0: i32) -> (i32, i32) {
    %c0_i32 = arith.constant 0 : i32
    %c0_i32_0 = arith.constant 0 : i32
    return %arg0, %c0_i32 : i32, i32
  }
}

module attributes {stable_mosaic.version = 11 : i64} {
  func.func @_merge_kernel(%arg0: i32, %arg1: memref<16x40xf32, #tpu.memory_space<vmem>>, %arg2: memref<16x40xf32, #tpu.memory_space<vmem>>, %arg3: memref<40x32xbf16, #tpu.memory_space<vmem>>, %arg4: memref<40x32xbf16, #tpu.memory_space<vmem>>, %arg5: memref<1x32xf32, #tpu.memory_space<vmem>>, %arg6: memref<16x32xf32, #tpu.memory_space<vmem>>) attributes {dimension_semantics = [#tpu.dimension_semantics<parallel>], iteration_bounds = array<i64: 1>, scalar_prefetch = 0 : i64, scratch_operands = 0 : i64, tpu.core_type = #tpu.core_type<tc>, window_params = [{transform_indices = @transform_0, window_bounds = array<i64: 16, 40>}, {transform_indices = @transform_1, window_bounds = array<i64: 16, 40>}, {pipeline_mode = #tpu.pipeline_mode<synchronous>, transform_indices = @transform_2, window_bounds = array<i64: 40, 32>}, {pipeline_mode = #tpu.pipeline_mode<synchronous>, transform_indices = @transform_3, window_bounds = array<i64: 40, 32>}, {pipeline_mode = #tpu.pipeline_mode<synchronous>, transform_indices = @transform_4, window_bounds = array<i64: 1, 32>}, {transform_indices = @transform_5, window_bounds = array<i64: 16, 32>}]} {
    %c0 = arith.constant 0 : index
    %c0_0 = arith.constant 0 : index
    %0 = vector.load %arg1[%c0, %c0_0] : memref<16x40xf32, #tpu.memory_space<vmem>>, vector<16x40xf32>
    %1 = arith.truncf %0 : vector<16x40xf32> to vector<16x40xbf16>
    %c0_1 = arith.constant 0 : index
    %c0_2 = arith.constant 0 : index
    %2 = vector.load %arg3[%c0_1, %c0_2] : memref<40x32xbf16, #tpu.memory_space<vmem>>, vector<40x32xbf16>
    %cst = arith.constant dense<0.000000e+00> : vector<16x32xf32>
    %3 = tpu.matmul %1, %2, %cst {dimension_numbers = #tpu.dot_dimension_numbers<[1], [0], [0], [1], [0, 0, 1, 1], [], []>} : vector<16x40xbf16>, vector<40x32xbf16>, vector<16x32xf32> -> vector<16x32xf32>
    %c0_3 = arith.constant 0 : index
    %c0_4 = arith.constant 0 : index
    %4 = vector.load %arg2[%c0_3, %c0_4] : memref<16x40xf32, #tpu.memory_space<vmem>>, vector<16x40xf32>
    %5 = arith.truncf %4 : vector<16x40xf32> to vector<16x40xbf16>
    %c0_5 = arith.constant 0 : index
    %c0_6 = arith.constant 0 : index
    %6 = vector.load %arg4[%c0_5, %c0_6] : memref<40x32xbf16, #tpu.memory_space<vmem>>, vector<40x32xbf16>
    %cst_7 = arith.constant dense<0.000000e+00> : vector<16x32xf32>
    %7 = tpu.matmul %5, %6, %cst_7 {dimension_numbers = #tpu.dot_dimension_numbers<[1], [0], [0], [1], [0, 0, 1, 1], [], []>} : vector<16x40xbf16>, vector<40x32xbf16>, vector<16x32xf32> -> vector<16x32xf32>
    %8 = arith.addf %3, %7 : vector<16x32xf32>
    %c0_8 = arith.constant 0 : index
    %c0_9 = arith.constant 0 : index
    %9 = vector.load %arg5[%c0_8, %c0_9] : memref<1x32xf32, #tpu.memory_space<vmem>>, vector<1x32xf32>
    %10 = vector.broadcast %9 : vector<1x32xf32> to vector<16x32xf32>
    %11 = arith.addf %8, %10 : vector<16x32xf32>
    %c0_10 = arith.constant 0 : index
    %c0_11 = arith.constant 0 : index
    %12 = vector.load %arg6[%c0_10, %c0_11] : memref<16x32xf32, #tpu.memory_space<vmem>>, vector<16x32xf32>
    tpu.vector_store %arg6[%c0_10, %c0_11], %11 {strides = array<i32>} : memref<16x32xf32, #tpu.memory_space<vmem>>, vector<16x32xf32>,
    return
  }
  func.func @transform_0(%arg0: i32) -> (i32, i32) {
    %c0_i32 = arith.constant 0 : i32
    %c0_i32_0 = arith.constant 0 : i32
    return %arg0, %c0_i32 : i32, i32
  }
  func.func @transform_1(%arg0: i32) -> (i32, i32) {
    %c0_i32 = arith.constant 0 : i32
    %c0_i32_0 = arith.constant 0 : i32
    return %arg0, %c0_i32 : i32, i32
  }
  func.func @transform_2(%arg0: i32) -> (i32, i32) {
    %c0_i32 = arith.constant 0 : i32
    %c0_i32_0 = arith.constant 0 : i32
    %c0_i32_1 = arith.constant 0 : i32
    return %c0_i32, %c0_i32_0 : i32, i32
  }
  func.func @transform_3(%arg0: i32) -> (i32, i32) {
    %c0_i32 = arith.constant 0 : i32
    %c0_i32_0 = arith.constant 0 : i32
    %c0_i32_1 = arith.constant 0 : i32
    return %c0_i32, %c0_i32_0 : i32, i32
  }
  func.func @transform_4(%arg0: i32) -> (i32, i32) {
    %c0_i32 = arith.constant 0 : i32
    %c0_i32_0 = arith.constant 0 : i32
    %c0_i32_1 = arith.constant 0 : i32
    return %c0_i32, %c0_i32_0 : i32, i32
  }
  func.func @transform_5(%arg0: i32) -> (i32, i32) {
    %c0_i32 = arith.constant 0 : i32
    %c0_i32_0 = arith.constant 0 : i32
    return %arg0, %c0_i32 : i32, i32
  }
}

module attributes {stable_mosaic.version = 11 : i64} {
  func.func @_pool_dec_kernel(%arg0: memref<2x32xf32, #tpu.memory_space<vmem>>, %arg1: memref<2x1xf32, #tpu.memory_space<vmem>>, %arg2: memref<32x32xbf16, #tpu.memory_space<vmem>>, %arg3: memref<1x32xf32, #tpu.memory_space<vmem>>, %arg4: memref<32x32xbf16, #tpu.memory_space<vmem>>, %arg5: memref<1x32xf32, #tpu.memory_space<vmem>>, %arg6: memref<1x32xf32, #tpu.memory_space<vmem>>, %arg7: memref<1x32xf32, #tpu.memory_space<vmem>>, %arg8: memref<32x6xbf16, #tpu.memory_space<vmem>>, %arg9: memref<1x6xf32, #tpu.memory_space<vmem>>, %arg10: memref<2x6xf32, #tpu.memory_space<vmem>>) attributes {dimension_semantics = [], scalar_prefetch = 0 : i64, scratch_operands = 0 : i64, tpu.core_type = #tpu.core_type<tc>} {
    %c0 = arith.constant 0 : index
    %c0_0 = arith.constant 0 : index
    %0 = vector.load %arg0[%c0, %c0_0] : memref<2x32xf32, #tpu.memory_space<vmem>>, vector<2x32xf32>
    %1 = arith.truncf %0 : vector<2x32xf32> to vector<2x32xbf16>
    %c0_1 = arith.constant 0 : index
    %c0_2 = arith.constant 0 : index
    %2 = vector.load %arg2[%c0_1, %c0_2] : memref<32x32xbf16, #tpu.memory_space<vmem>>, vector<32x32xbf16>
    %cst = arith.constant dense<0.000000e+00> : vector<2x32xf32>
    %3 = tpu.matmul %1, %2, %cst {dimension_numbers = #tpu.dot_dimension_numbers<[1], [0], [0], [1], [0, 0, 1, 1], [], []>} : vector<2x32xbf16>, vector<32x32xbf16>, vector<2x32xf32> -> vector<2x32xf32>
    %c0_3 = arith.constant 0 : index
    %c0_4 = arith.constant 0 : index
    %4 = vector.load %arg1[%c0_3, %c0_4] : memref<2x1xf32, #tpu.memory_space<vmem>>, vector<2x1xf32>
    %c0_5 = arith.constant 0 : index
    %c0_6 = arith.constant 0 : index
    %5 = vector.load %arg3[%c0_5, %c0_6] : memref<1x32xf32, #tpu.memory_space<vmem>>, vector<1x32xf32>
    %6 = vector.broadcast %4 : vector<2x1xf32> to vector<2x32xf32>
    %7 = vector.broadcast %5 : vector<1x32xf32> to vector<2x32xf32>
    %8 = arith.mulf %6, %7 : vector<2x32xf32>
    %9 = arith.addf %3, %8 : vector<2x32xf32>
    %10 = arith.truncf %9 : vector<2x32xf32> to vector<2x32xbf16>
    %c0_7 = arith.constant 0 : index
    %c0_8 = arith.constant 0 : index
    %11 = vector.load %arg4[%c0_7, %c0_8] : memref<32x32xbf16, #tpu.memory_space<vmem>>, vector<32x32xbf16>
    %cst_9 = arith.constant dense<0.000000e+00> : vector<2x32xf32>
    %12 = tpu.matmul %10, %11, %cst_9 {dimension_numbers = #tpu.dot_dimension_numbers<[1], [0], [0], [1], [0, 0, 1, 1], [], []>} : vector<2x32xbf16>, vector<32x32xbf16>, vector<2x32xf32> -> vector<2x32xf32>
    %c0_10 = arith.constant 0 : index
    %c0_11 = arith.constant 0 : index
    %13 = vector.load %arg5[%c0_10, %c0_11] : memref<1x32xf32, #tpu.memory_space<vmem>>, vector<1x32xf32>
    %14 = vector.broadcast %13 : vector<1x32xf32> to vector<2x32xf32>
    %15 = arith.addf %12, %14 : vector<2x32xf32>
    %c0_12 = arith.constant 0 : index
    %c0_13 = arith.constant 0 : index
    %16 = vector.load %arg6[%c0_12, %c0_13] : memref<1x32xf32, #tpu.memory_space<vmem>>, vector<1x32xf32>
    %c0_14 = arith.constant 0 : index
    %c0_15 = arith.constant 0 : index
    %17 = vector.load %arg7[%c0_14, %c0_15] : memref<1x32xf32, #tpu.memory_space<vmem>>, vector<1x32xf32>
    %cst_16 = arith.constant dense<0.000000e+00> : vector<2xf32>
    %18 = vector.multi_reduction <add>, %15, %cst_16 [1] : vector<2x32xf32> to vector<2xf32>
    %19 = vector.shape_cast %18 : vector<2xf32> to vector<2x1xf32>
    %cst_17 = arith.constant 3.200000e+01 : f32
    %20 = vector.broadcast %cst_17 : f32 to vector<2x1xf32>
    %21 = arith.divf %19, %20 : vector<2x1xf32>
    %22 = vector.broadcast %21 : vector<2x1xf32> to vector<2x32xf32>
    %23 = arith.subf %15, %22 : vector<2x32xf32>
    %24 = arith.mulf %23, %23 : vector<2x32xf32>
    %cst_18 = arith.constant dense<0.000000e+00> : vector<2xf32>
    %25 = vector.multi_reduction <add>, %24, %cst_18 [1] : vector<2x32xf32> to vector<2xf32>
    %26 = vector.shape_cast %25 : vector<2xf32> to vector<2x1xf32>
    %cst_19 = arith.constant 3.200000e+01 : f32
    %27 = vector.broadcast %cst_19 : f32 to vector<2x1xf32>
    %28 = arith.divf %26, %27 : vector<2x1xf32>
    %29 = vector.broadcast %21 : vector<2x1xf32> to vector<2x32xf32>
    %30 = arith.subf %15, %29 : vector<2x32xf32>
    %cst_20 = arith.constant 9.99999974E-6 : f32
    %31 = vector.broadcast %cst_20 : f32 to vector<2x1xf32>
    %32 = arith.addf %28, %31 : vector<2x1xf32>
    %33 = math.rsqrt %32 : vector<2x1xf32>
    %34 = vector.broadcast %33 : vector<2x1xf32> to vector<2x32xf32>
    %35 = arith.mulf %30, %34 : vector<2x32xf32>
    %36 = vector.broadcast %16 : vector<1x32xf32> to vector<2x32xf32>
    %37 = arith.mulf %35, %36 : vector<2x32xf32>
    %38 = vector.broadcast %17 : vector<1x32xf32> to vector<2x32xf32>
    %39 = arith.addf %37, %38 : vector<2x32xf32>
    %cst_21 = arith.constant 0.000000e+00 : f32
    %40 = vector.broadcast %cst_21 : f32 to vector<2x32xf32>
    %41 = arith.maximumf %39, %40 : vector<2x32xf32>
    %42 = arith.truncf %41 : vector<2x32xf32> to vector<2x32xbf16>
    %c0_22 = arith.constant 0 : index
    %c0_23 = arith.constant 0 : index
    %43 = vector.load %arg8[%c0_22, %c0_23] : memref<32x6xbf16, #tpu.memory_space<vmem>>, vector<32x6xbf16>
    %cst_24 = arith.constant dense<0.000000e+00> : vector<2x6xf32>
    %44 = tpu.matmul %42, %43, %cst_24 {dimension_numbers = #tpu.dot_dimension_numbers<[1], [0], [0], [1], [0, 0, 1, 1], [], []>} : vector<2x32xbf16>, vector<32x6xbf16>, vector<2x6xf32> -> vector<2x6xf32>
    %c0_25 = arith.constant 0 : index
    %c0_26 = arith.constant 0 : index
    %45 = vector.load %arg9[%c0_25, %c0_26] : memref<1x6xf32, #tpu.memory_space<vmem>>, vector<1x6xf32>
    %46 = vector.broadcast %45 : vector<1x6xf32> to vector<2x6xf32>
    %47 = arith.addf %44, %46 : vector<2x6xf32>
    %c0_27 = arith.constant 0 : index
    %c0_28 = arith.constant 0 : index
    %48 = vector.load %arg10[%c0_27, %c0_28] : memref<2x6xf32, #tpu.memory_space<vmem>>, vector<2x6xf32>
    tpu.vector_store %arg10[%c0_27, %c0_28], %47 {strides = array<i32>} : memref<2x6xf32, #tpu.memory_space<vmem>>, vector<2x6xf32>,
    return
  }
}

</mosaic_0001>

<bundles_post_ra>
// kernel: _lambda_.4
= control target key start
LH: loop header
LB: loop body
LE: loop exit
PB: predicated region body
PF: predicated region fallthrough
CT: control target
= control target key end

     0   :  { %vm48_vm0 = vcmask 1043456   ;;  %v278_v0 = vmov 0.0   ;;  %vm279_vm1 = vmmov 0   ;;  %vm44_vm2 = vcmask 64512   ;;  %s280_s22 = smov 32   ;;  %s281_s25 = smov 36   ;;  %s384_s3 = inlined_call_operand.vmem [shape: bf16[8,32], index: 3, kind: input, shape index: {}]   ;;  %s385_s0 = inlined_call_operand.vmem [shape: f32[16,8], index: 0, kind: input, shape index: {}]   ;;  %s386_s4 = inlined_call_operand.vmem [shape: f32[1,32], index: 4, kind: input, shape index: {}, may-alias: {4,6,8}]   ;;  %s387_s7 = inlined_call_operand.vmem [shape: bf16[32,32], index: 7, kind: input, shape index: {}]   ;;  %s388_s1 = inlined_call_operand.vmem [shape: f32[16,4], index: 1, kind: input, shape index: {}]   ;;  %s389_s2 = inlined_call_operand.vmem [shape: f32[16,4], index: 2, kind: input, shape index: {}]   ;;  %s390_s5 = inlined_call_operand.vmem [shape: f32[1,32], index: 5, kind: input, shape index: {}]   ;;  %s391_s6 = inlined_call_operand.vmem [shape: f32[1,32], index: 6, kind: input, shape index: {}, may-alias: {4,6,8}]   ;;  %s392_s8 = inlined_call_operand.vmem [shape: f32[1,32], index: 8, kind: input, shape index: {}, may-alias: {4,6,8}]   ;;  %s393_s9 = inlined_call_operand.vmem [shape: f32[16,40], index: 9, kind: output, shape index: {}]  }
   0x1   :  { %254 = vmatprep.subr.bf16.mxu0 %v278_v0  ;;  %v36_v1 = vld [vmem:[%s384_s3] sm:$0xf]  ;;  %256 = vmatprep.mubr.msk.bf16.mxu0 %vm279_vm1, %v278_v0  ;;  %v34_v3 = vld [vmem:[%s385_s0 + $0x8] sm:$0xff]  ;;  %vm95_vm3 = vcmask 261120   ;;  %vm231_vm4 = vcmask 293888   ;;  %vm234_vm5 = vcmask 326656  }
   0x2   :  { %v33_v2 = vld [vmem:[%s385_s0] sm:$0xff]  ;;  %v50_v4 = vsel %vm48_vm0, %v36_v1, 0  ;;  %260 = vmatprep.subr.bf16.mxu1 %v278_v0  ;;  %264 = vmatprep.mubr.msk.bf16.mxu1 %vm279_vm1, %v278_v0  ;;  %v273_v26 = vld [vmem:[%s387_s7 + $0x8] sm:$0xff]  }
   0x3   :  { %v35_v5 = vpack.c.bf16 %v34_v3, %v33_v2  ;;  %255 = vmatpush3.bf16.msra.mxu0 %v50_v4  ;;  %v241_v6 = vld [vmem:[%s386_s4] ss:$0 sm:$0xff]  ;;  %v210_v27 = vld [vmem:[%s388_s1 + $0x8] sm:$0xff] }
   0x4   :  { %v272_v25 = vld [vmem:[%s387_s7] sm:$0xff]   ;;  %v212_v30 = vld [vmem:[%s389_s2 + $0x8] sm:$0xff] }
   0x5   :  { %261 = vmatpush3.bf16.msra.mxu1 %v272_v25  ;;  %v209_v28 = vld [vmem:[%s388_s1] sm:$0xff] }
   0x6   :  { %257 = vmatmul.mubr.msk.bf16.vlgmr.msra.gmra.mrb[0].mxu0 %vm44_vm2, %v35_v5  ;;  %262 = vmatprep.subr.bf16.mxu1 %v278_v0  ;;  %v211_v29 = vld [vmem:[%s389_s2] sm:$0xff] }
   0x7   :  { %v243_v38 = vld [vmem:[%s390_s5] ss:$0 sm:$0xff] }
   0x8   :  { %v244_v42 = vld [vmem:[%s391_s6] ss:$0 sm:$0xff] }
   0x9   :  { %263 = vmatpush3.bf16.msra.mxu1 %v273_v26  ;;  %v245_v52 = vld [vmem:[%s392_s8] ss:$0 sm:$0xff] }
  0xd9   :  { %v86_v7 = vpop.f32.mrb[0].mxu0 }
  0xda   :  { %v87_v8 = vadd.f32 %v241_v6, %v86_v7  ;;  %v258_v9 = vpop.f32.mrb[1].mxu0 }
  0xdb   :  { %v89_v10 = vpop.f32.mrb[2].mxu0 }
  0xdc   :  { %v90_v11 = vadd.f32 %v241_v6, %v89_v10  ;;  %v259_v12 = vpop.f32.mrb[3].mxu0  ;;  %v96_v13 = vsel %vm95_vm3, %v87_v8, 0.0 }
  0xdd   :  { %97 = vadd.xlane.f32.xlu0 %v96_v13 }
  0xde   :  { %v99_v14 = vsel %vm95_vm3, %v90_v11, 0.0 }
  0xe1   :  { %100 = vadd.xlane.f32.xlu0 %v99_v14 }
  0xf7   :  { %215 = vrot.lane.b32.xlu0 %v209_v28, %s280_s22 }
 0x16a   :  { %v98_v15 = vpop.xlane.xlu0 %97 }
 0x16b   :  { %v103_v16 = vmul.f32 0.03125, %v98_v15 }
 0x16d   :  { %v105_v17 = vsub.f32 %v87_v8, %v103_v16 }
 0x16e   :  { %v101_v18 = vpop.xlane.xlu0 %100 }
 0x16f   :  { %v104_v19 = vmul.f32 0.03125, %v101_v18  ;;  %v107_v20 = vmul.f32 %v105_v17, %v105_v17 }
 0x171   :  { %v106_v21 = vsub.f32 %v90_v11, %v104_v19  ;;  %v109_v22 = vsel %vm95_vm3, %v107_v20, 0.0 }
 0x172   :  { %110 = vadd.xlane.f32.xlu1 %v109_v22  ;;  %v216_v54 = vpop.permute.xlu0 %215 }
 0x173   :  { %v108_v23 = vmul.f32 %v106_v21, %v106_v21 }
 0x175   :  { %v112_v24 = vsel %vm95_vm3, %v108_v23, 0.0 }
 0x176   :  { %113 = vadd.xlane.f32.xlu1 %v112_v24 }
 0x187   :  { %217 = vrot.lane.b32.xlu1 %v210_v27, %s280_s22 }
 0x18b   :  { %223 = vrot.lane.b32.xlu1 %v211_v29, %s281_s25 }
 0x18f   :  { %225 = vrot.lane.b32.xlu1 %v212_v30, %s281_s25 }
 0x1ff   :  { %v111_v31 = vpop.xlane.xlu1 %110 }
 0x200   :  { %v115_v32 = vmul.f32 0.03125, %v111_v31 }
 0x202   :  { %v117_v33 = vadd.f32 1e-05, %v115_v32 }
 0x203   :  { %v114_v34 = vpop.xlane.xlu1 %113 }
 0x204   :  { %274 = vrsqrt.f32 %v117_v33  ;;  %v116_v35 = vmul.f32 0.03125, %v114_v34 }
 0x206   :  { %v118_v36 = vadd.f32 1e-05, %v116_v35 }
 0x207   :  { %v218_v50 = vpop.permute.xlu1 %217 }
 0x208   :  { %276 = vrsqrt.f32 %v118_v36 }
 0x20b   :  { %v224_v51 = vpop.permute.xlu1 %223 }
 0x20e   :  { %v275_v37 = vpop.eup %274 }
 0x20f   :  { %v121_v39 = vmul.f32 %v275_v37, %v105_v17  ;;  %v226_v61 = vpop.permute.xlu1 %225 }
 0x211   :  { %v129_v40 = vmul.f32 %v243_v38, %v121_v39 }
 0x212   :  { %v277_v41 = vpop.eup %276 }
 0x213   :  { %v122_v43 = vmul.f32 %v277_v41, %v106_v21  ;;  %v137_v45 = vadd.f32 %v244_v42, %v129_v40 }
 0x215   :  { %v130_v44 = vmul.f32 %v243_v38, %v122_v43  ;;  %v139_v47 = vmax.f32 %v137_v45, 0.0 }
 0x217   :  { %v138_v46 = vadd.f32 %v244_v42, %v130_v44 }
 0x219   :  { %v140_v48 = vmax.f32 %v138_v46, 0.0 }
 0x21b   :  { %v141_v49 = vpack.c.bf16 %v140_v48, %v139_v47 }
 0x21d   :  { %265 = vmatmul.mubr.msk.bf16.vlgmr.msra.gmra.mrb[0].mxu1 %vm95_vm3, %v141_v49 }
 0x2f0   :  { %v202_v53 = vpop.f32.mrb[0].mxu1 }
 0x2f1   :  { %v203_v55 = vadd.f32 %v245_v52, %v202_v53  ;;  %v266_v56 = vpop.f32.mrb[1].mxu1 }
 0x2f2   :  { %v205_v57 = vpop.f32.mrb[2].mxu1 }
 0x2f3   :  { %v206_v58 = vadd.f32 %v245_v52, %v205_v57  ;;  %v229_v59 = vsel %vm95_vm3, %v203_v55, %v216_v54  ;;  %v267_v60 = vpop.f32.mrb[3].mxu1 }
 0x2f4   :  { %v232_v62 = vsel %vm231_vm4, %v229_v59, %v224_v51 }
 0x2f5   :  { %235 = vst.msk [vmem:[%s393_s9] sm:$0xff] %vm234_vm5, %v232_v62  ;;  %v230_v63 = vsel %vm95_vm3, %v206_v58, %v218_v50 }
 0x2f6   :  { %v233_v0 = vsel %vm231_vm4, %v230_v63, %v226_v61 }
 0x2f7   :  { %236 = vst.msk [vmem:[%s393_s9 + $0x8] sm:$0xff] %vm234_vm5, %v233_v0 }

// kernel: _lambda_.6
= control target key start
LH: loop header
LB: loop body
LE: loop exit
PB: predicated region body
PF: predicated region fallthrough
CT: control target
= control target key end

     0   :  { %v224_v0 = vmov 0.0   ;;  %vm225_vm0 = vmmov 0   ;;  %vm56_vm1 = vcmask 1043456   ;;  %vm52_vm2 = vcmask 326656   ;;  %s295_s3 = inlined_call_operand.vmem [shape: bf16[40,32], index: 3, kind: input, shape index: {}]   ;;  %s296_s2 = inlined_call_operand.vmem [shape: bf16[40,32], index: 2, kind: input, shape index: {}]   ;;  %s297_s1 = inlined_call_operand.vmem [shape: f32[16,40], index: 1, kind: input, shape index: {}]   ;;  %s298_s0 = inlined_call_operand.vmem [shape: f32[16,40], index: 0, kind: input, shape index: {}]   ;;  %s299_s4 = inlined_call_operand.vmem [shape: f32[1,32], index: 4, kind: input, shape index: {}]   ;;  %s300_s5 = inlined_call_operand.vmem [shape: f32[16,32], index: 5, kind: output, shape index: {}]  }
   0x1   :  { %196 = vmatprep.subr.bf16.mxu0 %v224_v0  ;;  %206 = vmatprep.subr.bf16.mxu1 %v224_v0  ;;  %v218_v1 = vld [vmem:[%s295_s3] sm:$0xff]   ;;  %v220_v3 = vld [vmem:[%s295_s3 + $0x8] sm:$0xff]   ;;  %v222_v5 = vld [vmem:[%s295_s3 + $0x10] ss:$0 sps:$4 sm:$0xff]   ;;  %vm172_vm3 = vcmask 261120  }
   0x2   :  { %v219_v2 = vld [vmem:[%s296_s2] sm:$0xff]   ;;  %202 = vmatprep.mubr.msk.bf16.mxu0 %vm225_vm0, %v224_v0  ;;  %212 = vmatprep.mubr.msk.bf16.mxu1 %vm225_vm0, %v224_v0  ;;  %v221_v4 = vld [vmem:[%s296_s2 + $0x8] sm:$0xff]   ;;  %v223_v6 = vld [vmem:[%s296_s2 + $0x10] ss:$0 sps:$4 sm:$0xff]   ;;  %v58_v9 = vsel %vm56_vm1, %v222_v5, 0 }
   0x3   :  { %197 = vmatpush3.bf16.msra.mxu0 %v218_v1  ;;  %207 = vmatpush3.bf16.msra.mxu1 %v219_v2  ;;  %v29_v7 = vld [vmem:[%s297_s1] sm:$0xff]  ;;  %v30_v8 = vld [vmem:[%s297_s1 + $0x8] sm:$0xff]  ;;  %v120_v12 = vsel %vm56_vm1, %v223_v6, 0 }
   0x4   :  { %198 = vmatprep.subr.bf16.mxu0 %v224_v0  ;;  %208 = vmatprep.subr.bf16.mxu1 %v224_v0  ;;  %v21_v10 = vld [vmem:[%s298_s0] sm:$0xff]  ;;  %v22_v11 = vld [vmem:[%s298_s0 + $0x8] sm:$0xff]  ;;  %v31_v13 = vpack.c.bf16 %v30_v8, %v29_v7 }
   0x5   :  { %v23_v14 = vpack.c.bf16 %v22_v11, %v21_v10  ;;  %v187_v17 = vld [vmem:[%s299_s4] ss:$0 sm:$0xff] }
   0x7   :  { %199 = vmatpush3.bf16.msra.mxu0 %v220_v3  ;;  %209 = vmatpush3.bf16.msra.mxu1 %v221_v4 }
   0x8   :  { %200 = vmatprep.subr.bf16.mxu0 %v224_v0  ;;  %210 = vmatprep.subr.bf16.mxu1 %v224_v0 }
   0xb   :  { %201 = vmatpush3.bf16.msra.mxu0 %v58_v9  ;;  %211 = vmatpush3.bf16.msra.mxu1 %v120_v12 }
   0xe   :  { %203 = vmatmul.mubr.msk.bf16.vlgmr.msra.gmra.mrb[0].mxu0 %vm52_vm2, %v31_v13  ;;  %213 = vmatmul.mubr.msk.bf16.vlgmr.msra.gmra.mrb[0].mxu1 %vm52_vm2, %v23_v14 }
  0xe1   :  { %v94_v15 = vpop.f32.mrb[0].mxu0  ;;  %v156_v16 = vpop.f32.mrb[0].mxu1 }
  0xe2   :  { %v204_v18 = vpop.f32.mrb[1].mxu0  ;;  %v157_v19 = vadd.f32 %v156_v16, %v94_v15  ;;  %v214_v20 = vpop.f32.mrb[1].mxu1 }
  0xe3   :  { %v97_v21 = vpop.f32.mrb[2].mxu0  ;;  %v159_v22 = vpop.f32.mrb[2].mxu1 }
  0xe4   :  { %v205_v23 = vpop.f32.mrb[3].mxu0  ;;  %v170_v24 = vadd.f32 %v187_v17, %v157_v19  ;;  %v160_v25 = vadd.f32 %v159_v22, %v97_v21  ;;  %v215_v26 = vpop.f32.mrb[3].mxu1 }
  0xe6   :  { %173 = vst.msk [vmem:[%s300_s5] sm:$0xff] %vm172_vm3, %v170_v24  ;;  %v171_v27 = vadd.f32 %v187_v17, %v160_v25 }
  0xe8   :  { %174 = vst.msk [vmem:[%s300_s5 + $0x8] sm:$0xff] %vm172_vm3, %v171_v27 }

// kernel: _lambda_.7
= control target key start
LH: loop header
LB: loop body
LE: loop exit
PB: predicated region body
PF: predicated region fallthrough
CT: control target
= control target key end

     0   :  { %v379_v1 = vmov 0.0   ;;  %vm380_vm0 = vmmov 0   ;;  %v381_v5 = vmov 0   ;;  %vm69_vm1 = vcmask 261120   ;;  %s495_s0 = inlined_call_operand.vmem [shape: f32[2,32], index: 0, kind: input, shape index: {}]   ;;  %s496_s1 = inlined_call_operand.vmem [shape: f32[2,1], index: 1, kind: input, shape index: {}]   ;;  %s497_s2 = inlined_call_operand.vmem [shape: bf16[32,32], index: 2, kind: input, shape index: {}]   ;;  %s498_s3 = inlined_call_operand.vmem [shape: f32[1,32], index: 3, kind: input, shape index: {}, may-alias: {3,5,7}]   ;;  %s499_s4 = inlined_call_operand.vmem [shape: bf16[32,32], index: 4, kind: input, shape index: {}]   ;;  %s500_s5 = inlined_call_operand.vmem [shape: f32[1,32], index: 5, kind: input, shape index: {}, may-alias: {3,5,7}]   ;;  %s501_s6 = inlined_call_operand.vmem [shape: f32[1,32], index: 6, kind: input, shape index: {}]   ;;  %s502_s7 = inlined_call_operand.vmem [shape: f32[1,32], index: 7, kind: input, shape index: {}, may-alias: {3,5,7}]   ;;  %s503_s8 = inlined_call_operand.vmem [shape: bf16[32,6], index: 8, kind: input, shape index: {}]   ;;  %s504_s9 = inlined_call_operand.vmem [shape: f32[1,6], index: 9, kind: input, shape index: {}]   ;;  %s505_s10 = inlined_call_operand.hbm [shape: f32[2,6], index: 10, kind: output, shape index: {}]  }
   0x1   :  { %v347_v0 = vld [vmem:[%s497_s2] sm:$0xff]   ;;  %318 = vmatprep.subr.bf16.mxu0 %v379_v1  ;;  %326 = vmatprep.subr.bf16.mxu1 %v379_v1  ;;  %v348_v2 = vld [vmem:[%s497_s2 + $0x8] sm:$0xff]  }
   0x2   :  { %319 = vmatpush3.bf16.msra.mxu0 %v347_v0  ;;  %322 = vmatprep.mubr.msk.bf16.mxu0 %vm380_vm0, %v379_v1  ;;  %v37_v3 = vld [vmem:[%s495_s0] sm:$0x3] }
   0x3   :  { %v43_v4 = vld [vmem:[%s496_s1] sm:$0x3]  ;;  %320 = vmatprep.subr.bf16.mxu0 %v379_v1  ;;  %346 = vset.pattern.permute.xlu0 %v381_v5  ;;  %v38_v7 = vpack.c.bf16 %v37_v3, %v37_v3 }
   0x4   :  { %v349_v6 = vld [vmem:[%s499_s4] sm:$0xff]   ;;  %47 = vperm.xlu0 %346, %v43_v4   ;;  %330 = vmatprep.mubr.msk.bf16.mxu1 %vm380_vm0, %v379_v1 }
   0x5   :  { %327 = vmatpush3.bf16.msra.mxu1 %v349_v6 }
   0x6   :  { %321 = vmatpush3.bf16.msra.mxu0 %v348_v2  ;;  %328 = vmatprep.subr.bf16.mxu1 %v379_v1 }
   0x7   :  { %15 = vsyncpa [#allocation3], 0  ;;  %334 = vmatprep.subr.bf16.mxu0 %v379_v1  ;;  %v350_v8 = vld [vmem:[%s499_s4 + $0x8] sm:$0xff]   ;;  %v295_v9 = vld [vmem:[%s498_s3] ss:$0 sm:$0xff]  ;;  %vm182_vm2 = vcmask 254976  }
   0x8   :  { %v299_v18 = vld [vmem:[%s500_s5] ss:$0 sm:$0xff]  ;;  %v352_v31 = vld [vmem:[%s503_s8 + $0x8] sm:$0xff]   ;;  %s382_s12 = smov [#allocation2]   ;;  %vm279_vm3 = vcmask 41984  }
   0x9   :  { %323 = vmatmul.mubr.msk.bf16.vlgmr.msra.gmra.mrb[0].mxu0 %vm69_vm1, %v38_v7  ;;  %329 = vmatpush3.bf16.msra.mxu1 %v350_v8  ;;  %v351_v30 = vld [vmem:[%s503_s8] sm:$0xff]   ;;  %s287_s13 = sshll.u32 %s382_s12, 4  ;;  %s288_s13 = int_to_ptr.vmem [resolvable:$true] %s287_s13 }
   0xa   :  { %338 = vmatprep.mubr.msk.bf16.mxu0 %vm380_vm0, %v379_v1  ;;  %335 = vmatpush3.bf16.msra.mxu0 %v351_v30  ;;  %v303_v36 = vld [vmem:[%s501_s6] ss:$0 sm:$0xff]  ;;  %s355_s6 = scalar_lea.vmem %s288_s13, 32  ;;  %p360_p1 = scmp.lt.s32.totalorder %s288_s13, %s288_s13 }
   0xb   :  { %336 = vmatprep.subr.bf16.mxu0 %v379_v1  ;;  %v304_v38 = vld [vmem:[%s502_s7] ss:$0 sm:$0xff]  ;;  %p356_p0 = scmp.ne.s32.totalorder %s288_s13, %s355_s6  ;;  %p361_p2 = scmp.lt.s32.totalorder %s355_s6, %s355_s6 }
   0xc   :  { %v305_v43 = vld [vmem:[%s504_s9] ss:$0 sm:$0xff] }
   0xd   :  { %p362_p3 = por %p361_p2, %p360_p1 }
   0xe   :  { %337 = vmatpush3.bf16.msra.mxu0 %v352_v31 }
   0xf   :  { %p363_p4 = pnand %p362_p3, %p356_p0 }
  0x83   :  { %v48_v10 = vpop.permute.xlu0 %47 }
  0x84   :  { %v56_v11 = vmul.f32 %v295_v9, %v48_v10 }
  0xdc   :  { %v107_v12 = vpop.f32.mrb[0].mxu0 }
  0xdd   :  { %v108_v13 = vadd.f32 %v107_v12, %v56_v11  ;;  %v324_v14 = vpop.f32.mrb[1].mxu0 }
  0xde   :  { %v110_v15 = vpop.f32.mrb[2].mxu0 }
  0xdf   :  { %v113_v16 = vpack.c.bf16 %v108_v13, %v108_v13  ;;  %v325_v17 = vpop.f32.mrb[3].mxu0 }
  0xe1   :  { %331 = vmatmul.mubr.msk.bf16.vlgmr.msra.gmra.mrb[0].mxu1 %vm69_vm1, %v113_v16 }
 0x1b4   :  { %v174_v19 = vpop.f32.mrb[0].mxu1 }
 0x1b5   :  { %v175_v20 = vadd.f32 %v299_v18, %v174_v19  ;;  %v332_v21 = vpop.f32.mrb[1].mxu1 }
 0x1b6   :  { %v177_v22 = vpop.f32.mrb[2].mxu1 }
 0x1b7   :  { %v333_v23 = vpop.f32.mrb[3].mxu1  ;;  %v183_v24 = vsel %vm182_vm2, %v175_v20, 0.0 }
 0x1b8   :  { %184 = vadd.xlane.f32.xlu0 %v183_v24 }
 0x245   :  { %v185_v25 = vpop.xlane.xlu0 %184 }
 0x246   :  { %v187_v26 = vmul.f32 0.03125, %v185_v25 }
 0x248   :  { %v188_v27 = vsub.f32 %v175_v20, %v187_v26 }
 0x24a   :  { %v189_v28 = vmul.f32 %v188_v27, %v188_v27 }
 0x24c   :  { %v190_v29 = vsel %vm182_vm2, %v189_v28, 0.0 }
 0x24d   :  { %191 = vadd.xlane.f32.xlu1 %v190_v29 }
 0x2da   :  { %v192_v32 = vpop.xlane.xlu1 %191 }
 0x2db   :  { %v193_v33 = vmul.f32 0.03125, %v192_v32 }
 0x2dd   :  { %v194_v34 = vadd.f32 1e-05, %v193_v33 }
 0x2df   :  { %353 = vrsqrt.f32 %v194_v34 }
 0x2e9   :  { %v354_v35 = vpop.eup %353 }
 0x2ea   :  { %v196_v37 = vmul.f32 %v354_v35, %v188_v27 }
 0x2ec   :  { %v203_v39 = vmul.f32 %v303_v36, %v196_v37 }
 0x2ee   :  { %v210_v40 = vadd.f32 %v304_v38, %v203_v39 }
 0x2f0   :  { %v211_v41 = vmax.f32 %v210_v40, 0.0 }
 0x2f2   :  { %v212_v42 = vpack.c.bf16 %v211_v41, %v211_v41 }
 0x2f4   :  { %339 = vmatmul.mubr.msk.bf16.vlgmr.msra.gmra.mrb[4].mxu0 %vm69_vm1, %v212_v42 }
 0x3c7   :  { %v273_v44 = vpop.f32.mrb[4].mxu0 }
 0x3c8   :  { %v274_v45 = vadd.f32 %v305_v43, %v273_v44  ;;  %v340_v46 = vpop.f32.mrb[5].mxu0 }
 0x3c9   :  { %v276_v47 = vpop.f32.mrb[6].mxu0 }
 0x3ca   :  { %v341_v48 = vpop.f32.mrb[7].mxu0  ;;  %280 = vst.msk [vmem:[#allocation2] sm:$0x3] %vm279_vm3, %v274_v45 }
 0x3cb   :  { %366 = shalt.err (!%p363_p4)
}
 0x3cc   :  { %s367_s9 = scalar_lea.hbm %s505_s10, 32 }
 0x3cd   :  { %p368_p5 = scmp.ne.s32.totalorder %s505_s10, %s367_s9  ;;  %p371_p6 = scmp.lt.u32.totalorder %s367_s9, %s505_s10 }
 0x3cf   :  { %p373_p7 = pnand %p371_p6, %p368_p5 }
 0x3d1   :  { %376 = shalt.err (!%p373_p7)
}
 0x3d2   :  { %290 = dma.vmem_to_hbm [thread:$0]  %s288_s13, 32, %s505_s10, [#allocation3]  }
 0x3d3   :  { %377 = dma.done.wait [#allocation3], 32  }
 0x3d4   :  { %378 = vsyncadd [#allocation3], 4294967264 }
 0x3d5   :  { %294 = vsyncpa [#allocation3], 1 }

// kernel: _lambda_.5
= control target key start
LH: loop header
LB: loop body
LE: loop exit
PB: predicated region body
PF: predicated region fallthrough
CT: control target
= control target key end

     0   :  { %vm57_vm0 = vcmask 326656   ;;  %v5565_v11 = vmov 0.0   ;;  %vm155_vm1 = vcmask 31744   ;;  %v165_v21 = vlaneseq  ;;  %s5550_s1 = inlined_call_operand.vmem [shape: f32[40,4], index: 1, kind: input, shape index: {}]   ;;  %s5551_s0 = inlined_call_operand.vmem [shape: f32[32,40], index: 0, kind: input, shape index: {}]   ;;  %s5552_s2 = inlined_call_operand.vmem [shape: bf16[40,80], index: 2, kind: input, shape index: {}]   ;;  %s5553_s3 = inlined_call_operand.vmem [shape: bf16[40,80], index: 3, kind: input, shape index: {}]   ;;  %s5554_s6 = inlined_call_operand.vmem [shape: bf16[80,259], index: 6, kind: input, shape index: {}]   ;;  %s5555_s4 = inlined_call_operand.vmem [shape: f32[4,80], index: 4, kind: input, shape index: {}]   ;;  %s5556_s5 = inlined_call_operand.vmem [shape: f32[1,80], index: 5, kind: input, shape index: {}]   ;;  %s5557_s7 = inlined_call_operand.vmem [shape: f32[3,80], index: 7, kind: input, shape index: {}]   ;;  %s5558_s8 = inlined_call_operand.vmem [shape: f32[1,80], index: 8, kind: input, shape index: {}]   ;;  %s5559_s9 = inlined_call_operand.vmem [shape: f32[128,80], index: 9, kind: input, shape index: {}]   ;;  %s5560_s11 = inlined_call_operand.vmem [shape: bf16[80,40], index: 11, kind: input, shape index: {}]   ;;  %s5561_s10 = inlined_call_operand.vmem [shape: f32[1,80], index: 10, kind: input, shape index: {}]   ;;  %s5562_s12 = inlined_call_operand.vmem [shape: f32[1,40], index: 12, kind: input, shape index: {}]   ;;  %s5563_s13 = inlined_call_operand.vmem [shape: f32[1,40], index: 13, kind: input, shape index: {}]   ;;  %s5564_s14 = inlined_call_operand.vmem [shape: f32[2,40], index: 14, kind: output, shape index: {}]  }
   0x1   :  { %v52_v0 = vld [vmem:[%s5550_s1] sm:$0xff]  ;;  %v53_v1 = vld [vmem:[%s5550_s1 + $0x8] sm:$0xff]  ;;  %v54_v2 = vld [vmem:[%s5550_s1 + $0x10] sm:$0xff] }
   0x2   :  { %v3584_v3 = vpack.c.bf16 %v53_v1, %v52_v0  ;;  %v55_v4 = vld [vmem:[%s5550_s1 + $0x18] sm:$0xff]  ;;  %v4188_v5 = vld [vmem:[%s5551_s0] sm:$0xff]  ;;  %v4198_v8 = vld [vmem:[%s5551_s0 + $0x8] sm:$0xff]  ;;  %v4221_v27 = vshrl.u32 %v165_v21, 7 }
   0x3   :  { %v3588_v6 = vpack.c.bf16 %v55_v4, %v54_v2  ;;  %3455 = vmatprep.mubr.msk.f32.mxu0 %vm57_vm0, %v4188_v5  ;;  %v56_v7 = vld [vmem:[%s5550_s1 + $0x20] sm:$0xff]  ;;  %v4203_v9 = vld [vmem:[%s5551_s0 + $0x10] sm:$0xff]  ;;  %v4212_v10 = vld [vmem:[%s5551_s0 + $0x18] sm:$0xff] }
   0x4   :  { %3585 = vmatprep.subr.bf16.mxu0 %v3584_v3  ;;  %v4224_v32 = vadd.s32 8, %v4221_v27  ;;  %v4235_v55 = vsub.s32 0, %v4221_v27  ;;  %v4241_v61 = vsub.s32 1, %v4221_v27  ;;  %v4248_v2 = vsub.s32 2, %v4221_v27 }
   0x5   :  { %3587 = vmatpush3.bf16.msra.mxu0 %v3584_v3 }
   0x6   :  { %3589 = vmatprep.subr.bf16.mxu0 %v3588_v6 }
   0x9   :  { %3591 = vmatpush3.bf16.msra.mxu0 %v3588_v6  ;;  %v4253_v6 = vsub.s32 3, %v4221_v27 }
   0xa   :  { %3453 = vmatprep.subr.mxu0 %v56_v7 }
   0xd   :  { %3454 = vmatpush3.msra.mxu0 %v56_v7 }
   0xe   :  { %3456 = vmatmul.mubr.msk.f32.vlgmr.msra.gmra.mrb[0].mxu0 %vm57_vm0, %v4198_v8  ;;  %3461 = vmatprep.subr.bf16.mxu0 %v5565_v11 }
   0xf   :  { %3458 = vmatprep.mubr.msk.f32.mxu0 %vm57_vm0, %v4203_v9 }
  0x12   :  { %3459 = vmatmul.mubr.msk.f32.gmra.mrb[2].mxu0 %vm57_vm0, %v4212_v10 }
  0xe1   :  { %v3457_v12 = vpop.f32.mrb[0].mxu0 }
  0xe2   :  { %v157_v13 = vsel %vm155_vm1, %v3457_v12, -inf  ;;  %v136_v14 = vpop.f32.mrb[1].mxu0 }
  0xe3   :  { %v156_v15 = vsel %vm155_vm1, %v136_v14, -inf }
  0xe4   :  { %v158_v16 = vmax.f32 %v156_v15, %v157_v13  ;;  %v4258_v13 = vsub.s32 4, %v4221_v27 }
  0xe5   :  { %v3460_v17 = vpop.f32.mrb[2].mxu0 }
  0xe6   :  { %v159_v18 = vrot.slane %v158_v16, 4  ;;  %v531_v19 = vsel %vm155_vm1, %v3460_v17, -inf  ;;  %v146_v20 = vpop.f32.mrb[3].mxu0 }
  0xe7   :  { %v530_v22 = vsel %vm155_vm1, %v146_v20, -inf }
  0xe8   :  { %v160_v23 = vmax.f32 %v158_v16, %v159_v18  ;;  %v532_v24 = vmax.f32 %v530_v22, %v531_v19  ;;  %v4263_v16 = vsub.s32 5, %v4221_v27  ;;  %v4268_v19 = vsub.s32 6, %v4221_v27 }
  0xe9   :  { %v4273_v22 = vsub.s32 7, %v4221_v27 }
  0xea   :  { %v161_v25 = vrot.slane %v160_v23, 2  ;;  %v533_v26 = vrot.slane %v532_v24, 4 }
  0xec   :  { %v162_v28 = vmax.f32 %v160_v23, %v161_v25  ;;  %v534_v29 = vmax.f32 %v532_v24, %v533_v26 }
  0xee   :  { %v163_v30 = vrot.slane %v162_v28, 1  ;;  %v535_v31 = vrot.slane %v534_v29, 2 }
  0xf0   :  { %v164_v33 = vmax.f32 %v162_v28, %v163_v30  ;;  %v536_v34 = vmax.f32 %v534_v29, %v535_v31 }
  0xf2   :  { %vm168_vm2 = vcmp.ge.f32.partialorder %v136_v14, %v164_v33  ;;  %vm169_vm3 = vcmp.ge.f32.partialorder %v3457_v12, %v164_v33  ;;  %v537_v35 = vrot.slane %v536_v34, 1 }
  0xf3   :  { %v170_v36 = vsel %vm168_vm2, %v4221_v27, 17  ;;  %v171_v37 = vsel %vm169_vm3, %v4224_v32, 17  ;;  %vm4087_vm3 = vmmov 0  }
  0xf4   :  { %v172_v38 = vsel %vm155_vm1, %v170_v36, 2147483647  ;;  %v173_v39 = vsel %vm155_vm1, %v171_v37, 2147483647  ;;  %v538_v40 = vmax.f32 %v536_v34, %v537_v35  ;;  %3467 = vmatprep.mubr.msk.bf16.mxu0 %vm4087_vm3, %v5565_v11 }
  0xf5   :  { %vm174_vm4 = vcmp.lt.s32.totalorder %v172_v38, %v173_v39 }
  0xf6   :  { %v175_v41 = vsel %vm174_vm4, %v172_v38, %v173_v39  ;;  %vm539_vm5 = vcmp.ge.f32.partialorder %v146_v20, %v538_v40  ;;  %vm540_vm6 = vcmp.ge.f32.partialorder %v3460_v17, %v538_v40  ;;  %vm903_vm4 = vcmask 1043456  }
  0xf7   :  { %v176_v42 = vrot.slane %v175_v41, 4  ;;  %v541_v43 = vsel %vm539_vm5, %v4221_v27, 17  ;;  %v542_v44 = vsel %vm540_vm6, %v4224_v32, 17  ;;  %vm497_vm5 = vcmask 322560  }
  0xf8   :  { %v543_v45 = vsel %vm155_vm1, %v541_v43, 2147483647  ;;  %v544_v46 = vsel %vm155_vm1, %v542_v44, 2147483647  ;;  %v3785_v44 = vld [vmem:[%s5552_s2] sm:$0xff]   ;;  %vm910_vm6 = vcmask 1040384  }
  0xf9   :  { %vm177_vm7 = vcmp.lt.s32.totalorder %v175_v41, %v176_v42  ;;  %vm545_vm8 = vcmp.lt.s32.totalorder %v543_v45, %v544_v46  ;;  %3462 = vmatpush3.bf16.msra.mxu0 %v3785_v44 }
  0xfa   :  { %v178_v47 = vsel %vm177_vm7, %v175_v41, %v176_v42  ;;  %v546_v48 = vsel %vm545_vm8, %v543_v45, %v544_v46  ;;  %v3786_v45 = vld [vmem:[%s5552_s2 + $0x8] sm:$0xff]   ;;  %3463 = vmatprep.subr.bf16.mxu0 %v5565_v11  ;;  %vm1338_vm7 = vcmask 1042432   ;;  %vm1341_vm8 = vcmask 1044480  }
  0xfb   :  { %v179_v49 = vrot.slane %v178_v47, 2  ;;  %v547_v50 = vrot.slane %v546_v48, 4 }
  0xfd   :  { %vm180_vm9 = vcmp.lt.s32.totalorder %v178_v47, %v179_v49  ;;  %vm548_vm10 = vcmp.lt.s32.totalorder %v546_v48, %v547_v50  ;;  %3464 = vmatpush3.bf16.msra.mxu0 %v3786_v45 }
  0xfe   :  { %v181_v51 = vsel %vm180_vm9, %v178_v47, %v179_v49  ;;  %v549_v52 = vsel %vm548_vm10, %v546_v48, %v547_v50  ;;  %v3787_v47 = vld [vmem:[%s5552_s2 + $0x10] ss:$0 sps:$4 sm:$0xff]   ;;  %3465 = vmatprep.subr.bf16.mxu0 %v5565_v11  ;;  %v4088_v49 = vmov 1966171168   ;;  %vm1343_vm9 = vcmask 1045504  }
  0xff   :  { %v182_v53 = vrot.slane %v181_v51, 1  ;;  %v550_v54 = vrot.slane %v549_v52, 2  ;;  %v937_v48 = vsel %vm903_vm4, %v3787_v47, 0  ;;  %v305_v50 = vunpack.c.l.s4 %v4088_v49 }
 0x100   :  { %vm1345_vm10 = vcmask 1046528  }
 0x101   :  { %vm183_vm11 = vcmp.lt.s32.totalorder %v181_v51, %v182_v53  ;;  %vm551_vm12 = vcmp.lt.s32.totalorder %v549_v52, %v550_v54  ;;  %3466 = vmatpush3.bf16.msra.mxu0 %v937_v48 }
 0x102   :  { %v184_v56 = vsel %vm183_vm11, %v181_v51, %v182_v53  ;;  %v552_v57 = vsel %vm551_vm12, %v549_v52, %v550_v54  ;;  %3471 = vmatprep.subr.bf16.mxu0 %v5565_v11  ;;  %v306_v51 = vunpack.c.0.s8 %v305_v50  ;;  %vm1455_vm11 = vcmask 654336  }
 0x103   :  { %vm185_vm13 = vcmp.eq.s32.totalorder %v4221_v27, %v184_v56  ;;  %v553_v58 = vrot.slane %v552_v57, 1  ;;  %vm186_vm1 = vcmp.eq.s32.totalorder %v4224_v32, %v184_v56  ;;  %vm1548_vm12 = vcmask 23552  }
 0x104   :  { %v3339_v59 = vsel %vm185_vm13, 1.0, %v5565_v11  ;;  %v3340_v25 = vsel %vm186_vm1, 1.0, %v5565_v11  ;;  %v4314_v52 = vsub.s32 %v306_v51, %v4221_v27  ;;  %vm3301_vm13 = vcmask 320512  }
 0x105   :  { %vm554_vm14 = vcmp.lt.s32.totalorder %v552_v57, %v553_v58  ;;  %v194_v60 = vrot.slane %v3339_v59, %v4235_v55  ;;  %v201_v0 = vrot.slane %v3339_v59, %v4241_v61  ;;  %v208_v3 = vrot.slane %v3339_v59, %v4248_v2 }
 0x106   :  { %v555_v62 = vsel %vm554_vm14, %v552_v57, %v553_v58  ;;  %v215_v7 = vrot.slane %v3339_v59, %v4253_v6  ;;  %v222_v14 = vrot.slane %v3339_v59, %v4258_v13  ;;  %v229_v17 = vrot.slane %v3339_v59, %v4263_v16 }
 0x107   :  { %vm556_vm15 = vcmp.eq.s32.totalorder %v4221_v27, %v555_v62  ;;  %196 = vbcast.lane.b32.xlu1 %v194_v60, 256  ;;  %v236_v20 = vrot.slane %v3339_v59, %v4268_v19  ;;  %v243_v23 = vrot.slane %v3339_v59, %v4273_v22  ;;  %vm557_vm2 = vcmp.eq.s32.totalorder %v4224_v32, %v555_v62 }
 0x108   :  { %v3341_v63 = vsel %vm556_vm15, 1.0, %v5565_v11  ;;  %v250_v26 = vrot.slane %v3340_v25, %v4235_v55  ;;  %v3342_v29 = vsel %vm557_vm2, 1.0, %v5565_v11  ;;  %v257_v30 = vrot.slane %v3340_v25, %v4241_v61 }
 0x109   :  { %v565_v1 = vrot.slane %v3341_v63, %v4235_v55  ;;  %v572_v4 = vrot.slane %v3341_v63, %v4241_v61  ;;  %v579_v12 = vrot.slane %v3341_v63, %v4248_v2  ;;  %v586_v15 = vrot.slane %v3341_v63, %v4253_v6 }
 0x10a   :  { %v593_v18 = vrot.slane %v3341_v63, %v4258_v13  ;;  %v600_v21 = vrot.slane %v3341_v63, %v4263_v16  ;;  %v607_v24 = vrot.slane %v3341_v63, %v4268_v19  ;;  %v614_v28 = vrot.slane %v3341_v63, %v4273_v22 }
 0x10b   :  { %203 = vbcast.lane.b32.xlu1 %v201_v0, 256  ;;  %567 = vbcast.lane.b32.xlu0 %v565_v1, 256  ;;  %v621_v31 = vrot.slane %v3342_v29, %v4235_v55  ;;  %v264_v33 = vrot.slane %v3340_v25, %v4248_v2  ;;  %v628_v32 = vrot.slane %v3342_v29, %v4241_v61 }
 0x10c   :  { %v271_v34 = vrot.slane %v3340_v25, %v4253_v6  ;;  %v635_v35 = vrot.slane %v3342_v29, %v4248_v2  ;;  %v278_v36 = vrot.slane %v3340_v25, %v4258_v13  ;;  %v642_v37 = vrot.slane %v3342_v29, %v4253_v6 }
 0x10d   :  { %v285_v38 = vrot.slane %v3340_v25, %v4263_v16  ;;  %v649_v39 = vrot.slane %v3342_v29, %v4258_v13  ;;  %v292_v40 = vrot.slane %v3340_v25, %v4268_v19  ;;  %v656_v41 = vrot.slane %v3342_v29, %v4263_v16 }
 0x10e   :  { %v299_v42 = vrot.slane %v3340_v25, %v4273_v22  ;;  %v663_v43 = vrot.slane %v3342_v29, %v4268_v19  ;;  %v670_v46 = vrot.slane %v3342_v29, %v4273_v22  ;;  %v310_v54 = vrot.slane %v4188_v5, %v4314_v52 }
 0x10f   :  { %210 = vbcast.lane.b32.xlu1 %v208_v3, 256  ;;  %574 = vbcast.lane.b32.xlu0 %v572_v4, 256  ;;  %v303_v57 = vcombine.high %v4188_v5, %v4188_v5  ;;  %v681_v60 = vrot.slane %v4203_v9, %v4314_v52  ;;  %v674_v62 = vcombine.high %v4203_v9, %v4203_v9 }
 0x110   :  { %v318_v56 = vcombine.high %v310_v54, %v310_v54  ;;  %v326_v63 = vrot.slane %v310_v54, %v4314_v52 }
 0x111   :  { %v689_v0 = vcombine.high %v681_v60, %v681_v60  ;;  %v317_v1 = vrot.slane %v303_v57, %v4314_v52  ;;  %v688_v5 = vrot.slane %v674_v62, %v4314_v52 }
 0x112   :  { %v340_v27 = vrot.slane %v318_v56, %v4314_v52 }
 0x113   :  { %217 = vbcast.lane.b32.xlu1 %v215_v7, 256  ;;  %581 = vbcast.lane.b32.xlu0 %v579_v12, 256  ;;  %v348_v7 = vcombine.high %v326_v63, %v326_v63  ;;  %v319_v12 = vcombine.high %v317_v1, %v317_v1 }
 0x114   :  { %v350_v9 = vcombine.high %v340_v27, %v340_v27 }
 0x115   :  { %v412_v25 = vrot.slane %v348_v7, %v4235_v55  ;;  %v347_v29 = vrot.slane %v319_v12, %v4314_v52 }
 0x117   :  { %224 = vbcast.lane.b32.xlu1 %v222_v14, 256  ;;  %588 = vbcast.lane.b32.xlu0 %v586_v15, 256  ;;  %v408_v14 = vrot.slane %v340_v27, %v4235_v55  ;;  %v697_v15 = vrot.slane %v681_v60, %v4314_v52 }
 0x11b   :  { %231 = vbcast.lane.b32.xlu1 %v229_v17, 256  ;;  %595 = vbcast.lane.b32.xlu0 %v593_v18, 256  ;;  %v711_v17 = vrot.slane %v689_v0, %v4314_v52 }
 0x11f   :  { %238 = vbcast.lane.b32.xlu1 %v236_v20, 256  ;;  %602 = vbcast.lane.b32.xlu0 %v600_v21, 256  ;;  %v333_v21 = vrot.slane %v317_v1, %v4314_v52 }
 0x121   :  { %v420_v44 = vrot.slane %v333_v21, %v4235_v55 }
 0x123   :  { %245 = vbcast.lane.b32.xlu1 %v243_v23, 256  ;;  %609 = vbcast.lane.b32.xlu0 %v607_v24, 256  ;;  %v690_v23 = vcombine.high %v688_v5, %v688_v5  ;;  %v404_v24 = vrot.slane %v326_v63, %v4235_v55 }
 0x127   :  { %252 = vbcast.lane.b32.xlu1 %v250_v26, 256  ;;  %616 = vbcast.lane.b32.xlu0 %v614_v28, 256  ;;  %v719_v26 = vcombine.high %v697_v15, %v697_v15  ;;  %v721_v28 = vcombine.high %v711_v17, %v711_v17 }
 0x129   :  { %v787_v45 = vrot.slane %v721_v28, %v4235_v55 }
 0x12b   :  { %259 = vbcast.lane.b32.xlu1 %v257_v30, 256  ;;  %623 = vbcast.lane.b32.xlu0 %v621_v31, 256  ;;  %v349_v30 = vcombine.high %v333_v21, %v333_v21 }
 0x12d   :  { %v428_v47 = vrot.slane %v349_v30, %v4235_v55 }
 0x12f   :  { %266 = vbcast.lane.b32.xlu1 %v264_v33, 256  ;;  %630 = vbcast.lane.b32.xlu0 %v628_v32, 256  ;;  %v779_v33 = vrot.slane %v711_v17, %v4235_v55  ;;  %v416_v32 = vrot.slane %v350_v9, %v4235_v55 }
 0x133   :  { %273 = vbcast.lane.b32.xlu1 %v271_v34, 256  ;;  %637 = vbcast.lane.b32.xlu0 %v635_v35, 256  ;;  %v704_v34 = vrot.slane %v688_v5, %v4314_v52  ;;  %v359_v35 = vrot.slane %v4198_v8, %v4314_v52 }
 0x135   :  { %v791_v51 = vrot.slane %v704_v34, %v4235_v55  ;;  %v720_v60 = vcombine.high %v704_v34, %v704_v34  ;;  %v367_v7 = vcombine.high %v359_v35, %v359_v35 }
 0x137   :  { %280 = vbcast.lane.b32.xlu1 %v278_v36, 256  ;;  %644 = vbcast.lane.b32.xlu0 %v642_v37, 256  ;;  %v4342_v36 = vrot.slane %v4212_v10, %v4314_v52  ;;  %v775_v37 = vrot.slane %v697_v15, %v4235_v55  ;;  %v799_v21 = vrot.slane %v720_v60, %v4235_v55 }
 0x13b   :  { %287 = vbcast.lane.b32.xlu1 %v285_v38, 256  ;;  %651 = vbcast.lane.b32.xlu0 %v649_v39, 256 }
 0x13f   :  { %294 = vbcast.lane.b32.xlu1 %v292_v40, 256  ;;  %658 = vbcast.lane.b32.xlu0 %v656_v41, 256  ;;  %v718_v40 = vrot.slane %v690_v23, %v4314_v52 }
 0x141   :  { %v795_v57 = vrot.slane %v718_v40, %v4235_v55 }
 0x143   :  { %301 = vbcast.lane.b32.xlu1 %v299_v42, 256  ;;  %665 = vbcast.lane.b32.xlu0 %v663_v43, 256  ;;  %v783_v43 = vrot.slane %v719_v26, %v4235_v55 }
 0x147   :  { %672 = vbcast.lane.b32.xlu0 %v670_v46, 256  ;;  %v424_v46 = vrot.slane %v347_v29, %v4235_v55 }
 0x179   :  { %v197_v53 = vpop.permute.xlu1 %196 }
 0x17a   :  { %v481_v41 = vmul.f32 %v404_v24, %v197_v53 }
 0x17c   :  { %v498_v62 = vsel %vm497_vm5, %v481_v41, 0.0  ;;  %v746_v41 = vrot.slane %v4342_v36, %v4314_v52 }
 0x17d   :  { %v204_v58 = vpop.permute.xlu1 %203  ;;  %v568_v59 = vpop.permute.xlu0 %567 }
 0x17e   :  { %v482_v31 = vmul.f32 %v408_v14, %v204_v58  ;;  %v852_v54 = vmul.f32 %v775_v37, %v568_v59  ;;  %v351_v58 = vcombine.high %v347_v29, %v347_v29 }
 0x180   :  { %v499_v48 = vsel %vm497_vm5, %v482_v31, 0.0  ;;  %v868_v15 = vsel %vm497_vm5, %v852_v54, 0.0 }
 0x181   :  { %v211_v3 = vpop.permute.xlu1 %210  ;;  %v575_v4 = vpop.permute.xlu0 %574  ;;  %v500_v1 = vadd.f32 %v499_v48, %v498_v62 }
 0x182   :  { %v483_v42 = vmul.f32 %v412_v25, %v211_v3  ;;  %v853_v49 = vmul.f32 %v779_v33, %v575_v4  ;;  %v4357_v3 = vrot.slane %v359_v35, %v4314_v52  ;;  %v722_v4 = vcombine.high %v718_v40, %v718_v40 }
 0x183   :  { %v389_v35 = vrot.slane %v367_v7, %v4314_v52 }
 0x184   :  { %v501_v63 = vsel %vm497_vm5, %v483_v42, 0.0  ;;  %v869_v59 = vsel %vm497_vm5, %v853_v49, 0.0  ;;  %v436_v30 = vrot.slane %v4357_v3, %v4235_v55  ;;  %v803_v31 = vrot.slane %v722_v4, %v4235_v55 }
 0x185   :  { %v218_v18 = vpop.permute.xlu1 %217  ;;  %v582_v20 = vpop.permute.xlu0 %581  ;;  %v502_v17 = vadd.f32 %v501_v63, %v500_v1  ;;  %v870_v28 = vadd.f32 %v869_v59, %v868_v15  ;;  %v738_v42 = vcombine.high %v4342_v36, %v4342_v36  ;;  %v352_v49 = vcombine.high %v4198_v8, %v4198_v8 }
 0x186   :  { %v484_v50 = vmul.f32 %v416_v32, %v218_v18  ;;  %v854_v27 = vmul.f32 %v783_v43, %v582_v20  ;;  %v432_v20 = vrot.slane %v351_v58, %v4235_v55  ;;  %v440_v54 = vrot.slane %v389_v35, %v4235_v55 }
 0x187   :  { %v807_v58 = vrot.slane %v746_v41, %v4235_v55  ;;  %v397_v60 = vcombine.high %v4357_v3, %v4357_v3  ;;  %v760_v8 = vrot.slane %v738_v42, %v4314_v52  ;;  %v399_v59 = vcombine.high %v389_v35, %v389_v35 }
 0x188   :  { %v503_v12 = vsel %vm497_vm5, %v484_v50, 0.0  ;;  %v871_v23 = vsel %vm497_vm5, %v854_v27, 0.0 }
 0x189   :  { %v225_v38 = vpop.permute.xlu1 %224  ;;  %v589_v39 = vpop.permute.xlu0 %588  ;;  %v504_v29 = vadd.f32 %v503_v12, %v502_v17  ;;  %v872_v37 = vadd.f32 %v871_v23, %v870_v28  ;;  %v366_v12 = vrot.slane %v352_v49, %v4314_v52  ;;  %v768_v23 = vcombine.high %v746_v41, %v746_v41 }
 0x18a   :  { %v485_v0 = vmul.f32 %v420_v44, %v225_v38  ;;  %v855_v5 = vmul.f32 %v787_v45, %v589_v39  ;;  %v448_v28 = vrot.slane %v399_v59, %v4235_v55 }
 0x18c   :  { %v505_v24 = vsel %vm497_vm5, %v485_v0, 0.0  ;;  %v873_v33 = vsel %vm497_vm5, %v855_v5, 0.0  ;;  %v723_v5 = vcombine.high %v4212_v10, %v4212_v10  ;;  %v382_v10 = vrot.slane %v366_v12, %v4314_v52 }
 0x18d   :  { %v232_v53 = vpop.permute.xlu1 %231  ;;  %v596_v56 = vpop.permute.xlu0 %595  ;;  %v506_v38 = vadd.f32 %v505_v24, %v504_v29 }
 0x18e   :  { %v486_v14 = vmul.f32 %v424_v46, %v232_v53  ;;  %v856_v25 = vmul.f32 %v791_v51, %v596_v56  ;;  %v452_v42 = vrot.slane %v382_v10, %v4235_v55 }
 0x190   :  { %v507_v32 = vsel %vm497_vm5, %v486_v14, 0.0  ;;  %v875_v43 = vsel %vm497_vm5, %v856_v25, 0.0 }
 0x191   :  { %v239_v9 = vpop.permute.xlu1 %238  ;;  %v603_v18 = vpop.permute.xlu0 %602  ;;  %v508_v48 = vadd.f32 %v507_v32, %v506_v38  ;;  %v770_v32 = vcombine.high %v760_v8, %v760_v8  ;;  %v815_v38 = vrot.slane %v768_v23, %v4235_v55 }
 0x192   :  { %v487_v26 = vmul.f32 %v428_v47, %v239_v9  ;;  %v857_v34 = vmul.f32 %v795_v57, %v603_v18  ;;  %v874_v47 = vadd.f32 %v873_v33, %v872_v37  ;;  %v444_v9 = vrot.slane %v397_v60, %v4235_v55 }
 0x194   :  { %v509_v44 = vsel %vm497_vm5, %v487_v26, 0.0  ;;  %v877_v50 = vsel %vm497_vm5, %v857_v34, 0.0  ;;  %v876_v53 = vadd.f32 %v875_v43, %v874_v47  ;;  %v368_v34 = vcombine.high %v366_v12, %v366_v12 }
 0x195   :  { %v246_v39 = vpop.permute.xlu1 %245  ;;  %v610_v40 = vpop.permute.xlu0 %609  ;;  %v510_v56 = vadd.f32 %v509_v44, %v508_v48  ;;  %v819_v47 = vrot.slane %v770_v32, %v4235_v55 }
 0x196   :  { %v488_v45 = vmul.f32 %v432_v20, %v246_v39  ;;  %v858_v46 = vmul.f32 %v799_v21, %v610_v40  ;;  %v878_v0 = vadd.f32 %v877_v50, %v876_v53  ;;  %v811_v21 = vrot.slane %v760_v8, %v4235_v55 }
 0x197   :  { %v737_v39 = vrot.slane %v723_v5, %v4314_v52  ;;  %v396_v48 = vrot.slane %v368_v34, %v4314_v52 }
 0x198   :  { %v511_v51 = vsel %vm497_vm5, %v488_v45, 0.0  ;;  %v879_v62 = vsel %vm497_vm5, %v858_v46, 0.0 }
 0x199   :  { %v253_v36 = vpop.permute.xlu1 %252  ;;  %v617_v57 = vpop.permute.xlu0 %616  ;;  %v512_v1 = vadd.f32 %v511_v51, %v510_v56  ;;  %v880_v14 = vadd.f32 %v879_v62, %v878_v0  ;;  %v753_v51 = vrot.slane %v737_v39, %v4314_v52  ;;  %v456_v62 = vrot.slane %v396_v48, %v4235_v55 }
 0x19a   :  { %v489_v63 = vmul.f32 %v436_v30, %v253_v36  ;;  %v859_v27 = vmul.f32 %v803_v31, %v617_v57 }
 0x19b   :  { %v823_v0 = vrot.slane %v753_v51, %v4235_v55 }
 0x19c   :  { %v513_v4 = vsel %vm497_vm5, %v489_v63, 0.0  ;;  %v881_v7 = vsel %vm497_vm5, %v859_v27, 0.0  ;;  %v398_v63 = vcombine.high %v382_v10, %v382_v10 }
 0x19d   :  { %v514_v3 = vadd.f32 %v513_v4, %v512_v1  ;;  %v260_v15 = vpop.permute.xlu1 %259  ;;  %v624_v17 = vpop.permute.xlu0 %623  ;;  %v882_v24 = vadd.f32 %v881_v7, %v880_v14 }
 0x19e   :  { %v490_v18 = vmul.f32 %v440_v54, %v260_v15  ;;  %v860_v20 = vmul.f32 %v807_v58, %v624_v17  ;;  %v739_v54 = vcombine.high %v737_v39, %v737_v39  ;;  %v400_v15 = vcombine.high %v396_v48, %v396_v48 }
 0x1a0   :  { %v515_v25 = vsel %vm497_vm5, %v490_v18, 0.0  ;;  %v883_v26 = vsel %vm497_vm5, %v860_v20, 0.0  ;;  %v767_v1 = vrot.slane %v739_v54, %v4314_v52  ;;  %v769_v20 = vcombine.high %v753_v51, %v753_v51 }
 0x1a1   :  { %v516_v29 = vadd.f32 %v515_v25, %v514_v3  ;;  %v884_v30 = vadd.f32 %v883_v26, %v882_v24  ;;  %v267_v31 = vpop.permute.xlu1 %266  ;;  %v631_v33 = vpop.permute.xlu0 %630  ;;  %v460_v3 = vrot.slane %v398_v63, %v4235_v55  ;;  %v464_v10 = vrot.slane %v400_v15, %v4235_v55  ;;  %v3789_v63 = vld [vmem:[%s5553_s3 + $0x8] sm:$0xff]   ;;  %v3801_v15 = vld [vmem:[%s5554_s6 + $0x30] ss:$12 sps:$4 sm:$0xff]  }
 0x1a2   :  { %v491_v35 = vmul.f32 %v444_v9, %v267_v31  ;;  %v861_v37 = vmul.f32 %v811_v21, %v631_v33  ;;  %v827_v18 = vrot.slane %v767_v1, %v4235_v55  ;;  %v831_v31 = vrot.slane %v769_v20, %v4235_v55  ;;  %v3806_v20 = vld [vmem:[%s5554_s6 + $0x50] ss:$12 sps:$4 sm:$0xff]  }
 0x1a3   :  { %v771_v33 = vcombine.high %v767_v1, %v767_v1  ;;  %v3791_v1 = vld [vmem:[%s5554_s6 + $0x4] ss:$12 sps:$4 sm:$0xff]  }
 0x1a4   :  { %v517_v40 = vsel %vm497_vm5, %v491_v35, 0.0  ;;  %v885_v41 = vsel %vm497_vm5, %v861_v37, 0.0  ;;  %1459 = vmatprep.subr.bf16.mxu1 %v3791_v1 }
 0x1a5   :  { %v518_v43 = vadd.f32 %v517_v40, %v516_v29  ;;  %v886_v44 = vadd.f32 %v885_v41, %v884_v30  ;;  %v274_v45 = vpop.permute.xlu1 %273  ;;  %v638_v46 = vpop.permute.xlu0 %637 }
 0x1a6   :  { %v492_v49 = vmul.f32 %v448_v28, %v274_v45  ;;  %v862_v50 = vmul.f32 %v815_v38, %v638_v46 }
 0x1a8   :  { %v519_v53 = vsel %vm497_vm5, %v492_v49, 0.0  ;;  %v887_v56 = vsel %vm497_vm5, %v862_v50, 0.0 }
 0x1a9   :  { %v520_v36 = vadd.f32 %v519_v53, %v518_v43  ;;  %v888_v57 = vadd.f32 %v887_v56, %v886_v44  ;;  %v281_v58 = vpop.permute.xlu1 %280  ;;  %v645_v60 = vpop.permute.xlu0 %644 }
 0x1aa   :  { %v493_v27 = vmul.f32 %v452_v42, %v281_v58  ;;  %v863_v8 = vmul.f32 %v819_v47, %v645_v60  ;;  %v835_v42 = vrot.slane %v771_v33, %v4235_v55  ;;  %v3788_v60 = vld [vmem:[%s5553_s3] sm:$0xff]  }
 0x1ab   :  { %v4504_v33 = vld [vmem:[%s5556_s5] sm:$0x1] }
 0x1ac   :  { %v521_v4 = vsel %vm497_vm5, %v493_v27, 0.0  ;;  %v889_v7 = vsel %vm497_vm5, %v863_v8, 0.0  ;;  %v3790_v27 = vld [vmem:[%s5553_s3 + $0x10] ss:$0 sps:$4 sm:$0xff]  }
 0x1ad   :  { %v522_v59 = vadd.f32 %v521_v4, %v520_v36  ;;  %v890_v12 = vadd.f32 %v889_v7, %v888_v57  ;;  %v288_v5 = vpop.permute.xlu1 %287  ;;  %v652_v14 = vpop.permute.xlu0 %651  ;;  %v1004_v8 = vsel %vm903_vm4, %v3790_v27, 0  ;;  %v3793_v4 = vld [vmem:[%s5554_s6] ss:$12 sps:$4 sm:$0xff]   ;;  %v3794_v7 = vld [vmem:[%s5554_s6 + $0x8] ss:$12 sps:$4 sm:$0xff]  }
 0x1ae   :  { %v494_v17 = vmul.f32 %v456_v62, %v288_v5  ;;  %v864_v9 = vmul.f32 %v823_v0, %v652_v14  ;;  %1460 = vmatpush1.bf16.msra.mxu1 %v3793_v4  ;;  %v5567_v5 = vmov 0   ;;  %v3798_v14 = vld [vmem:[%s5554_s6 + $0x20] ss:$12 sps:$4 sm:$0xff]  }
 0x1af   :  { %1491 = vmatprep.mubr.bf16.mxu1 %v5567_v5 }
 0x1b0   :  { %v523_v21 = vsel %vm497_vm5, %v494_v17, 0.0  ;;  %v891_v23 = vsel %vm497_vm5, %v864_v9, 0.0  ;;  %v3802_v17 = vld [vmem:[%s5554_s6 + $0x38] ss:$12 sps:$4 sm:$0xff]  }
 0x1b1   :  { %v524_v24 = vadd.f32 %v523_v21, %v522_v59  ;;  %v892_v25 = vadd.f32 %v891_v23, %v890_v12  ;;  %v295_v26 = vpop.permute.xlu1 %294  ;;  %v659_v28 = vpop.permute.xlu0 %658  ;;  %v3795_v59 = vld [vmem:[%s5554_s6 + $0x1c] ss:$12 sps:$4 sm:$0xff]   ;;  %v3797_v12 = vld [vmem:[%s5554_s6 + $0x18] ss:$12 sps:$4 sm:$0xff]   ;;  %v3809_v23 = vld [vmem:[%s5554_s6 + $0x60] ss:$12 sps:$4 sm:$0xff]  }
 0x1b2   :  { %v495_v29 = vmul.f32 %v460_v3, %v295_v26  ;;  %v865_v30 = vmul.f32 %v827_v18, %v659_v28  ;;  %1461 = vmatprep.subr.bf16.mxu1 %v3795_v59  ;;  %v3799_v3 = vld [vmem:[%s5554_s6 + $0x34] ss:$12 sps:$4 sm:$0xff]   ;;  %v3803_v9 = vld [vmem:[%s5554_s6 + $0x4c] ss:$12 sps:$4 sm:$0xff]   ;;  %v3807_v21 = vld [vmem:[%s5554_s6 + $0x64] ss:$12 sps:$4 sm:$0xff]  }
 0x1b3   :  { %1462 = vmatpush1.bf16.msra.mxu1 %v3797_v12  ;;  %v3805_v18 = vld [vmem:[%s5554_s6 + $0x48] ss:$12 sps:$4 sm:$0xff]  }
 0x1b4   :  { %v525_v32 = vsel %vm497_vm5, %v495_v29, 0.0  ;;  %v893_v34 = vsel %vm497_vm5, %v865_v30, 0.0  ;;  %1463 = vmatprep.subr.bf16.mxu1 %v3799_v3 }
 0x1b5   :  { %v526_v35 = vadd.f32 %v525_v32, %v524_v24  ;;  %v894_v37 = vadd.f32 %v893_v34, %v892_v25  ;;  %v302_v38 = vpop.permute.xlu1 %301  ;;  %v666_v39 = vpop.permute.xlu0 %665  ;;  %v3810_v24 = vld [vmem:[%s5554_s6 + $0x68] ss:$12 sps:$4 sm:$0xff]   ;;  %v1046_v25 = vld [vmem:[%s5555_s4] sm:$0xf] }
 0x1b6   :  { %v496_v40 = vmul.f32 %v464_v10, %v302_v38  ;;  %v866_v41 = vmul.f32 %v831_v31, %v666_v39 }
 0x1b7   :  { %1464 = vmatpush1.bf16.msra.mxu1 %v3801_v15 }
 0x1b8   :  { %v527_v43 = vsel %vm497_vm5, %v496_v40, 0.0  ;;  %v895_v44 = vsel %vm497_vm5, %v866_v41, 0.0  ;;  %1465 = vmatprep.subr.bf16.mxu1 %v3803_v9 }
 0x1b9   :  { %v528_v45 = vadd.f32 %v527_v43, %v526_v35  ;;  %v896_v46 = vadd.f32 %v895_v44, %v894_v37  ;;  %v673_v47 = vpop.permute.xlu0 %672 }
 0x1ba   :  { %v867_v48 = vmul.f32 %v835_v42, %v673_v47 }
 0x1bb   :  { %v529_v50 = vmul.f32 0.1, %v528_v45  ;;  %1466 = vmatpush1.bf16.msra.mxu1 %v3805_v18 }
 0x1bc   :  { %v897_v49 = vsel %vm497_vm5, %v867_v48, 0.0  ;;  %1467 = vmatprep.subr.bf16.mxu1 %v3807_v21 }
 0x1bd   :  { %v898_v51 = vadd.f32 %v897_v49, %v896_v46  ;;  %v906_v53 = vrot.slane %v529_v50, 3 }
 0x1bf   :  { %v899_v54 = vmul.f32 0.1, %v898_v51  ;;  %1468 = vmatpush1.bf16.msra.mxu1 %v3809_v23 }
 0x1c0   :  { %3495 = vmatprep.subr.mxu1 %v5565_v11 }
 0x1c1   :  { %v901_v56 = vrot.slane %v899_v54, 4  ;;  %v908_v36 = vrot.slane %v899_v54, 2 }
 0x1c3   :  { %v911_v57 = vsel %vm910_vm6, %v906_v53, %v908_v36  ;;  %v904_v58 = vsel %vm903_vm4, %v529_v50, %v901_v56 }
 0x1c4   :  { %v912_v62 = vpack.c.bf16 %v904_v58, %v904_v58  ;;  %v979_v0 = vpack.c.bf16 %v911_v57, %v911_v57 }
 0x1c6   :  { %3468 = vmatmul.mubr.msk.bf16.vlgmr.msra.gmra.mrb[4].mxu0 %vm57_vm0, %v912_v62 }
 0x1c7   :  { %3472 = vmatpush3.bf16.msra.mxu0 %v3788_v60  ;;  %3477 = vmatprep.mubr.msk.bf16.mxu0 %vm4087_vm3, %v5565_v11 }
 0x1c8   :  { %3473 = vmatprep.subr.bf16.mxu0 %v5565_v11 }
 0x1cb   :  { %3474 = vmatpush3.bf16.msra.mxu0 %v3789_v63 }
 0x1cc   :  { %3475 = vmatprep.subr.bf16.mxu0 %v5565_v11 }
 0x1cf   :  { %3476 = vmatpush3.bf16.msra.mxu0 %v1004_v8 }
 0x1d0   :  { %3481 = vmatprep.subr.bf16.mxu0 %v5565_v11 }
 0x1d2   :  { %3478 = vmatmul.mubr.msk.bf16.vlgmr.msra.gmra.mrb[8].mxu0 %vm57_vm0, %v979_v0  ;;  %vm1336_vm0 = vcmask 1041408  }
 0x1d3   :  { %3491 = vmatprep.mubr.msk.bf16.mxu0 %vm4087_vm3, %v5565_v11  ;;  %3482 = vmatpush3.bf16.msra.mxu0 %v3794_v7 }
 0x1d4   :  { %3483 = vmatprep.subr.bf16.mxu0 %v5565_v11 }
 0x1d7   :  { %3484 = vmatpush3.bf16.msra.mxu0 %v3798_v14 }
 0x1d8   :  { %3485 = vmatprep.subr.bf16.mxu0 %v5565_v11 }
 0x1db   :  { %3486 = vmatpush3.bf16.msra.mxu0 %v3802_v17 }
 0x1dc   :  { %3487 = vmatprep.subr.bf16.mxu0 %v5565_v11 }
 0x1df   :  { %3488 = vmatpush3.bf16.msra.mxu0 %v3806_v20 }
 0x1e0   :  { %3489 = vmatprep.subr.bf16.mxu0 %v5565_v11 }
 0x1e3   :  { %3490 = vmatpush3.bf16.msra.mxu0 %v3810_v24 }
 0x299   :  { %v973_v26 = vpop.f32.mrb[4].mxu0 }
 0x29a   :  { %v1049_v28 = vrot.slane %v973_v26, 5  ;;  %v1071_v10 = vrot.slane %v973_v26, 6  ;;  %v1103_v29 = vrot.slane %v973_v26, 7  ;;  %v1137_v30 = vmul.f32 %v1046_v25, %v973_v26  ;;  %v3469_v31 = vpop.f32.mrb[5].mxu0 }
 0x29b   :  { %v1170_v32 = vrot.slane %v973_v26, 1  ;;  %v1192_v34 = vrot.slane %v973_v26, 2  ;;  %v1224_v35 = vrot.slane %v973_v26, 3  ;;  %v976_v37 = vpop.f32.mrb[6].mxu0  ;;  %v1258_v45 = vrot.slane %v973_v26, 4 }
 0x29c   :  { %v1051_v38 = vmul.f32 %v1049_v28, %v1046_v25  ;;  %v1073_v39 = vmul.f32 %v1071_v10, %v1046_v25  ;;  %v1105_v40 = vmul.f32 %v1103_v29, %v1046_v25  ;;  %v3470_v41 = vpop.f32.mrb[7].mxu0  ;;  %v1146_v42 = vrot.slane %v1137_v30, %v4314_v52 }
 0x29d   :  { %v1172_v43 = vmul.f32 %v1170_v32, %v1046_v25  ;;  %v1194_v44 = vmul.f32 %v1192_v34, %v1046_v25  ;;  %v1138_v49 = vadd.f32 %v1137_v30, %v4504_v33  ;;  %v1226_v53 = vmul.f32 %v1224_v35, %v1046_v25 }
 0x29e   :  { %v1059_v46 = vrot.slane %v1051_v38, %v4314_v52  ;;  %v1081_v47 = vrot.slane %v1073_v39, %v4314_v52  ;;  %v1113_v48 = vrot.slane %v1105_v40, %v4314_v52  ;;  %v1147_v50 = vcombine.high %v1146_v42, %v1146_v42 }
 0x29f   :  { %v1154_v51 = vrot.slane %v1146_v42, %v4314_v52  ;;  %v1180_v54 = vrot.slane %v1172_v43, %v4314_v52  ;;  %v1202_v27 = vrot.slane %v1194_v44, %v4314_v52  ;;  %v1260_v4 = vmul.f32 %v1258_v45, %v1046_v25 }
 0x2a0   :  { %v1060_v56 = vcombine.high %v1059_v46, %v1059_v46  ;;  %v1088_v36 = vrot.slane %v1081_v47, %v4314_v52  ;;  %v1092_v57 = vcombine.high %v1081_v47, %v1081_v47  ;;  %v1114_v58 = vcombine.high %v1113_v48, %v1113_v48 }
 0x2a1   :  { %v1121_v60 = vrot.slane %v1113_v48, %v4314_v52  ;;  %v1161_v62 = vrot.slane %v1147_v50, %v4314_v52  ;;  %v1181_v63 = vcombine.high %v1180_v54, %v1180_v54  ;;  %v1164_v12 = vcombine.high %v1154_v51, %v1154_v51 }
 0x2a2   :  { %v1089_v8 = vcombine.high %v1088_v36, %v1088_v36  ;;  %v1099_v0 = vrot.slane %v1092_v57, %v4314_v52  ;;  %v1128_v1 = vrot.slane %v1114_v58, %v4314_v52  ;;  %v1067_v7 = vrot.slane %v1060_v56, %v4314_v52 }
 0x2a3   :  { %v1163_v59 = vadd.f32 %v1161_v62, %v1138_v49  ;;  %v1188_v14 = vrot.slane %v1181_v63, %v4314_v52  ;;  %v1131_v9 = vcombine.high %v1121_v60, %v1121_v60  ;;  %v1167_v21 = vcombine.high %v1161_v62, %v1161_v62 }
 0x2a4   :  { %v1091_v3 = vadd.f32 %v1089_v8, %v4504_v33  ;;  %v1100_v15 = vcombine.high %v1099_v0, %v1099_v0  ;;  %v1130_v17 = vadd.f32 %v1128_v1, %v4504_v33  ;;  %v1134_v18 = vcombine.high %v1128_v1, %v1128_v1 }
 0x2a5   :  { %v1166_v20 = vadd.f32 %v1164_v12, %v1163_v59  ;;  %v1209_v23 = vrot.slane %v1202_v27, %v4314_v52  ;;  %v4524_v24 = vpop.f32.mrb[8].mxu0  ;;  %v1189_v28 = vcombine.high %v1188_v14, %v1188_v14  ;;  %v1213_v10 = vcombine.high %v1202_v27, %v1202_v27 }
 0x2a6   :  { %5594 = vst [vmem:[#allocation2_spill] sm:$0xff] %v4524_v24  ;;  %v1102_v25 = vadd.f32 %v1100_v15, %v1091_v3  ;;  %v1133_v26 = vadd.f32 %v1131_v9, %v1130_v17  ;;  %v3479_v29 = vpop.f32.mrb[9].mxu0  ;;  %v1068_v30 = vcombine.high %v1067_v7, %v1067_v7  ;;  %v1234_v32 = vrot.slane %v1226_v53, %v4314_v52 }
 0x2a7   :  { %v1210_v31 = vcombine.high %v1209_v23, %v1209_v23  ;;  %v1043_v34 = vpop.f32.mrb[10].mxu0  ;;  %v1169_v37 = vadd.f32 %v1167_v21, %v1166_v20  ;;  %v1220_v38 = vrot.slane %v1213_v10, %v4314_v52  ;;  %v1269_v39 = vrot.slane %v1260_v4, %v4314_v52  ;;  %v1540_v29 = vld [vmem:[%s5557_s7] sm:$0x7] }
 0x2a8   :  { %v1136_v35 = vadd.f32 %v1134_v18, %v1133_v26  ;;  %v3480_v40 = vpop.f32.mrb[11].mxu0  ;;  %v1235_v42 = vcombine.high %v1234_v32, %v1234_v32  ;;  %v1242_v43 = vrot.slane %v1234_v32, %v4314_v52  ;;  %v1297_v44 = vrot.slane %v1102_v25, %v4235_v55 }
 0x2a9   :  { %v1212_v41 = vadd.f32 %v1210_v31, %v4504_v33  ;;  %v1191_v45 = vadd.f32 %v1189_v28, %v4504_v33  ;;  %v1221_v46 = vcombine.high %v1220_v38, %v1220_v38  ;;  %v1270_v47 = vcombine.high %v1269_v39, %v1269_v39 }
 0x2aa   :  { %v1277_v48 = vrot.slane %v1269_v39, %v4314_v52  ;;  %v1070_v49 = vadd.f32 %v1068_v30, %v4504_v33  ;;  %v1249_v50 = vrot.slane %v1235_v42, %v4314_v52  ;;  %v1303_v51 = vrot.slane %v1136_v35, %v4235_v55 }
 0x2ab   :  { %v1261_v54 = vadd.f32 %v1260_v4, %v4504_v33  ;;  %v1284_v53 = vrot.slane %v1270_v47, %v4314_v52  ;;  %v1223_v56 = vadd.f32 %v1221_v46, %v1212_v41  ;;  %v1252_v36 = vcombine.high %v1242_v43, %v1242_v43 }
 0x2ac   :  { %v1309_v57 = vrot.slane %v1169_v37, %v4235_v55  ;;  %v1251_v58 = vadd.f32 %v1249_v50, %v4504_v33  ;;  %v1335_v60 = vsel %vm910_vm6, %v1070_v49, %v1297_v44  ;;  %v1287_v63 = vcombine.high %v1277_v48, %v1277_v48 }
 0x2ad   :  { %v1286_v62 = vadd.f32 %v1284_v53, %v1261_v54  ;;  %v1315_v27 = vrot.slane %v1191_v45, %v4235_v55  ;;  %v1337_v8 = vsel %vm1336_vm0, %v1335_v60, %v1303_v51  ;;  %v1255_v1 = vcombine.high %v1249_v50, %v1249_v50 }
 0x2ae   :  { %v1254_v0 = vadd.f32 %v1252_v36, %v1251_v58  ;;  %v1339_v4 = vsel %vm1338_vm7, %v1337_v8, %v1309_v57  ;;  %v1290_v7 = vcombine.high %v1284_v53, %v1284_v53  ;;  %v1321_v59 = vrot.slane %v1223_v56, %v4235_v55 }
 0x2af   :  { %v1289_v52 = vadd.f32 %v1287_v63, %v1286_v62  ;;  %v1340_v12 = vsel %vm903_vm4, %v1339_v4, %v1315_v27  ;;  %v5571_v30 = vmov 4   ;;  %v5573_v44 = vmov 5   ;;  %v3368_v63 = vld [vmem:[%s5558_s8] ss:$0 sm:$0xff] }
 0x2b0   :  { %v1257_v14 = vadd.f32 %v1255_v1, %v1254_v0  ;;  %v1342_v3 = vsel %vm1341_vm8, %v1340_v12, %v1321_v59  ;;  %3652 = vset.pattern.permute.xlu1 %v5571_v30  ;;  %v5579_v45 = vmov 7   ;;  %v5577_v46 = vmov 1  }
 0x2b1   :  { %v1292_v33 = vadd.f32 %v1290_v7, %v1289_v52  ;;  %v5581_v48 = vmov 2   ;;  %v5583_v49 = vmov 6   ;;  %v5575_v50 = vmov 3  }
 0x2b2   :  { %v1327_v15 = vrot.slane %v1257_v14, %v4235_v55  ;;  %v5569_v58 = vmov 0.0|0.0  }
 0x2b3   :  { %v1333_v17 = vrot.slane %v1292_v33, %v4235_v55  ;;  %3616 = vmatprep.subr.bf16.mxu0 %v5569_v58 }
 0x2b4   :  { %v1344_v9 = vsel %vm1343_vm9, %v1342_v3, %v1327_v15 }
 0x2b5   :  { %v1346_v18 = vsel %vm1345_vm10, %v1344_v9, %v1333_v17 }
 0x2b6   :  { %v1347_v20 = vsub.f32 0.0, %v1346_v18 }
 0x2b8   :  { %v1348_v21 = vmul.f32 1.442695, %v1347_v20 }
 0x2ba   :  { %3816 = vpow2.f32 %v1348_v21 }
 0x2c4   :  { %v3817_v23 = vpop.eup %3816 }
 0x2c5   :  { %v1350_v25 = vadd.f32 1.0, %v3817_v23 }
 0x2c7   :  { %3818 = vrcp.f32 %v1350_v25 }
 0x2d1   :  { %v3819_v26 = vpop.eup %3818 }
 0x2d2   :  { %v4548_v28 = vmul.f32 %v3819_v26, %v1346_v18 }
 0x2d4   :  { %5595 = vst [vmem:[#allocation3_spill] sm:$0xff] %v4548_v28  ;;  %v1354_v10 = vpack.c.bf16 %v4548_v28, %v4548_v28 }
 0x2d6   :  { %3366 = vmatmul.mubr.msk.bf16.vlgmr.msra.gmra.mrb[0].mxu1 %vm1455_vm11, %v1354_v10  ;;  %3492 = vmatmul.mubr.msk.bf16.vlgmr.msra.gmra.mrb[12].mxu0 %vm1455_vm11, %v1354_v10  ;;  %v4730_v10 = vld [vmem:[%s5559_s9] sm:$0xff] }
 0x2d7   :  { %3497 = vmatprep.mubr.msk.f32.mxu1 %vm4087_vm3, %v5565_v11  ;;  %3567 = vmatprep.mubr.msk.f32.mxu0 %vm4087_vm3, %v5565_v11 }
 0x2d8   :  { %3496 = vmatpush3.msk.msra.mxu1 %vm1338_vm7, %v1540_v29 }
 0x2d9   :  { %3592 = vmatprep.subr.bf16.mxu1 %v5569_v58 }
 0x3a9   :  { %v1493_v31 = vpop.f32.mrb[0].mxu1  ;;  %v1534_v32 = vpop.f32.mrb[12].mxu0 }
 0x3aa   :  { %1650 = vxpose.xlu0.b32.start.end [1/1] (short) %v1493_v31, 128  ;;  %v4563_v34 = vpop.f32.mrb[1].mxu1  ;;  %v3493_v35 = vpop.f32.mrb[13].mxu0  ;;  %3498 = vmatmul.mubr.msk.f32.vlgmr.msra.gmra.mrb[4].mxu1 %vm1548_vm12, %v1534_v32  ;;  %v4743_v32 = vld [vmem:[%s5559_s9 + $0x8] sm:$0xff] }
 0x3ab   :  { %5596 = vst [vmem:[#allocation4_spill] sm:$0xff] %v4563_v34  ;;  %v1497_v37 = vpop.f32.mrb[2].mxu1  ;;  %v1537_v38 = vpop.f32.mrb[14].mxu0  ;;  %3532 = vmatprep.mubr.msk.f32.mxu1 %vm4087_vm3, %v5565_v11 }
 0x3ac   :  { %v1498_v39 = vpop.f32.mrb[3].mxu1  ;;  %v3494_v40 = vpop.f32.mrb[15].mxu0 }
 0x3d3   :  { %3669 = vset.pattern.permute.xlu0 %v5567_v5 }
 0x42a   :  { %v1666_v41 = vpop.trf.xlu0 }
 0x42b   :  { %2513 = vperm.xlu1 %3652, %v1666_v41  }
 0x42e   :  { %v4568_v42 = vpop.trf.xlu0 }
 0x42f   :  { %3653 = vset.pattern.permute.xlu1 %v5567_v5 }
 0x430   :  { %1753 = vperm.xlu1 %3653, %v1666_v41  }
 0x432   :  { %v4571_v43 = vpop.trf.xlu0 }
 0x433   :  { %1763 = vperm.xlu0 %3669, %v4571_v43  }
 0x434   :  { %3654 = vset.pattern.permute.xlu1 %v5573_v44 }
 0x435   :  { %2681 = vperm.xlu1 %3654, %v1666_v41  }
 0x436   :  { %v4578_v47 = vpop.trf.xlu0 }
 0x437   :  { %3674 = vset.pattern.permute.xlu0 %v5579_v45 }
 0x438   :  { %3025 = vperm.xlu0 %3674, %v4571_v43  }
 0x439   :  { %3655 = vset.pattern.permute.xlu1 %v5577_v46 }
 0x43a   :  { %1936 = vperm.xlu1 %3655, %v1666_v41   ;;  %v4586_v51 = vpop.trf.xlu0 }
 0x43c   :  { %3681 = vset.pattern.permute.xlu0 %v5581_v48 }
 0x43d   :  { %2116 = vperm.xlu0 %3681, %v4578_v47  }
 0x43e   :  { %3656 = vset.pattern.permute.xlu1 %v5583_v49  ;;  %v4590_v54 = vpop.trf.xlu0 }
 0x43f   :  { %2849 = vperm.xlu1 %3656, %v1666_v41  }
 0x441   :  { %3683 = vset.pattern.permute.xlu0 %v5575_v50 }
 0x442   :  { %2284 = vperm.xlu0 %3683, %v4578_v47   ;;  %v4596_v53 = vpop.trf.xlu0 }
 0x443   :  { %3657 = vset.pattern.permute.xlu1 %v5581_v48 }
 0x444   :  { %2104 = vperm.xlu1 %3657, %v1666_v41  }
 0x446   :  { %3687 = vset.pattern.permute.xlu0 %v5577_v46  ;;  %v4602_v56 = vpop.trf.xlu0 }
 0x447   :  { %1952 = vperm.xlu0 %3687, %v4586_v51  }
 0x448   :  { %3658 = vset.pattern.permute.xlu1 %v5579_v45 }
 0x449   :  { %3017 = vperm.xlu1 %3658, %v1666_v41  }
 0x44a   :  { %v4616_v36 = vpop.trf.xlu0 }
 0x44b   :  { %3689 = vset.pattern.permute.xlu0 %v5581_v48 }
 0x44c   :  { %2120 = vperm.xlu0 %3689, %v4586_v51  }
 0x44d   :  { %3659 = vset.pattern.permute.xlu1 %v5575_v50 }
 0x44e   :  { %2272 = vperm.xlu1 %3659, %v1666_v41   ;;  %v4634_v57 = vpop.trf.xlu0 }
 0x450   :  { %3691 = vset.pattern.permute.xlu0 %v5575_v50 }
 0x451   :  { %2288 = vperm.xlu0 %3691, %v4586_v51  }
 0x452   :  { %3660 = vset.pattern.permute.xlu1 %v5571_v30  ;;  %v4657_v27 = vpop.trf.xlu0 }
 0x453   :  { %2517 = vperm.xlu1 %3660, %v4568_v42  }
 0x455   :  { %3710 = vset.pattern.permute.xlu0 %v5573_v44 }
 0x456   :  { %2709 = vperm.xlu0 %3710, %v4602_v56   ;;  %v4671_v52 = vpop.trf.xlu0 }
 0x457   :  { %3661 = vset.pattern.permute.xlu1 %v5567_v5 }
 0x458   :  { %1758 = vperm.xlu1 %3661, %v4568_v42  }
 0x45a   :  { %3712 = vset.pattern.permute.xlu0 %v5583_v49  ;;  %v4681_v7 = vpop.trf.xlu0 }
 0x45b   :  { %2877 = vperm.xlu0 %3712, %v4602_v56  }
 0x45c   :  { %3662 = vset.pattern.permute.xlu1 %v5573_v44 }
 0x45d   :  { %2685 = vperm.xlu1 %3662, %v4568_v42  }
 0x45e   :  { %v4699_v3 = vpop.trf.xlu0 }
 0x45f   :  { %3714 = vset.pattern.permute.xlu0 %v5579_v45 }
 0x460   :  { %3045 = vperm.xlu0 %3714, %v4602_v56  }
 0x461   :  { %3663 = vset.pattern.permute.xlu1 %v5577_v46 }
 0x462   :  { %1940 = vperm.xlu1 %3663, %v4568_v42   ;;  %v4715_v23 = vpop.trf.xlu0 }
 0x464   :  { %3716 = vset.pattern.permute.xlu0 %v5571_v30 }
 0x465   :  { %2545 = vperm.xlu0 %3716, %v4616_v36  }
 0x466   :  { %3664 = vset.pattern.permute.xlu1 %v5583_v49  ;;  %v4745_v35 = vpop.trf.xlu0 }
 0x467   :  { %2853 = vperm.xlu1 %3664, %v4568_v42   ;;  %5597 = vst [vmem:[#allocation5_spill] sm:$0xff] %v4745_v35 }
 0x469   :  { %3718 = vset.pattern.permute.xlu0 %v5573_v44 }
 0x46a   :  { %2713 = vperm.xlu0 %3718, %v4616_v36  }
 0x46b   :  { %3665 = vset.pattern.permute.xlu1 %v5581_v48 }
 0x46c   :  { %2108 = vperm.xlu1 %3665, %v4568_v42  }
 0x46e   :  { %3720 = vset.pattern.permute.xlu0 %v5583_v49 }
 0x46f   :  { %2881 = vperm.xlu0 %3720, %v4616_v36  }
 0x470   :  { %3666 = vset.pattern.permute.xlu1 %v5579_v45 }
 0x471   :  { %3021 = vperm.xlu1 %3666, %v4568_v42  }
 0x473   :  { %3722 = vset.pattern.permute.xlu0 %v5579_v45 }
 0x474   :  { %3049 = vperm.xlu0 %3722, %v4616_v36  }
 0x475   :  { %3667 = vset.pattern.permute.xlu1 %v5575_v50 }
 0x476   :  { %2276 = vperm.xlu1 %3667, %v4568_v42  }
 0x478   :  { %3725 = vset.pattern.permute.xlu0 %v5567_v5 }
 0x479   :  { %1798 = vperm.xlu0 %3725, %v4634_v57  }
 0x47a   :  { %3668 = vset.pattern.permute.xlu1 %v5571_v30 }
 0x47b   :  { %2521 = vperm.xlu1 %3668, %v4571_v43  }
 0x47d   :  { %3727 = vset.pattern.permute.xlu0 %v5577_v46  ;;  %v1621_v60 = vpop.f32.mrb[4].mxu1 }
 0x47e   :  { %1972 = vperm.xlu0 %3727, %v4634_v57   ;;  %v3499_v62 = vpop.f32.mrb[5].mxu1  ;;  %v1622_v8 = vadd.f32 %v3368_v63, %v1621_v60 }
 0x47f   :  { %3670 = vset.pattern.permute.xlu1 %v5573_v44 }
 0x480   :  { %2689 = vperm.xlu1 %3670, %v4571_v43   ;;  %v1626_v0 = vand.u32 2147483647, %v1622_v8  ;;  %v1625_v20 = vmax.f32 %v1622_v8, 0.0 }
 0x482   :  { %3729 = vset.pattern.permute.xlu0 %v5581_v48  ;;  %v1627_v1 = vsub.f32 0.0, %v1626_v0 }
 0x483   :  { %2140 = vperm.xlu0 %3729, %v4634_v57  }
 0x484   :  { %3671 = vset.pattern.permute.xlu1 %v5577_v46  ;;  %v1628_v4 = vmul.f32 1.442695, %v1627_v1 }
 0x485   :  { %1944 = vperm.xlu1 %3671, %v4571_v43  }
 0x486   :  { %3820 = vpow2.f32 %v1628_v4 }
 0x487   :  { %3731 = vset.pattern.permute.xlu0 %v5575_v50 }
 0x488   :  { %2308 = vperm.xlu0 %3731, %v4634_v57  }
 0x489   :  { %3672 = vset.pattern.permute.xlu1 %v5583_v49 }
 0x48a   :  { %2857 = vperm.xlu1 %3672, %v4571_v43  }
 0x48c   :  { %3733 = vset.pattern.permute.xlu0 %v5567_v5 }
 0x48d   :  { %1803 = vperm.xlu0 %3733, %v4657_v27  }
 0x48e   :  { %3673 = vset.pattern.permute.xlu1 %v5581_v48 }
 0x48f   :  { %2112 = vperm.xlu1 %3673, %v4571_v43  }
 0x490   :  { %v3821_v59 = vpop.eup %3820 }
 0x491   :  { %3735 = vset.pattern.permute.xlu0 %v5577_v46  ;;  %v1630_v12 = vadd.f32 1.0, %v3821_v59 }
 0x492   :  { %1976 = vperm.xlu0 %3735, %v4657_v27  }
 0x493   :  { %3675 = vset.pattern.permute.xlu1 %v5575_v50  ;;  %3822 = vlog2.f32 %v1630_v12 }
 0x494   :  { %2280 = vperm.xlu1 %3675, %v4571_v43  }
 0x496   :  { %3737 = vset.pattern.permute.xlu0 %v5581_v48 }
 0x497   :  { %2144 = vperm.xlu0 %3737, %v4657_v27  }
 0x498   :  { %3676 = vset.pattern.permute.xlu1 %v5571_v30 }
 0x499   :  { %2525 = vperm.xlu1 %3676, %v4578_v47  }
 0x49b   :  { %3746 = vset.pattern.permute.xlu0 %v5579_v45 }
 0x49c   :  { %3061 = vperm.xlu0 %3746, %v4671_v52  }
 0x49d   :  { %3677 = vset.pattern.permute.xlu1 %v5567_v5  ;;  %v3823_v17 = vpop.eup %3822 }
 0x49e   :  { %1768 = vperm.xlu1 %3677, %v4578_v47   ;;  %v1632_v18 = vmul.f32 0.6931472, %v3823_v17 }
 0x4a0   :  { %3747 = vset.pattern.permute.xlu0 %v5575_v50  ;;  %v4713_v21 = vadd.f32 %v1632_v18, %v1625_v20 }
 0x4a1   :  { %2316 = vperm.xlu0 %3747, %v4671_v52  }
 0x4a2   :  { %3678 = vset.pattern.permute.xlu1 %v5573_v44  ;;  %v4725_v26 = vrot.slane %v4713_v21, %v4258_v13  ;;  %v4752_v38 = vrot.slane %v4713_v21, %v4235_v55  ;;  %v4761_v41 = vrot.slane %v4713_v21, %v4263_v16  ;;  %v4777_v62 = vrot.slane %v4713_v21, %v4241_v61 }
 0x4a3   :  { %2693 = vperm.xlu1 %3678, %v4578_v47   ;;  %v4781_v8 = vrot.slane %v4713_v21, %v4268_v19  ;;  %v4795_v20 = vmul.f32 %v4713_v21, %v4548_v28 }
 0x4a4   :  { %v2448_v31 = vmul.f32 %v4725_v26, %v4730_v10  ;;  %5598 = vst [vmem:[#allocation6_spill] sm:$0xff] %v4752_v38  ;;  %v2449_v40 = vmul.f32 %v4725_v26, %v4743_v32  ;;  %v1687_v42 = vmul.f32 %v4752_v38, %v4730_v10  ;;  %v2616_v60 = vmul.f32 %v4761_v41, %v4730_v10 }
 0x4a5   :  { %3752 = vset.pattern.permute.xlu0 %v5583_v49  ;;  %v2617_v1 = vmul.f32 %v4761_v41, %v4743_v32  ;;  %v1871_v12 = vmul.f32 %v4777_v62, %v4730_v10  ;;  %v2784_v17 = vmul.f32 %v4781_v8, %v4730_v10 }
 0x4a6   :  { %2897 = vperm.xlu0 %3752, %v4681_v7   ;;  %v2464_v39 = vmul.f32 1.442695, %v2448_v31  ;;  %v1703_v63 = vmul.f32 1.442695, %v1687_v42  ;;  %v2632_v59 = vmul.f32 1.442695, %v2616_v60  ;;  %v4799_v31 = vrot.slane %v4713_v21, %v4248_v2 }
 0x4a7   :  { %3679 = vset.pattern.permute.xlu1 %v5577_v46  ;;  %v2634_v18 = vmul.f32 1.442695, %v2617_v1  ;;  %v1887_v60 = vmul.f32 1.442695, %v1871_v12  ;;  %v4814_v1 = vrot.slane %v4795_v20, %v4258_v13 }
 0x4a8   :  { %1948 = vperm.xlu1 %3679, %v4578_v47   ;;  %3824 = vpow2.f32 %v2464_v39  ;;  %v2039_v11 = vmul.f32 %v4799_v31, %v4730_v10  ;;  %v2040_v13 = vmul.f32 %v4799_v31, %v4743_v32 }
 0x4aa   :  { %v4687_v14 = vpop.permute.xlu1 %2513  ;;  %3753 = vset.pattern.permute.xlu0 %v5581_v48 }
 0x4ab   :  { %2152 = vperm.xlu0 %3753, %v4681_v7  }
 0x4ac   :  { %3680 = vset.pattern.permute.xlu1 %v5583_v49 }
 0x4ad   :  { %2861 = vperm.xlu1 %3680, %v4578_v47  }
 0x4af   :  { %v4693_v33 = vpop.permute.xlu1 %1753  ;;  %3754 = vset.pattern.permute.xlu0 %v5579_v45 }
 0x4b0   :  { %3065 = vperm.xlu0 %3754, %v4681_v7  }
 0x4b1   :  { %3682 = vset.pattern.permute.xlu1 %v5579_v45 }
 0x4b2   :  { %3029 = vperm.xlu1 %3682, %v4578_v47   ;;  %v2466_v47 = vmul.f32 1.442695, %v2449_v40  ;;  %v1872_v40 = vmul.f32 %v4777_v62, %v4743_v32  ;;  %v3825_v42 = vpop.eup %3824 }
 0x4b4   :  { %v4701_v15 = vpop.permute.xlu1 %2681  ;;  %3756 = vset.pattern.permute.xlu0 %v5571_v30  ;;  %3826 = vpow2.f32 %v2466_v47  ;;  %v4806_v47 = vrot.slane %v4713_v21, %v4273_v22 }
 0x4b5   :  { %2565 = vperm.xlu0 %3756, %v4699_v3   ;;  %3828 = vpow2.f32 %v1703_v63  ;;  %v2800_v63 = vmul.f32 1.442695, %v2784_v17  ;;  %v2580_v17 = vmul.f32 %v4814_v1, %v4687_v14 }
 0x4b6   :  { %3684 = vset.pattern.permute.xlu1 %v5571_v30  ;;  %v2952_v58 = vmul.f32 %v4806_v47, %v4730_v10 }
 0x4b7   :  { %2529 = vperm.xlu1 %3684, %v4586_v51  }
 0x4b9   :  { %v4707_v9 = vpop.permute.xlu1 %1936  ;;  %3758 = vset.pattern.permute.xlu0 %v5573_v44 }
 0x4ba   :  { %2733 = vperm.xlu0 %3758, %v4699_v3  }
 0x4bb   :  { %3685 = vset.pattern.permute.xlu1 %v5567_v5 }
 0x4bc   :  { %1773 = vperm.xlu1 %3685, %v4586_v51  }
 0x4be   :  { %v4717_v25 = vpop.permute.xlu1 %2849  ;;  %3764 = vset.pattern.permute.xlu0 %v5571_v30 }
 0x4bf   :  { %2569 = vperm.xlu0 %3764, %v4715_v23  }
 0x4c0   :  { %3686 = vset.pattern.permute.xlu1 %v5573_v44 }
 0x4c1   :  { %2697 = vperm.xlu1 %3686, %v4586_v51  }
 0x4c3   :  { %v4732_v29 = vpop.permute.xlu1 %2104  ;;  %3770 = vset.pattern.permute.xlu0 %v5579_v45 }
 0x4c4   :  { %3073 = vperm.xlu0 %3770, %v4715_v23  }
 0x4c5   :  { %3688 = vset.pattern.permute.xlu1 %v5583_v49 }
 0x4c6   :  { %2865 = vperm.xlu1 %3688, %v4586_v51  }
 0x4c8   :  { %v4747_v37 = vpop.permute.xlu1 %3017  ;;  %3772 = vset.pattern.permute.xlu0 %v5567_v5 }
 0x4c9   :  { %1828 = vperm.xlu0 %3772, %v4745_v35  }
 0x4ca   :  { %3690 = vset.pattern.permute.xlu1 %v5579_v45 }
 0x4cb   :  { %3033 = vperm.xlu1 %3690, %v4586_v51   ;;  %v1688_v51 = vmul.f32 %v4752_v38, %v4743_v32 }
 0x4cd   :  { %v4765_v43 = vpop.permute.xlu1 %2272  ;;  %3776 = vset.pattern.permute.xlu0 %v5581_v48  ;;  %v1705_v4 = vmul.f32 1.442695, %v1688_v51  ;;  %v2785_v51 = vmul.f32 %v4781_v8, %v4743_v32  ;;  %v2057_v48 = vmul.f32 1.442695, %v2040_v13 }
 0x4ce   :  { %2164 = vperm.xlu0 %3776, %v4745_v35  }
 0x4cf   :  { %3692 = vset.pattern.permute.xlu1 %v5571_v30  ;;  %3830 = vpow2.f32 %v1705_v4  ;;  %v2496_v4 = vmul.f32 0.0, %v3825_v42  ;;  %v2802_v30 = vmul.f32 1.442695, %v2785_v51  ;;  %v4827_v42 = vrot.slane %v4713_v21, %v4253_v6 }
 0x4d0   :  { %2533 = vperm.xlu1 %3692, %v4590_v54   ;;  %3832 = vpow2.f32 %v2632_v59  ;;  %v3827_v59 = vpop.eup %3826 }
 0x4d1   :  { %3834 = vpow2.f32 %v2634_v18  ;;  %v3829_v51 = vpop.eup %3828  ;;  %v2497_v14 = vmul.f32 0.0, %v3827_v59  ;;  %v2207_v59 = vmul.f32 %v4827_v42, %v4730_v10  ;;  %v4853_v10 = vrot.slane %v4795_v20, %v4241_v61 }
 0x4d2   :  { %v2518_v0 = vpop.permute.xlu1 %2517  ;;  %3779 = vset.pattern.permute.xlu0 %v5575_v50  ;;  %3836 = vpow2.f32 %v1887_v60  ;;  %v2055_v50 = vmul.f32 1.442695, %v2039_v11  ;;  %v2968_v60 = vmul.f32 1.442695, %v2952_v58  ;;  %v1735_v11 = vmul.f32 0.0, %v3829_v51 }
 0x4d3   :  { %2332 = vperm.xlu0 %3779, %v4745_v35   ;;  %v2581_v18 = vmul.f32 %v4814_v1, %v2518_v0  ;;  %3838 = vpow2.f32 %v2800_v63  ;;  %v4835_v0 = vrot.slane %v4795_v20, %v4235_v55  ;;  %v4839_v63 = vrot.slane %v4795_v20, %v4263_v16 }
 0x4d4   :  { %3693 = vset.pattern.permute.xlu1 %v5567_v5  ;;  %v1889_v5 = vmul.f32 1.442695, %v1872_v40  ;;  %v2953_v40 = vmul.f32 %v4806_v47, %v4743_v32  ;;  %v2208_v16 = vmul.f32 %v4827_v42, %v4743_v32 }
 0x4d5   :  { %1778 = vperm.xlu1 %3693, %v4590_v54  }
 0x4d6   :  { %3840 = vpow2.f32 %v1889_v5 }
 0x4d7   :  { %v1759_v39 = vpop.permute.xlu1 %1758  ;;  %3780 = vset.pattern.permute.xlu0 %v5579_v45  ;;  %3842 = vpow2.f32 %v2802_v30 }
 0x4d8   :  { %v1836_v5 = vmul.f32 %v4835_v0, %v1759_v39  ;;  %3844 = vpow2.f32 %v2055_v50 }
 0x4d9   :  { %3694 = vset.pattern.permute.xlu1 %v5573_v44  ;;  %v2596_v44 = vadd.f32 %v2580_v17, %v2496_v4  ;;  %v3831_v21 = vpop.eup %3830  ;;  %v2970_v17 = vmul.f32 1.442695, %v2953_v40  ;;  %3846 = vpow2.f32 %v2968_v60 }
 0x4da   :  { %2701 = vperm.xlu1 %3694, %v4590_v54   ;;  %v3833_v4 = vpop.eup %3832  ;;  %v1736_v13 = vmul.f32 0.0, %v3831_v21  ;;  %3848 = vpow2.f32 %v2057_v48  ;;  %v2225_v21 = vmul.f32 1.442695, %v2208_v16  ;;  %v5599_v48 = vmov 2  }
 0x4db   :  { %v2664_v55 = vmul.f32 %v3833_v4, %v2596_v44  ;;  %v3835_v58 = vpop.eup %3834  ;;  %v2748_v44 = vmul.f32 %v4839_v63, %v4701_v15  ;;  %3850 = vpow2.f32 %v2970_v17  ;;  %v2003_v4 = vmul.f32 %v4853_v10, %v4707_v9 }
 0x4dc   :  { %v2686_v12 = vpop.permute.xlu1 %2685  ;;  %v1852_v32 = vadd.f32 %v1836_v5, %v1736_v13  ;;  %v3837_v51 = vpop.eup %3836 }
 0x4dd   :  { %v2749_v30 = vmul.f32 %v4839_v63, %v2686_v12  ;;  %v2223_v12 = vmul.f32 1.442695, %v2207_v59  ;;  %v3839_v61 = vpop.eup %3838 }
 0x4de   :  { %3695 = vset.pattern.permute.xlu1 %v5577_v46  ;;  %v2597_v46 = vadd.f32 %v2581_v18, %v2497_v14  ;;  %v1835_v18 = vmul.f32 %v4835_v0, %v4693_v33  ;;  %v4859_v33 = vrot.slane %v4795_v20, %v4268_v19  ;;  %v2764_v14 = vadd.f32 %v2748_v44, %v2664_v55 }
 0x4df   :  { %1956 = vperm.xlu1 %3695, %v4590_v54   ;;  %3852 = vpow2.f32 %v2223_v12 }
 0x4e0   :  { %v2665_v50 = vmul.f32 %v3835_v58, %v2597_v46  ;;  %v1851_v39 = vadd.f32 %v1835_v18, %v1735_v11  ;;  %v3841_v15 = vpop.eup %3840  ;;  %v2916_v11 = vmul.f32 %v4859_v33, %v4717_v25  ;;  %v2832_v55 = vmul.f32 %v3839_v61, %v2764_v14 }
 0x4e1   :  { %v1941_v45 = vpop.permute.xlu1 %1940  ;;  %v3843_v19 = vpop.eup %3842  ;;  %v1920_v17 = vmul.f32 %v3841_v15, %v1852_v32  ;;  %3854 = vpow2.f32 %v2225_v21  ;;  %v4875_v25 = vrot.slane %v4795_v20, %v4273_v22 }
 0x4e2   :  { %v2765_v60 = vadd.f32 %v2749_v30, %v2665_v50  ;;  %v2004_v46 = vmul.f32 %v4853_v10, %v1941_v45  ;;  %v1919_v5 = vmul.f32 %v3837_v51, %v1851_v39  ;;  %v4871_v45 = vrot.slane %v4795_v20, %v4248_v2  ;;  %v3845_v18 = vpop.eup %3844 }
 0x4e3   :  { %3696 = vset.pattern.permute.xlu1 %v5583_v49  ;;  %v2932_v13 = vadd.f32 %v2916_v11, %v2832_v55  ;;  %v5600_v50 = vmov 7   ;;  %v3847_v39 = vpop.eup %3846  ;;  %v5601_v11 = vmov 3  }
 0x4e4   :  { %2869 = vperm.xlu1 %3696, %v4590_v54   ;;  %v2833_v30 = vmul.f32 %v3843_v19, %v2765_v60  ;;  %v2019_v9 = vadd.f32 %v2003_v4, %v1919_v5  ;;  %v2020_v58 = vadd.f32 %v2004_v46, %v1920_v17  ;;  %v2171_v12 = vmul.f32 %v4871_v45, %v4732_v29  ;;  %v3849_v2 = vpop.eup %3848 }
 0x4e5   :  { %v3851_v51 = vpop.eup %3850  ;;  %v3000_v21 = vmul.f32 %v3847_v39, %v2932_v13  ;;  %v4887_v46 = vrot.slane %v4795_v20, %v4253_v6  ;;  %v5602_v20 = vmov 4   ;;  %v5603_v13 = vmov 0.0|0.0  }
 0x4e6   :  { %v2854_v40 = vpop.permute.xlu1 %2853  ;;  %v2087_v14 = vmul.f32 %v3845_v18, %v2019_v9  ;;  %v2088_v22 = vmul.f32 %v3849_v2, %v2020_v58  ;;  %v5604_v39 = vmov 0  }
 0x4e7   :  { %v2917_v59 = vmul.f32 %v4859_v33, %v2854_v40  ;;  %v3084_v40 = vmul.f32 %v4875_v25, %v4747_v37  ;;  %v2339_v5 = vmul.f32 %v4887_v46, %v4765_v43 }
 0x4e8   :  { %3697 = vset.pattern.permute.xlu1 %v5599_v48  ;;  %v2187_v29 = vadd.f32 %v2171_v12, %v2087_v14  ;;  %v1636_v12 = vld [vmem:[%s5559_s9 + $0x10] sm:$0xff] }
 0x4e9   :  { %2124 = vperm.xlu1 %3697, %v4590_v54   ;;  %v2933_v44 = vadd.f32 %v2917_v59, %v2833_v30  ;;  %v3100_v59 = vadd.f32 %v3084_v40, %v3000_v21  ;;  %v3853_v37 = vpop.eup %3852  ;;  %v1689_v2 = vmul.f32 %v4752_v38, %v1636_v12  ;;  %v1637_v21 = vld [vmem:[%s5559_s9 + $0x18] sm:$0xff] }
 0x4ea   :  { %v2955_v28 = vmul.f32 %v4806_v47, %v1637_v21 }
 0x4eb   :  { %v2109_v16 = vpop.permute.xlu1 %2108  ;;  %v3001_v61 = vmul.f32 %v3851_v51, %v2933_v44  ;;  %v3855_v17 = vpop.eup %3854  ;;  %v5606_v51 = vmov 1   ;;  %v1707_v14 = vmul.f32 1.442695, %v1689_v2 }
 0x4ec   :  { %v2172_v32 = vmul.f32 %v4871_v45, %v2109_v16  ;;  %v2255_v16 = vmul.f32 %v3853_v37, %v2187_v29  ;;  %v2451_v29 = vmul.f32 %v4725_v26, %v1637_v21  ;;  %v2618_v37 = vmul.f32 %v4761_v41, %v1636_v12 }
 0x4ed   :  { %3698 = vset.pattern.permute.xlu1 %v5600_v50  ;;  %3856 = vpow2.f32 %v1707_v14 }
 0x4ee   :  { %3037 = vperm.xlu1 %3698, %v4590_v54   ;;  %v2188_v15 = vadd.f32 %v2172_v32, %v2088_v22  ;;  %v2355_v58 = vadd.f32 %v2339_v5, %v2255_v16  ;;  %v5605_v32 = vmov 5   ;;  %v2450_v22 = vmul.f32 %v4725_v26, %v1636_v12 }
 0x4ef   :  { %v2470_v5 = vmul.f32 1.442695, %v2451_v29 }
 0x4f0   :  { %v3022_v60 = vpop.permute.xlu1 %3021  ;;  %v2256_v9 = vmul.f32 %v3855_v17, %v2188_v15  ;;  %v1690_v15 = vmul.f32 %v4752_v38, %v1637_v21 }
 0x4f1   :  { %v3085_v4 = vmul.f32 %v4875_v25, %v3022_v60 }
 0x4f2   :  { %3699 = vset.pattern.permute.xlu1 %v5601_v11  ;;  %v1709_v17 = vmul.f32 1.442695, %v1690_v15 }
 0x4f3   :  { %v3101_v19 = vadd.f32 %v3085_v4, %v3001_v61  ;;  %2292 = vperm.xlu1 %3699, %v4590_v54   ;;  %v1873_v61 = vmul.f32 %v4777_v62, %v1636_v12  ;;  %v2468_v4 = vmul.f32 1.442695, %v2450_v22 }
 0x4f5   :  { %v3617_v55 = vpack.c.bf16 %v3101_v19, %v3100_v59  ;;  %v2277_v30 = vpop.permute.xlu1 %2276  ;;  %v1891_v19 = vmul.f32 1.442695, %v1873_v61  ;;  %3858 = vpow2.f32 %v2468_v4 }
 0x4f6   :  { %v2340_v6 = vmul.f32 %v4887_v46, %v2277_v30  ;;  %v2041_v30 = vmul.f32 %v4799_v31, %v1636_v12 }
 0x4f7   :  { %3700 = vset.pattern.permute.xlu1 %v5602_v20  ;;  %3618 = vmatpush3.bf16.msra.mxu0 %v3617_v55  ;;  %3860 = vpow2.f32 %v1891_v19  ;;  %v2636_v55 = vmul.f32 1.442695, %v2618_v37  ;;  %v2042_v19 = vmul.f32 %v4799_v31, %v1637_v21 }
 0x4f8   :  { %v2356_v18 = vadd.f32 %v2340_v6, %v2256_v9  ;;  %2537 = vperm.xlu1 %3700, %v4596_v53   ;;  %3619 = vmatprep.subr.bf16.mxu0 %v5603_v13  ;;  %3862 = vpow2.f32 %v2470_v5  ;;  %v2619_v9 = vmul.f32 %v4761_v41, %v1637_v21  ;;  %v3857_v6 = vpop.eup %3856  ;;  %v2059_v2 = vmul.f32 1.442695, %v2041_v30 }
 0x4f9   :  { %3864 = vpow2.f32 %v1709_v17  ;;  %v1737_v14 = vmul.f32 0.0, %v3857_v6  ;;  %v2787_v5 = vmul.f32 %v4781_v8, %v1637_v21 }
 0x4fa   :  { %v3593_v54 = vpack.c.bf16 %v2356_v18, %v2355_v58  ;;  %v2522_v44 = vpop.permute.xlu1 %2521  ;;  %v1764_v58 = vpop.permute.xlu0 %1763  ;;  %v1874_v18 = vmul.f32 %v4777_v62, %v1637_v21  ;;  %3866 = vpow2.f32 %v2636_v55  ;;  %v2638_v4 = vmul.f32 1.442695, %v2619_v9 }
 0x4fb   :  { %v1837_v22 = vmul.f32 %v4835_v0, %v1764_v58  ;;  %v2582_v37 = vmul.f32 %v4814_v1, %v2522_v44  ;;  %3868 = vpow2.f32 %v2059_v2  ;;  %v2209_v55 = vmul.f32 %v4827_v42, %v1636_v12 }
 0x4fc   :  { %3701 = vset.pattern.permute.xlu1 %v5604_v39  ;;  %3594 = vmatpush3.bf16.msra.mxu1 %v3593_v54  ;;  %v2786_v54 = vmul.f32 %v4781_v8, %v1636_v12  ;;  %v1893_v15 = vmul.f32 1.442695, %v1874_v18  ;;  %v2954_v9 = vmul.f32 %v4806_v47, %v1636_v12  ;;  %3870 = vpow2.f32 %v2638_v4 }
 0x4fd   :  { %1783 = vperm.xlu1 %3701, %v4596_v53   ;;  %3595 = vmatprep.subr.bf16.mxu1 %v5603_v13  ;;  %v1853_v30 = vadd.f32 %v1837_v22, %v1737_v14  ;;  %v2210_v44 = vmul.f32 %v4827_v42, %v1637_v21  ;;  %v2806_v2 = vmul.f32 1.442695, %v2787_v5  ;;  %v2227_v35 = vmul.f32 1.442695, %v2209_v55 }
 0x4fe   :  { %v2804_v17 = vmul.f32 1.442695, %v2786_v54  ;;  %3872 = vpow2.f32 %v1893_v15  ;;  %v2972_v22 = vmul.f32 1.442695, %v2954_v9 }
 0x4ff   :  { %v4900_v43 = vpop.permute.xlu1 %2689  ;;  %v3859_v29 = vpop.eup %3858 }
 0x500   :  { %v2498_v6 = vmul.f32 0.0, %v3859_v29  ;;  %3874 = vpow2.f32 %v2804_v17  ;;  %v4952_v29 = vpop.permute.xlu0 %3025 }
 0x501   :  { %3702 = vset.pattern.permute.xlu1 %v5605_v32  ;;  %v3861_v58 = vpop.eup %3860 }
 0x502   :  { %2705 = vperm.xlu1 %3702, %v4596_v53   ;;  %v3863_v24 = vpop.eup %3862  ;;  %v2598_v54 = vadd.f32 %v2582_v37, %v2498_v6  ;;  %v1921_v12 = vmul.f32 %v3861_v58, %v1853_v30  ;;  %v2974_v37 = vmul.f32 1.442695, %v2955_v28 }
 0x503   :  { %v3865_v34 = vpop.eup %3864  ;;  %v2499_v15 = vmul.f32 0.0, %v3863_v24 }
 0x504   :  { %v4908_v40 = vpop.permute.xlu1 %1944  ;;  %v3867_v21 = vpop.eup %3866  ;;  %v1738_v17 = vmul.f32 0.0, %v3865_v34 }
 0x505   :  { %v2005_v14 = vmul.f32 %v4853_v10, %v4908_v40  ;;  %v2666_v5 = vmul.f32 %v3867_v21, %v2598_v54  ;;  %v3869_v9 = vpop.eup %3868 }
 0x506   :  { %3703 = vset.pattern.permute.xlu1 %v5606_v51  ;;  %v3871_v28 = vpop.eup %3870 }
 0x507   :  { %1960 = vperm.xlu1 %3703, %v4596_v53   ;;  %v2021_v30 = vadd.f32 %v2005_v14, %v1921_v12 }
 0x509   :  { %v4913_v60 = vpop.permute.xlu1 %2857  ;;  %v2089_v54 = vmul.f32 %v3869_v9, %v2021_v30 }
 0x50b   :  { %3704 = vset.pattern.permute.xlu1 %v5583_v49  ;;  %v2061_v49 = vmul.f32 1.442695, %v2042_v19  ;;  %v2229_v19 = vmul.f32 1.442695, %v2210_v44  ;;  %v2918_v44 = vmul.f32 %v4859_v33, %v4913_v60 }
 0x50c   :  { %2873 = vperm.xlu1 %3704, %v4596_v53  }
 0x50d   :  { %3876 = vpow2.f32 %v2061_v49 }
 0x50e   :  { %v4923_v59 = vpop.permute.xlu1 %2112  ;;  %3878 = vpow2.f32 %v2806_v2 }
 0x50f   :  { %3880 = vpow2.f32 %v2227_v35  ;;  %v2173_v34 = vmul.f32 %v4871_v45, %v4923_v59  ;;  %v2117_v35 = vpop.permute.xlu0 %2116 }
 0x510   :  { %3705 = vset.pattern.permute.xlu1 %v5599_v48  ;;  %3882 = vpow2.f32 %v2972_v22 }
 0x511   :  { %2128 = vperm.xlu1 %3705, %v4596_v53   ;;  %3884 = vpow2.f32 %v2229_v19  ;;  %v2174_v19 = vmul.f32 %v4871_v45, %v2117_v35 }
 0x512   :  { %3886 = vpow2.f32 %v2974_v37 }
 0x513   :  { %v4929_v16 = vpop.permute.xlu1 %2280 }
 0x514   :  { %v2341_v9 = vmul.f32 %v4887_v46, %v4929_v16 }
 0x515   :  { %3706 = vset.pattern.permute.xlu1 %v5600_v50 }
 0x516   :  { %3041 = vperm.xlu1 %3706, %v4596_v53  }
 0x518   :  { %v2526_v61 = vpop.permute.xlu1 %2525 }
 0x51a   :  { %3707 = vset.pattern.permute.xlu1 %v5601_v11 }
 0x51b   :  { %2296 = vperm.xlu1 %3707, %v4596_v53   ;;  %v2583_v53 = vmul.f32 %v4814_v1, %v2526_v61  ;;  %v2750_v61 = vmul.f32 %v4839_v63, %v4900_v43  ;;  %v3873_v43 = vpop.eup %3872 }
 0x51c   :  { %v3875_v12 = vpop.eup %3874 }
 0x51d   :  { %v1769_v18 = vpop.permute.xlu1 %1768  ;;  %v2599_v40 = vadd.f32 %v2583_v53, %v2499_v15  ;;  %v2766_v49 = vadd.f32 %v2750_v61, %v2666_v5  ;;  %v3877_v59 = vpop.eup %3876 }
 0x51e   :  { %v1838_v4 = vmul.f32 %v4835_v0, %v1769_v18  ;;  %v3879_v15 = vpop.eup %3878 }
 0x51f   :  { %3708 = vset.pattern.permute.xlu1 %v5602_v20  ;;  %v2667_v58 = vmul.f32 %v3871_v28, %v2599_v40  ;;  %v2834_v22 = vmul.f32 %v3875_v12, %v2766_v49  ;;  %v3881_v61 = vpop.eup %3880 }
 0x520   :  { %2541 = vperm.xlu1 %3708, %v4602_v56   ;;  %v1854_v6 = vadd.f32 %v1838_v4, %v1738_v17  ;;  %v2189_v4 = vadd.f32 %v2173_v34, %v2089_v54  ;;  %v2285_v17 = vpop.permute.xlu0 %2284  ;;  %v3883_v30 = vpop.eup %3882  ;;  %v3086_v54 = vmul.f32 %v4875_v25, %v4952_v29 }
 0x521   :  { %v2934_v37 = vadd.f32 %v2918_v44, %v2834_v22  ;;  %v3885_v28 = vpop.eup %3884 }
 0x522   :  { %v2694_v55 = vpop.permute.xlu1 %2693  ;;  %v1922_v2 = vmul.f32 %v3873_v43, %v1854_v6  ;;  %v2257_v6 = vmul.f32 %v3881_v61, %v2189_v4  ;;  %v3887_v34 = vpop.eup %3886  ;;  %v2342_v43 = vmul.f32 %v4887_v46, %v2285_v17 }
 0x523   :  { %v2751_v24 = vmul.f32 %v4839_v63, %v2694_v55  ;;  %v3002_v35 = vmul.f32 %v3883_v30, %v2934_v37 }
 0x524   :  { %3709 = vset.pattern.permute.xlu1 %v5604_v39 }
 0x525   :  { %1788 = vperm.xlu1 %3709, %v4602_v56   ;;  %v2767_v14 = vadd.f32 %v2751_v24, %v2667_v58  ;;  %v3102_v12 = vadd.f32 %v3086_v54, %v3002_v35 }
 0x527   :  { %v1949_v18 = vpop.permute.xlu1 %1948  ;;  %v2835_v55 = vmul.f32 %v3879_v15, %v2767_v14 }
 0x528   :  { %v2006_v53 = vmul.f32 %v4853_v10, %v1949_v18 }
 0x529   :  { %3711 = vset.pattern.permute.xlu1 %v5606_v51 }
 0x52a   :  { %v2022_v21 = vadd.f32 %v2006_v53, %v1922_v2  ;;  %1964 = vperm.xlu1 %3711, %v4602_v56   ;;  %v2357_v2 = vadd.f32 %v2341_v9, %v2257_v6 }
 0x52c   :  { %v2090_v5 = vmul.f32 %v3877_v59, %v2022_v21  ;;  %v2862_v60 = vpop.permute.xlu1 %2861 }
 0x52d   :  { %v2919_v40 = vmul.f32 %v4859_v33, %v2862_v60 }
 0x52e   :  { %v2190_v24 = vadd.f32 %v2174_v19, %v2090_v5  ;;  %3713 = vset.pattern.permute.xlu1 %v5599_v48  ;;  %v4996_v19 = vld [vmem:[%s5559_s9 + $0x28] sm:$0xff] }
 0x52f   :  { %v2935_v49 = vadd.f32 %v2919_v40, %v2835_v55  ;;  %2132 = vperm.xlu1 %3713, %v4602_v56   ;;  %v2453_v61 = vmul.f32 %v4725_v26, %v4996_v19  ;;  %v1692_v6 = vmul.f32 %v4752_v38, %v4996_v19 }
 0x530   :  { %v2258_v58 = vmul.f32 %v3885_v28, %v2190_v24  ;;  %v2621_v28 = vmul.f32 %v4761_v41, %v4996_v19 }
 0x531   :  { %v3030_v18 = vpop.permute.xlu1 %3029  ;;  %v3003_v44 = vmul.f32 %v3887_v34, %v2935_v49  ;;  %v2474_v30 = vmul.f32 1.442695, %v2453_v61  ;;  %v1713_v49 = vmul.f32 1.442695, %v1692_v6  ;;  %v2044_v6 = vmul.f32 %v4799_v31, %v4996_v19 }
 0x532   :  { %v3087_v16 = vmul.f32 %v4875_v25, %v3030_v18  ;;  %v2358_v53 = vadd.f32 %v2342_v43, %v2258_v58  ;;  %v2642_v58 = vmul.f32 1.442695, %v2621_v28 }
 0x533   :  { %3715 = vset.pattern.permute.xlu1 %v5601_v11 }
 0x534   :  { %v3103_v14 = vadd.f32 %v3087_v16, %v3003_v44  ;;  %2300 = vperm.xlu1 %3715, %v4602_v56   ;;  %v3596_v22 = vpack.c.bf16 %v2358_v53, %v2357_v2  ;;  %v4987_v56 = vld [vmem:[%s5559_s9 + $0x20] sm:$0xff]  ;;  %v1876_v44 = vmul.f32 %v4777_v62, %v4996_v19  ;;  %v2789_v16 = vmul.f32 %v4781_v8, %v4996_v19 }
 0x535   :  { %v2452_v15 = vmul.f32 %v4725_v26, %v4987_v56  ;;  %v1691_v5 = vmul.f32 %v4752_v38, %v4987_v56  ;;  %v2620_v40 = vmul.f32 %v4761_v41, %v4987_v56  ;;  %v1875_v9 = vmul.f32 %v4777_v62, %v4987_v56 }
 0x536   :  { %v3620_v4 = vpack.c.bf16 %v3103_v14, %v3102_v12  ;;  %v2530_v21 = vpop.permute.xlu1 %2529  ;;  %3597 = vmatpush3.bf16.msra.mxu1 %v3596_v22  ;;  %v2788_v34 = vmul.f32 %v4781_v8, %v4987_v56  ;;  %v2043_v35 = vmul.f32 %v4799_v31, %v4987_v56  ;;  %v5607_v12 = vmov 6  }
 0x537   :  { %3598 = vmatprep.subr.bf16.mxu1 %v5603_v13  ;;  %v2472_v60 = vmul.f32 1.442695, %v2452_v15  ;;  %v1711_v17 = vmul.f32 1.442695, %v1691_v5  ;;  %v1895_v43 = vmul.f32 1.442695, %v1875_v9  ;;  %v2584_v53 = vmul.f32 %v4814_v1, %v2530_v21 }
 0x538   :  { %3717 = vset.pattern.permute.xlu1 %v5604_v39  ;;  %3621 = vmatpush3.bf16.msra.mxu0 %v3620_v4  ;;  %v2808_v2 = vmul.f32 1.442695, %v2788_v34  ;;  %v2063_v14 = vmul.f32 1.442695, %v2043_v35  ;;  %v1897_v15 = vmul.f32 1.442695, %v1876_v44  ;;  %v2956_v61 = vmul.f32 %v4806_v47, %v4987_v56 }
 0x539   :  { %1793 = vperm.xlu1 %3717, %v4616_v36   ;;  %3622 = vmatprep.subr.bf16.mxu0 %v5603_v13  ;;  %3888 = vpow2.f32 %v2472_v60 }
 0x53a   :  { %3890 = vpow2.f32 %v1711_v17 }
 0x53b   :  { %v1774_v29 = vpop.permute.xlu1 %1773  ;;  %3892 = vpow2.f32 %v2474_v30 }
 0x53c   :  { %v1839_v60 = vmul.f32 %v4835_v0, %v1774_v29 }
 0x53d   :  { %3719 = vset.pattern.permute.xlu1 %v5606_v51 }
 0x53e   :  { %1968 = vperm.xlu1 %3719, %v4616_v36  }
 0x540   :  { %v2698_v59 = vpop.permute.xlu1 %2697 }
 0x541   :  { %v2752_v29 = vmul.f32 %v4839_v63, %v2698_v59 }
 0x542   :  { %3721 = vset.pattern.permute.xlu1 %v5599_v48 }
 0x543   :  { %2136 = vperm.xlu1 %3721, %v4616_v36   ;;  %v3889_v54 = vpop.eup %3888 }
 0x544   :  { %v3891_v22 = vpop.eup %3890  ;;  %v2500_v4 = vmul.f32 0.0, %v3889_v54  ;;  %v2065_v54 = vmul.f32 1.442695, %v2044_v6 }
 0x545   :  { %v4998_v37 = vpop.permute.xlu1 %2865  ;;  %v3893_v5 = vpop.eup %3892  ;;  %v1739_v9 = vmul.f32 0.0, %v3891_v22 }
 0x546   :  { %v2600_v21 = vadd.f32 %v2584_v53, %v2500_v4  ;;  %v2501_v28 = vmul.f32 0.0, %v3893_v5  ;;  %v2212_v4 = vmul.f32 %v4827_v42, %v4996_v19  ;;  %v2920_v6 = vmul.f32 %v4859_v33, %v4998_v37 }
 0x547   :  { %3723 = vset.pattern.permute.xlu1 %v5601_v11  ;;  %v1855_v34 = vadd.f32 %v1839_v60, %v1739_v9 }
 0x548   :  { %2304 = vperm.xlu1 %3723, %v4616_v36   ;;  %v2640_v36 = vmul.f32 1.442695, %v2620_v40  ;;  %v2810_v40 = vmul.f32 1.442695, %v2789_v16  ;;  %v2233_v9 = vmul.f32 1.442695, %v2212_v4 }
 0x54a   :  { %v5006_v55 = vpop.permute.xlu1 %3033  ;;  %3894 = vpow2.f32 %v2640_v36  ;;  %v2957_v36 = vmul.f32 %v4806_v47, %v4996_v19 }
 0x54b   :  { %3896 = vpow2.f32 %v1713_v49  ;;  %v3088_v4 = vmul.f32 %v4875_v25, %v5006_v55 }
 0x54c   :  { %3724 = vset.pattern.permute.xlu1 %v5602_v20  ;;  %3898 = vpow2.f32 %v1895_v43  ;;  %v2976_v43 = vmul.f32 1.442695, %v2956_v61  ;;  %v2978_v53 = vmul.f32 1.442695, %v2957_v36 }
 0x54d   :  { %2549 = vperm.xlu1 %3724, %v4634_v57   ;;  %3900 = vpow2.f32 %v2642_v58 }
 0x54e   :  { %3902 = vpow2.f32 %v2808_v2  ;;  %v2211_v2 = vmul.f32 %v4827_v42, %v4987_v56 }
 0x54f   :  { %v2534_v24 = vpop.permute.xlu1 %2533  ;;  %3904 = vpow2.f32 %v2063_v14  ;;  %v1953_v14 = vpop.permute.xlu0 %1952 }
 0x550   :  { %v2585_v30 = vmul.f32 %v4814_v1, %v2534_v24  ;;  %3906 = vpow2.f32 %v1897_v15 }
 0x551   :  { %3726 = vset.pattern.permute.xlu1 %v5605_v32  ;;  %3908 = vpow2.f32 %v2810_v40  ;;  %v2007_v40 = vmul.f32 %v4853_v10, %v1953_v14 }
 0x552   :  { %2717 = vperm.xlu1 %3726, %v4634_v57   ;;  %v2601_v58 = vadd.f32 %v2585_v30, %v2501_v28  ;;  %3910 = vpow2.f32 %v2976_v43 }
 0x553   :  { %3912 = vpow2.f32 %v2065_v54 }
 0x554   :  { %v1779_v18 = vpop.permute.xlu1 %1778  ;;  %v3895_v49 = vpop.eup %3894  ;;  %3914 = vpow2.f32 %v2978_v53 }
 0x555   :  { %v3897_v24 = vpop.eup %3896  ;;  %v2668_v35 = vmul.f32 %v3895_v49, %v2600_v21  ;;  %v1840_v16 = vmul.f32 %v4835_v0, %v1779_v18  ;;  %v2231_v18 = vmul.f32 1.442695, %v2211_v2 }
 0x556   :  { %3728 = vset.pattern.permute.xlu1 %v5607_v12  ;;  %v3899_v59 = vpop.eup %3898  ;;  %v1740_v60 = vmul.f32 0.0, %v3897_v24 }
 0x557   :  { %2885 = vperm.xlu1 %3728, %v4634_v57   ;;  %v2768_v22 = vadd.f32 %v2752_v29, %v2668_v35  ;;  %v3901_v15 = vpop.eup %3900  ;;  %v1923_v5 = vmul.f32 %v3899_v59, %v1855_v34  ;;  %3916 = vpow2.f32 %v2231_v18  ;;  %v2121_v35 = vpop.permute.xlu0 %2120 }
 0x558   :  { %v2669_v56 = vmul.f32 %v3901_v15, %v2601_v58  ;;  %v3903_v61 = vpop.eup %3902  ;;  %v1856_v21 = vadd.f32 %v1840_v16, %v1740_v60  ;;  %3918 = vpow2.f32 %v2233_v9  ;;  %v2175_v59 = vmul.f32 %v4871_v45, %v2121_v35 }
 0x559   :  { %v2702_v17 = vpop.permute.xlu1 %2701  ;;  %v3905_v36 = vpop.eup %3904  ;;  %v2023_v29 = vadd.f32 %v2007_v40, %v1923_v5 }
 0x55a   :  { %v3907_v49 = vpop.eup %3906 }
 0x55b   :  { %3730 = vset.pattern.permute.xlu1 %v5600_v50  ;;  %v3909_v43 = vpop.eup %3908  ;;  %v1924_v24 = vmul.f32 %v3907_v49, %v1856_v21  ;;  %v2091_v2 = vmul.f32 %v3905_v36, %v2023_v29 }
 0x55c   :  { %3053 = vperm.xlu1 %3730, %v4634_v57   ;;  %v2753_v57 = vmul.f32 %v4839_v63, %v2702_v17  ;;  %v2836_v17 = vmul.f32 %v3903_v61, %v2768_v22 }
 0x55e   :  { %v1957_v44 = vpop.permute.xlu1 %1956  ;;  %v2769_v19 = vadd.f32 %v2753_v57, %v2669_v56  ;;  %v2936_v58 = vadd.f32 %v2920_v6, %v2836_v17  ;;  %v2191_v56 = vadd.f32 %v2175_v59, %v2091_v2 }
 0x55f   :  { %v2008_v28 = vmul.f32 %v4853_v10, %v1957_v44  ;;  %v3911_v44 = vpop.eup %3910 }
 0x560   :  { %3732 = vset.pattern.permute.xlu1 %v5602_v20  ;;  %v2837_v54 = vmul.f32 %v3909_v43, %v2769_v19  ;;  %v3913_v22 = vpop.eup %3912  ;;  %v3004_v57 = vmul.f32 %v3911_v44, %v2936_v58  ;;  %v5099_v44 = vld [vmem:[%s5559_s9 + $0x38] sm:$0xff] }
 0x561   :  { %2553 = vperm.xlu1 %3732, %v4657_v27   ;;  %v2024_v16 = vadd.f32 %v2008_v28, %v1924_v24  ;;  %v3915_v15 = vpop.eup %3914 }
 0x562   :  { %v3917_v21 = vpop.eup %3916  ;;  %v3104_v17 = vadd.f32 %v3088_v4, %v3004_v57 }
 0x563   :  { %v2870_v30 = vpop.permute.xlu1 %2869  ;;  %v2092_v5 = vmul.f32 %v3913_v22, %v2024_v16  ;;  %v2259_v19 = vmul.f32 %v3917_v21, %v2191_v56  ;;  %v3919_v9 = vpop.eup %3918  ;;  %v2455_v22 = vmul.f32 %v4725_v26, %v5099_v44  ;;  %v2623_v21 = vmul.f32 %v4761_v41, %v5099_v44 }
 0x564   :  { %v2921_v34 = vmul.f32 %v4859_v33, %v2870_v30  ;;  %v2289_v30 = vpop.permute.xlu0 %2288 }
 0x565   :  { %3734 = vset.pattern.permute.xlu1 %v5605_v32  ;;  %v2343_v29 = vmul.f32 %v4887_v46, %v2289_v30 }
 0x566   :  { %2721 = vperm.xlu1 %3734, %v4657_v27   ;;  %v2937_v53 = vadd.f32 %v2921_v34, %v2837_v54 }
 0x567   :  { %v2359_v34 = vadd.f32 %v2343_v29, %v2259_v19  ;;  %v2791_v29 = vmul.f32 %v4781_v8, %v5099_v44 }
 0x568   :  { %v2125_v37 = vpop.permute.xlu1 %2124  ;;  %v3005_v18 = vmul.f32 %v3915_v15, %v2937_v53  ;;  %v5078_v54 = vpop.permute.xlu0 %2709 }
 0x569   :  { %v2176_v14 = vmul.f32 %v4871_v45, %v2125_v37  ;;  %v5085_v37 = vld [vmem:[%s5559_s9 + $0x30] sm:$0xff] }
 0x56a   :  { %3736 = vset.pattern.permute.xlu1 %v5607_v12  ;;  %v2454_v2 = vmul.f32 %v4725_v26, %v5085_v37  ;;  %v1693_v4 = vmul.f32 %v4752_v38, %v5085_v37  ;;  %v2622_v15 = vmul.f32 %v4761_v41, %v5085_v37  ;;  %v1877_v19 = vmul.f32 %v4777_v62, %v5085_v37 }
 0x56b   :  { %2889 = vperm.xlu1 %3736, %v4657_v27   ;;  %v2192_v40 = vadd.f32 %v2176_v14, %v2092_v5  ;;  %v5117_v5 = vld [vmem:[%s5559_s9 + $0x48] sm:$0xff] }
 0x56c   :  { %v5091_v16 = vpop.permute.xlu0 %2877  ;;  %v2476_v59 = vmul.f32 1.442695, %v2454_v2  ;;  %v1715_v56 = vmul.f32 1.442695, %v1693_v4  ;;  %v2959_v4 = vmul.f32 %v4806_v47, %v5099_v44 }
 0x56d   :  { %v3038_v60 = vpop.permute.xlu1 %3037  ;;  %v2260_v28 = vmul.f32 %v3919_v9, %v2192_v40  ;;  %v2644_v40 = vmul.f32 1.442695, %v2622_v15 }
 0x56e   :  { %v3089_v61 = vmul.f32 %v4875_v25, %v3038_v60  ;;  %3920 = vpow2.f32 %v2476_v59  ;;  %v2478_v60 = vmul.f32 1.442695, %v2455_v22  ;;  %v1899_v59 = vmul.f32 1.442695, %v1877_v19 }
 0x56f   :  { %3738 = vset.pattern.permute.xlu1 %v5600_v50  ;;  %v2814_v22 = vmul.f32 1.442695, %v2791_v29 }
 0x570   :  { %v3105_v6 = vadd.f32 %v3089_v61, %v3005_v18  ;;  %3057 = vperm.xlu1 %3738, %v4657_v27   ;;  %v5106_v57 = vpop.permute.xlu0 %3045  ;;  %v1694_v61 = vmul.f32 %v4752_v38, %v5099_v44  ;;  %3922 = vpow2.f32 %v2478_v60  ;;  %v2045_v60 = vmul.f32 %v4799_v31, %v5085_v37 }
 0x571   :  { %3924 = vpow2.f32 %v1715_v56 }
 0x572   :  { %v3623_v36 = vpack.c.bf16 %v3105_v6, %v3104_v17  ;;  %v2293_v55 = vpop.permute.xlu1 %2292  ;;  %v1696_v17 = vmul.f32 %v4752_v38, %v5117_v5  ;;  %v2790_v6 = vmul.f32 %v4781_v8, %v5085_v37  ;;  %v1717_v9 = vmul.f32 1.442695, %v1694_v61 }
 0x573   :  { %v2344_v49 = vmul.f32 %v4887_v46, %v2293_v55  ;;  %3926 = vpow2.f32 %v2644_v40  ;;  %v2646_v55 = vmul.f32 1.442695, %v2623_v21  ;;  %v2067_v29 = vmul.f32 1.442695, %v2045_v60 }
 0x574   :  { %3739 = vset.pattern.permute.xlu1 %v5601_v11  ;;  %3624 = vmatpush3.bf16.msra.mxu0 %v3623_v36  ;;  %v5125_v30 = vpop.permute.xlu0 %2545  ;;  %3928 = vpow2.f32 %v1717_v9 }
 0x575   :  { %v2360_v43 = vadd.f32 %v2344_v49, %v2260_v28  ;;  %2312 = vperm.xlu1 %3739, %v4657_v27   ;;  %3625 = vmatprep.subr.bf16.mxu0 %v5603_v13  ;;  %v1721_v28 = vmul.f32 1.442695, %v1696_v17  ;;  %v1878_v49 = vmul.f32 %v4777_v62, %v5099_v44  ;;  %3930 = vpow2.f32 %v2646_v55 }
 0x577   :  { %v3599_v24 = vpack.c.bf16 %v2360_v43, %v2359_v34  ;;  %v2538_v35 = vpop.permute.xlu1 %2537  ;;  %v2812_v43 = vmul.f32 1.442695, %v2790_v6  ;;  %3932 = vpow2.f32 %v1721_v28  ;;  %v1901_v61 = vmul.f32 1.442695, %v1878_v49 }
 0x578   :  { %v3921_v34 = vpop.eup %3920  ;;  %v2586_v2 = vmul.f32 %v4814_v1, %v2538_v35  ;;  %v2046_v35 = vmul.f32 %v4799_v31, %v5099_v44  ;;  %v2982_v6 = vmul.f32 1.442695, %v2959_v4  ;;  %v1880_v49 = vmul.f32 %v4777_v62, %v5117_v5 }
 0x579   :  { %3740 = vset.pattern.permute.xlu1 %v5602_v20  ;;  %3600 = vmatpush3.bf16.msra.mxu1 %v3599_v24  ;;  %v5144_v24 = vpop.permute.xlu0 %2713  ;;  %v2502_v15 = vmul.f32 0.0, %v3921_v34  ;;  %3934 = vpow2.f32 %v2812_v43 }
 0x57a   :  { %2557 = vperm.xlu1 %3740, %v4671_v52   ;;  %3601 = vmatprep.subr.bf16.mxu1 %v5603_v13  ;;  %3936 = vpow2.f32 %v1899_v59  ;;  %v3923_v17 = vpop.eup %3922  ;;  %v2069_v43 = vmul.f32 1.442695, %v2046_v35 }
 0x57b   :  { %v2602_v21 = vadd.f32 %v2586_v2, %v2502_v15  ;;  %3938 = vpow2.f32 %v2814_v22  ;;  %v3925_v19 = vpop.eup %3924  ;;  %v5169_v2 = vld [vmem:[%s5559_s9 + $0x40] sm:$0xff]  ;;  %v2503_v22 = vmul.f32 0.0, %v3923_v17  ;;  %v2213_v15 = vmul.f32 %v4827_v42, %v5085_v37 }
 0x57c   :  { %v5074_v58 = vpop.permute.xlu1 %1783  ;;  %3940 = vpow2.f32 %v1901_v61  ;;  %v1695_v17 = vmul.f32 %v4752_v38, %v5169_v2 }
 0x57d   :  { %v5158_v9 = vpop.permute.xlu0 %2881  ;;  %v3927_v28 = vpop.eup %3926 }
 0x57e   :  { %3741 = vset.pattern.permute.xlu1 %v5604_v39  ;;  %v2670_v59 = vmul.f32 %v3927_v28, %v2602_v21  ;;  %v3929_v60 = vpop.eup %3928  ;;  %v1905_v21 = vmul.f32 1.442695, %v1880_v49 }
 0x57f   :  { %1808 = vperm.xlu1 %3741, %v4671_v52   ;;  %v3931_v35 = vpop.eup %3930 }
 0x581   :  { %v5080_v27 = vpop.permute.xlu1 %2705  ;;  %v5182_v28 = vpop.permute.xlu0 %3049 }
 0x582   :  { %v2754_v55 = vmul.f32 %v4839_v63, %v5080_v27  ;;  %v1841_v27 = vmul.f32 %v4835_v0, %v5074_v58  ;;  %v2755_v58 = vmul.f32 %v4839_v63, %v5078_v54 }
 0x583   :  { %3742 = vset.pattern.permute.xlu1 %v5605_v32 }
 0x584   :  { %2725 = vperm.xlu1 %3742, %v4671_v52   ;;  %v2770_v61 = vadd.f32 %v2754_v55, %v2670_v59 }
 0x586   :  { %v5093_v53 = vpop.permute.xlu1 %1960 }
 0x588   :  { %3743 = vset.pattern.permute.xlu1 %v5606_v51 }
 0x589   :  { %1980 = vperm.xlu1 %3743, %v4671_v52  }
 0x58b   :  { %v5102_v14 = vpop.permute.xlu1 %2873 }
 0x58d   :  { %3744 = vset.pattern.permute.xlu1 %v5607_v12 }
 0x58e   :  { %2893 = vperm.xlu1 %3744, %v4671_v52  }
 0x590   :  { %v5119_v18 = vpop.permute.xlu1 %2128 }
 0x592   :  { %3745 = vset.pattern.permute.xlu1 %v5599_v48 }
 0x593   :  { %2148 = vperm.xlu1 %3745, %v4671_v52   ;;  %v2958_v52 = vmul.f32 %v4806_v47, %v5085_v37  ;;  %v3933_v37 = vpop.eup %3932 }
 0x594   :  { %v3935_v59 = vpop.eup %3934 }
 0x595   :  { %v5135_v36 = vpop.permute.xlu1 %3041  ;;  %v2980_v40 = vmul.f32 1.442695, %v2958_v52  ;;  %v2214_v52 = vmul.f32 %v4827_v42, %v5099_v44  ;;  %v1741_v44 = vmul.f32 0.0, %v3925_v19  ;;  %v2922_v19 = vmul.f32 %v4859_v33, %v5102_v14  ;;  %v3937_v49 = vpop.eup %3936 }
 0x596   :  { %v2838_v38 = vmul.f32 %v3935_v59, %v2770_v61  ;;  %v2923_v14 = vmul.f32 %v4859_v33, %v5091_v16  ;;  %v3090_v16 = vmul.f32 %v4875_v25, %v5135_v36 }
 0x597   :  { %3748 = vset.pattern.permute.xlu1 %v5602_v20  ;;  %3942 = vpow2.f32 %v2980_v40 }
 0x598   :  { %2561 = vperm.xlu1 %3748, %v4681_v7   ;;  %3944 = vpow2.f32 %v2982_v6  ;;  %v1857_v6 = vadd.f32 %v1841_v27, %v1741_v44  ;;  %v3939_v27 = vpop.eup %3938 }
 0x599   :  { %3946 = vpow2.f32 %v2067_v29 }
 0x59a   :  { %v5152_v56 = vpop.permute.xlu1 %2296  ;;  %3948 = vpow2.f32 %v2069_v43  ;;  %v2009_v43 = vmul.f32 %v4853_v10, %v5093_v53 }
 0x59b   :  { %3950 = vpow2.f32 %v1905_v21 }
 0x59c   :  { %3749 = vset.pattern.permute.xlu1 %v5604_v39 }
 0x59d   :  { %1813 = vperm.xlu1 %3749, %v4681_v7  }
 0x59f   :  { %v2542_v34 = vpop.permute.xlu1 %2541 }
 0x5a0   :  { %v2587_v4 = vmul.f32 %v4814_v1, %v2542_v34  ;;  %v2237_v34 = vmul.f32 1.442695, %v2214_v52  ;;  %v1719_v52 = vmul.f32 1.442695, %v1695_v17 }
 0x5a1   :  { %3750 = vset.pattern.permute.xlu1 %v5605_v32 }
 0x5a2   :  { %v2603_v40 = vadd.f32 %v2587_v4, %v2503_v22  ;;  %2729 = vperm.xlu1 %3750, %v4681_v7   ;;  %v2235_v22 = vmul.f32 1.442695, %v2213_v15  ;;  %v1742_v4 = vmul.f32 0.0, %v3929_v60  ;;  %v3941_v15 = vpop.eup %3940  ;;  %v1925_v60 = vmul.f32 %v3937_v49, %v1857_v6 }
 0x5a3   :  { %3952 = vpow2.f32 %v2237_v34  ;;  %v2456_v49 = vmul.f32 %v4725_v26, %v5169_v2 }
 0x5a4   :  { %v2671_v55 = vmul.f32 %v3931_v35, %v2603_v40  ;;  %v1789_v29 = vpop.permute.xlu1 %1788  ;;  %v2938_v40 = vadd.f32 %v2922_v19, %v2838_v38  ;;  %3954 = vpow2.f32 %v2235_v22  ;;  %v2025_v59 = vadd.f32 %v2009_v43, %v1925_v60 }
 0x5a5   :  { %v1842_v54 = vmul.f32 %v4835_v0, %v1789_v29  ;;  %v3943_v29 = vpop.eup %3942  ;;  %v3091_v38 = vmul.f32 %v4875_v25, %v5106_v57  ;;  %3956 = vpow2.f32 %v1719_v52  ;;  %v2177_v19 = vmul.f32 %v4871_v45, %v5119_v18 }
 0x5a6   :  { %v2771_v20 = vadd.f32 %v2755_v58, %v2671_v55  ;;  %3751 = vset.pattern.permute.xlu1 %v5606_v51  ;;  %v1879_v58 = vmul.f32 %v4777_v62, %v5169_v2  ;;  %v1799_v55 = vpop.permute.xlu0 %1798  ;;  %v3006_v34 = vmul.f32 %v3943_v29, %v2938_v40  ;;  %v2047_v40 = vmul.f32 %v4799_v31, %v5169_v2 }
 0x5a7   :  { %v1858_v44 = vadd.f32 %v1842_v54, %v1742_v4  ;;  %1984 = vperm.xlu1 %3751, %v4681_v7   ;;  %v3945_v4 = vpop.eup %3944  ;;  %v1844_v57 = vmul.f32 %v4835_v0, %v1799_v55 }
 0x5a8   :  { %v2839_v35 = vmul.f32 %v3939_v27, %v2771_v20  ;;  %v2048_v20 = vmul.f32 %v4799_v31, %v5117_v5  ;;  %v3947_v6 = vpop.eup %3946  ;;  %v1903_v43 = vmul.f32 1.442695, %v1879_v58 }
 0x5a9   :  { %v1965_v53 = vpop.permute.xlu1 %1964  ;;  %v1926_v61 = vmul.f32 %v3941_v15, %v1858_v44  ;;  %v3949_v54 = vpop.eup %3948  ;;  %v2093_v27 = vmul.f32 %v3947_v6, %v2025_v59 }
 0x5aa   :  { %v2939_v21 = vadd.f32 %v2923_v14, %v2839_v35  ;;  %v2010_v17 = vmul.f32 %v4853_v10, %v1965_v53  ;;  %v3106_v14 = vadd.f32 %v3090_v16, %v3006_v34  ;;  %v2073_v60 = vmul.f32 1.442695, %v2048_v20  ;;  %v3951_v53 = vpop.eup %3950 }
 0x5ab   :  { %3755 = vset.pattern.permute.xlu1 %v5601_v11  ;;  %v2193_v35 = vadd.f32 %v2177_v19, %v2093_v27  ;;  %v2345_v16 = vmul.f32 %v4887_v46, %v5152_v56  ;;  %3958 = vpow2.f32 %v1903_v43  ;;  %v2071_v20 = vmul.f32 1.442695, %v2047_v40 }
 0x5ac   :  { %v2026_v22 = vadd.f32 %v2010_v17, %v1926_v61  ;;  %2320 = vperm.xlu1 %3755, %v4681_v7   ;;  %v3007_v36 = vmul.f32 %v3945_v4, %v2939_v21  ;;  %v1744_v7 = vmul.f32 0.0, %v3933_v37  ;;  %v2480_v61 = vmul.f32 1.442695, %v2456_v49  ;;  %v1973_v17 = vpop.permute.xlu0 %1972 }
 0x5ad   :  { %v3953_v58 = vpop.eup %3952  ;;  %3960 = vpow2.f32 %v2073_v60  ;;  %v2216_v37 = vmul.f32 %v4827_v42, %v5117_v5  ;;  %v2215_v34 = vmul.f32 %v4827_v42, %v5169_v2 }
 0x5ae   :  { %v2133_v44 = vpop.permute.xlu1 %2132  ;;  %v2094_v52 = vmul.f32 %v3949_v54, %v2026_v22  ;;  %v3107_v15 = vadd.f32 %v3091_v38, %v3007_v36  ;;  %v1860_v59 = vadd.f32 %v1844_v57, %v1744_v7  ;;  %v3955_v21 = vpop.eup %3954  ;;  %3962 = vpow2.f32 %v2480_v61 }
 0x5af   :  { %v2178_v18 = vmul.f32 %v4871_v45, %v2133_v44  ;;  %v2261_v6 = vmul.f32 %v3955_v21, %v2193_v35  ;;  %v3957_v56 = vpop.eup %3956  ;;  %v2012_v36 = vmul.f32 %v4853_v10, %v1973_v17  ;;  %v2624_v57 = vmul.f32 %v4761_v41, %v5169_v2 }
 0x5b0   :  { %3757 = vset.pattern.permute.xlu1 %v5604_v39  ;;  %v3626_v29 = vpack.c.bf16 %v3107_v15, %v3106_v14  ;;  %v1928_v22 = vmul.f32 %v3951_v53, %v1860_v59  ;;  %v2241_v43 = vmul.f32 1.442695, %v2216_v37  ;;  %3964 = vpow2.f32 %v2071_v20  ;;  %v2141_v7 = vpop.permute.xlu0 %2140 }
 0x5b1   :  { %v2194_v55 = vadd.f32 %v2178_v18, %v2094_v52  ;;  %1818 = vperm.xlu1 %3757, %v4699_v3   ;;  %v2361_v54 = vadd.f32 %v2345_v16, %v2261_v6  ;;  %v2239_v44 = vmul.f32 1.442695, %v2215_v34  ;;  %v2457_v52 = vmul.f32 %v4725_v26, %v5117_v5 }
 0x5b2   :  { %3627 = vmatpush3.bf16.msra.mxu0 %v3626_v29  ;;  %v1743_v15 = vmul.f32 0.0, %v3957_v56  ;;  %v2028_v18 = vadd.f32 %v2012_v36, %v1928_v22  ;;  %v2648_v40 = vmul.f32 1.442695, %v2624_v57  ;;  %3966 = vpow2.f32 %v2241_v43 }
 0x5b3   :  { %v2301_v4 = vpop.permute.xlu1 %2300  ;;  %v2262_v38 = vmul.f32 %v3953_v58, %v2194_v55  ;;  %3628 = vmatprep.subr.bf16.mxu0 %v5603_v13  ;;  %3968 = vpow2.f32 %v2239_v44  ;;  %v2482_v53 = vmul.f32 1.442695, %v2457_v52  ;;  %v2180_v16 = vmul.f32 %v4871_v45, %v2141_v7 }
 0x5b4   :  { %v2346_v19 = vmul.f32 %v4887_v46, %v2301_v4  ;;  %v2625_v17 = vmul.f32 %v4761_v41, %v5117_v5  ;;  %3970 = vpow2.f32 %v2648_v40  ;;  %v2792_v4 = vmul.f32 %v4781_v8, %v5169_v2 }
 0x5b5   :  { %3759 = vset.pattern.permute.xlu1 %v5606_v51  ;;  %v3959_v29 = vpop.eup %3958  ;;  %3972 = vpow2.f32 %v2482_v53  ;;  %v2588_v6 = vmul.f32 %v4814_v1, %v5125_v30  ;;  %v2793_v57 = vmul.f32 %v4781_v8, %v5117_v5 }
 0x5b6   :  { %v2362_v49 = vadd.f32 %v2346_v19, %v2262_v38  ;;  %1988 = vperm.xlu1 %3759, %v4699_v3   ;;  %v2650_v22 = vmul.f32 1.442695, %v2625_v17  ;;  %v2816_v36 = vmul.f32 1.442695, %v2792_v4 }
 0x5b7   :  { %v3961_v61 = vpop.eup %3960  ;;  %v2818_v7 = vmul.f32 1.442695, %v2793_v57 }
 0x5b8   :  { %v3602_v27 = vpack.c.bf16 %v2362_v49, %v2361_v54  ;;  %v1794_v14 = vpop.permute.xlu1 %1793  ;;  %v2096_v59 = vmul.f32 %v3961_v61, %v2028_v18  ;;  %v3963_v37 = vpop.eup %3962  ;;  %3974 = vpow2.f32 %v2650_v22 }
 0x5b9   :  { %v1843_v60 = vmul.f32 %v4835_v0, %v1794_v14  ;;  %v2309_v54 = vpop.permute.xlu0 %2308  ;;  %v2504_v43 = vmul.f32 0.0, %v3963_v37  ;;  %3976 = vpow2.f32 %v2816_v36 }
 0x5ba   :  { %3760 = vset.pattern.permute.xlu1 %v5607_v12  ;;  %3603 = vmatpush3.bf16.msra.mxu1 %v3602_v27  ;;  %v3965_v20 = vpop.eup %3964  ;;  %v2196_v19 = vadd.f32 %v2180_v16, %v2096_v59  ;;  %3978 = vpow2.f32 %v2818_v7 }
 0x5bb   :  { %v1859_v35 = vadd.f32 %v1843_v60, %v1743_v15  ;;  %2901 = vperm.xlu1 %3760, %v4699_v3   ;;  %3604 = vmatprep.subr.bf16.mxu1 %v5603_v13  ;;  %v2604_v30 = vadd.f32 %v2588_v6, %v2504_v43  ;;  %v2348_v15 = vmul.f32 %v4887_v46, %v2309_v54 }
 0x5bc   :  { %v3967_v27 = vpop.eup %3966  ;;  %v2960_v60 = vmul.f32 %v4806_v47, %v5169_v2 }
 0x5bd   :  { %v1969_v55 = vpop.permute.xlu1 %1968  ;;  %v1927_v58 = vmul.f32 %v3959_v29, %v1859_v35  ;;  %v3969_v44 = vpop.eup %3968  ;;  %v2264_v52 = vmul.f32 %v3967_v27, %v2196_v19  ;;  %v2961_v29 = vmul.f32 %v4806_v47, %v5117_v5 }
 0x5be   :  { %v2011_v21 = vmul.f32 %v4853_v10, %v1969_v55  ;;  %v3971_v53 = vpop.eup %3970  ;;  %v2984_v2 = vmul.f32 1.442695, %v2960_v60 }
 0x5bf   :  { %3761 = vset.pattern.permute.xlu1 %v5599_v48  ;;  %v3973_v61 = vpop.eup %3972  ;;  %v2672_v55 = vmul.f32 %v3971_v53, %v2604_v30  ;;  %v2364_v59 = vadd.f32 %v2348_v15, %v2264_v52  ;;  %v2986_v37 = vmul.f32 1.442695, %v2961_v29  ;;  %v3092_v30 = vmul.f32 %v4875_v25, %v5182_v28  ;;  %v5278_v29 = vld [vmem:[%s5559_s9 + $0x50] sm:$0xff] }
 0x5c0   :  { %v2027_v38 = vadd.f32 %v2011_v21, %v1927_v58  ;;  %2156 = vperm.xlu1 %3761, %v4699_v3   ;;  %v2756_v58 = vmul.f32 %v4839_v63, %v5144_v24  ;;  %v2505_v4 = vmul.f32 0.0, %v3973_v61  ;;  %3980 = vpow2.f32 %v2984_v2 }
 0x5c1   :  { %3982 = vpow2.f32 %v2986_v37  ;;  %v2458_v28 = vmul.f32 %v4725_v26, %v5278_v29  ;;  %v5608_v61 = vmov 4  }
 0x5c2   :  { %v2137_v34 = vpop.permute.xlu1 %2136  ;;  %v2095_v56 = vmul.f32 %v3965_v20, %v2027_v38  ;;  %v2772_v38 = vadd.f32 %v2756_v58, %v2672_v55  ;;  %v3975_v24 = vpop.eup %3974  ;;  %v5609_v55 = vld [vmem:[#allocation5_spill] sm:$0xff] }
 0x5c3   :  { %v2179_v49 = vmul.f32 %v4871_v45, %v2137_v34  ;;  %v2484_v58 = vmul.f32 1.442695, %v2458_v28 }
 0x5c4   :  { %3762 = vset.pattern.permute.xlu1 %v5600_v50 }
 0x5c5   :  { %v2195_v14 = vadd.f32 %v2179_v49, %v2095_v56  ;;  %3069 = vperm.xlu1 %3762, %v4699_v3   ;;  %v2924_v56 = vmul.f32 %v4859_v33, %v5158_v9  ;;  %3984 = vpow2.f32 %v2484_v58 }
 0x5c7   :  { %v2305_v18 = vpop.permute.xlu1 %2304  ;;  %v2263_v40 = vmul.f32 %v3969_v44, %v2195_v14 }
 0x5c8   :  { %v2347_v35 = vmul.f32 %v4887_v46, %v2305_v18 }
 0x5c9   :  { %3763 = vset.pattern.permute.xlu1 %v5601_v11 }
 0x5ca   :  { %v2363_v16 = vadd.f32 %v2347_v35, %v2263_v40  ;;  %2324 = vperm.xlu1 %3763, %v4699_v3   ;;  %v3977_v3 = vpop.eup %3976 }
 0x5cb   :  { %v2840_v34 = vmul.f32 %v3977_v3, %v2772_v38  ;;  %v3979_v36 = vpop.eup %3978 }
 0x5cc   :  { %v3605_v21 = vpack.c.bf16 %v2364_v59, %v2363_v16  ;;  %v2550_v17 = vpop.permute.xlu1 %2549  ;;  %v3981_v27 = vpop.eup %3980  ;;  %v5610_v16 = vld [vmem:[#allocation6_spill] sm:$0xff] }
 0x5cd   :  { %v2589_v5 = vmul.f32 %v4814_v1, %v2550_v17  ;;  %v2940_v54 = vadd.f32 %v2924_v56, %v2840_v34  ;;  %v3983_v9 = vpop.eup %3982  ;;  %v1697_v2 = vmul.f32 %v5610_v16, %v5278_v29 }
 0x5ce   :  { %3765 = vset.pattern.permute.xlu1 %v5604_v39  ;;  %3606 = vmatpush3.bf16.msra.mxu1 %v3605_v21  ;;  %v2626_v21 = vmul.f32 %v4761_v41, %v5278_v29 }
 0x5cf   :  { %v2605_v20 = vadd.f32 %v2589_v5, %v2505_v4  ;;  %1823 = vperm.xlu1 %3765, %v4715_v23   ;;  %3607 = vmatprep.subr.bf16.mxu1 %v5603_v13  ;;  %v3008_v44 = vmul.f32 %v3981_v27, %v2940_v54  ;;  %v1723_v37 = vmul.f32 1.442695, %v1697_v2 }
 0x5d0   :  { %v2652_v5 = vmul.f32 1.442695, %v2626_v21  ;;  %v2217_v21 = vmul.f32 %v4827_v42, %v5278_v29 }
 0x5d1   :  { %v2718_v6 = vpop.permute.xlu1 %2717  ;;  %v2673_v19 = vmul.f32 %v3975_v24, %v2605_v20  ;;  %v3108_v18 = vadd.f32 %v3092_v30, %v3008_v44  ;;  %3986 = vpow2.f32 %v1723_v37  ;;  %v2794_v24 = vmul.f32 %v4781_v8, %v5278_v29 }
 0x5d2   :  { %v2757_v22 = vmul.f32 %v4839_v63, %v2718_v6  ;;  %3988 = vpow2.f32 %v2652_v5 }
 0x5d3   :  { %3766 = vset.pattern.permute.xlu1 %v5605_v32 }
 0x5d4   :  { %v2773_v39 = vadd.f32 %v2757_v22, %v2673_v19  ;;  %2737 = vperm.xlu1 %3766, %v4715_v23   ;;  %v3985_v19 = vpop.eup %3984  ;;  %v2820_v22 = vmul.f32 1.442695, %v2794_v24 }
 0x5d5   :  { %v2506_v54 = vmul.f32 0.0, %v3985_v19 }
 0x5d6   :  { %v2886_v49 = vpop.permute.xlu1 %2885  ;;  %v2841_v57 = vmul.f32 %v3979_v36, %v2773_v39 }
 0x5d7   :  { %v2925_v43 = vmul.f32 %v4859_v33, %v2886_v49 }
 0x5d8   :  { %3767 = vset.pattern.permute.xlu1 %v5606_v51 }
 0x5d9   :  { %v2941_v14 = vadd.f32 %v2925_v43, %v2841_v57  ;;  %1992 = vperm.xlu1 %3767, %v4715_v23   ;;  %v2049_v57 = vmul.f32 %v4799_v31, %v5278_v29  ;;  %v1804_v43 = vpop.permute.xlu0 %1803 }
 0x5db   :  { %v3054_v52 = vpop.permute.xlu1 %3053  ;;  %v3009_v15 = vmul.f32 %v3983_v9, %v2941_v14  ;;  %v3987_v14 = vpop.eup %3986  ;;  %v2962_v9 = vmul.f32 %v4806_v47, %v5278_v29 }
 0x5dc   :  { %v3093_v60 = vmul.f32 %v4875_v25, %v3054_v52  ;;  %v3989_v44 = vpop.eup %3988 }
 0x5dd   :  { %3768 = vset.pattern.permute.xlu1 %v5607_v12  ;;  %v2988_v58 = vmul.f32 1.442695, %v2962_v9  ;;  %v1977_v2 = vpop.permute.xlu0 %1976 }
 0x5de   :  { %v3109_v40 = vadd.f32 %v3093_v60, %v3009_v15  ;;  %2905 = vperm.xlu1 %3768, %v4715_v23   ;;  %v1845_v60 = vmul.f32 %v4835_v0, %v1804_v43 }
 0x5e0   :  { %v3629_v7 = vpack.c.bf16 %v3109_v40, %v3108_v18  ;;  %v2554_v35 = vpop.permute.xlu1 %2553 }
 0x5e1   :  { %v2590_v56 = vmul.f32 %v4814_v1, %v2554_v35 }
 0x5e2   :  { %3769 = vset.pattern.permute.xlu1 %v5599_v48  ;;  %3630 = vmatpush3.bf16.msra.mxu0 %v3629_v7  ;;  %v5292_v48 = vld [vmem:[%s5559_s9 + $0x58] sm:$0xff] }
 0x5e3   :  { %2160 = vperm.xlu1 %3769, %v4715_v23   ;;  %3631 = vmatprep.subr.bf16.mxu0 %v5603_v13  ;;  %v2459_v17 = vmul.f32 %v4725_v26, %v5292_v48  ;;  %v1698_v20 = vmul.f32 %v5610_v16, %v5292_v48  ;;  %v1882_v49 = vmul.f32 %v4777_v62, %v5292_v48 }
 0x5e4   :  { %v2606_v27 = vadd.f32 %v2590_v56, %v2506_v54  ;;  %v2963_v40 = vmul.f32 %v4806_v47, %v5292_v48 }
 0x5e5   :  { %v2722_v53 = vpop.permute.xlu1 %2721  ;;  %v2486_v38 = vmul.f32 1.442695, %v2459_v17  ;;  %v1725_v6 = vmul.f32 1.442695, %v1698_v20  ;;  %v1909_v52 = vmul.f32 1.442695, %v1882_v49 }
 0x5e6   :  { %v2674_v7 = vmul.f32 %v3989_v44, %v2606_v27  ;;  %v2758_v35 = vmul.f32 %v4839_v63, %v2722_v53  ;;  %v2218_v53 = vmul.f32 %v4827_v42, %v5292_v48 }
 0x5e7   :  { %3771 = vset.pattern.permute.xlu1 %v5608_v61  ;;  %3990 = vpow2.f32 %v2486_v38  ;;  %v2050_v61 = vmul.f32 %v4799_v31, %v5292_v48 }
 0x5e8   :  { %2573 = vperm.xlu1 %3771, %v5609_v55   ;;  %3992 = vpow2.f32 %v1725_v6  ;;  %v2774_v20 = vadd.f32 %v2758_v35, %v2674_v7 }
 0x5e9   :  { %v2077_v24 = vmul.f32 1.442695, %v2050_v61 }
 0x5ea   :  { %v5287_v59 = vpop.permute.xlu1 %2889 }
 0x5eb   :  { %v2926_v49 = vmul.f32 %v4859_v33, %v5287_v59 }
 0x5ec   :  { %3773 = vset.pattern.permute.xlu1 %v5605_v32  ;;  %v1881_v32 = vmul.f32 %v4777_v62, %v5278_v29  ;;  %v2243_v29 = vmul.f32 1.442695, %v2217_v21 }
 0x5ed   :  { %2741 = vperm.xlu1 %3773, %v5609_v55  }
 0x5ee   :  { %v1907_v34 = vmul.f32 1.442695, %v1881_v32 }
 0x5ef   :  { %v5302_v4 = vpop.permute.xlu1 %3057 }
 0x5f0   :  { %3994 = vpow2.f32 %v1907_v34  ;;  %v2245_v34 = vmul.f32 1.442695, %v2218_v53 }
 0x5f1   :  { %3774 = vset.pattern.permute.xlu1 %v5606_v51  ;;  %v2627_v51 = vmul.f32 %v4761_v41, %v5292_v48  ;;  %3996 = vpow2.f32 %v2820_v22  ;;  %v3991_v15 = vpop.eup %3990  ;;  %v2013_v22 = vmul.f32 %v4853_v10, %v1977_v2 }
 0x5f2   :  { %1996 = vperm.xlu1 %3774, %v5609_v55   ;;  %v2507_v17 = vmul.f32 0.0, %v3991_v15  ;;  %v3993_v38 = vpop.eup %3992 }
 0x5f3   :  { %v2654_v36 = vmul.f32 1.442695, %v2627_v51 }
 0x5f4   :  { %v5312_v3 = vpop.permute.xlu1 %2312 }
 0x5f5   :  { %3998 = vpow2.f32 %v2654_v36  ;;  %v2145_v36 = vpop.permute.xlu0 %2144 }
 0x5f6   :  { %3775 = vset.pattern.permute.xlu1 %v5607_v12  ;;  %v2795_v12 = vmul.f32 %v4781_v8, %v5292_v48  ;;  %4000 = vpow2.f32 %v1909_v52 }
 0x5f7   :  { %2909 = vperm.xlu1 %3775, %v5609_v55  }
 0x5f8   :  { %v2822_v18 = vmul.f32 1.442695, %v2795_v12 }
 0x5f9   :  { %v2558_v39 = vpop.permute.xlu1 %2557 }
 0x5fa   :  { %v2591_v28 = vmul.f32 %v4814_v1, %v2558_v39  ;;  %4002 = vpow2.f32 %v2822_v18  ;;  %v3995_v51 = vpop.eup %3994  ;;  %v1746_v39 = vmul.f32 0.0, %v3993_v38  ;;  %v3062_v18 = vpop.permute.xlu0 %3061 }
 0x5fb   :  { %3777 = vset.pattern.permute.xlu1 %v5600_v50  ;;  %v2075_v50 = vmul.f32 1.442695, %v2049_v57  ;;  %v3997_v6 = vpop.eup %3996  ;;  %v3095_v53 = vmul.f32 %v4875_v25, %v3062_v18 }
 0x5fc   :  { %3077 = vperm.xlu1 %3777, %v5609_v55   ;;  %v1745_v55 = vmul.f32 0.0, %v3987_v14  ;;  %v2607_v32 = vadd.f32 %v2591_v28, %v2507_v17  ;;  %v2842_v54 = vmul.f32 %v3997_v6, %v2774_v20  ;;  %v2181_v28 = vmul.f32 %v4871_v45, %v2145_v36  ;;  %v5365_v36 = vld [vmem:[%s5559_s9 + $0x68] sm:$0xff] }
 0x5fd   :  { %4004 = vpow2.f32 %v2075_v50  ;;  %v2349_v6 = vmul.f32 %v4887_v46, %v5312_v3  ;;  %v2629_v18 = vmul.f32 %v4761_v41, %v5365_v36 }
 0x5fe   :  { %v1809_v30 = vpop.permute.xlu1 %1808  ;;  %v1861_v37 = vadd.f32 %v1845_v60, %v1745_v55  ;;  %4006 = vpow2.f32 %v2988_v58  ;;  %v3094_v58 = vmul.f32 %v4875_v25, %v5302_v4 }
 0x5ff   :  { %v3999_v56 = vpop.eup %3998 }
 0x600   :  { %3778 = vset.pattern.permute.xlu1 %v5601_v11  ;;  %v2990_v11 = vmul.f32 1.442695, %v2963_v40  ;;  %v1929_v48 = vmul.f32 %v3995_v51, %v1861_v37  ;;  %v2675_v57 = vmul.f32 %v3999_v56, %v2607_v32  ;;  %v4001_v44 = vpop.eup %4000  ;;  %v2317_v32 = vpop.permute.xlu0 %2316 }
 0x601   :  { %2328 = vperm.xlu1 %3778, %v4715_v23   ;;  %v1846_v23 = vmul.f32 %v4835_v0, %v1809_v30  ;;  %v2942_v30 = vadd.f32 %v2926_v49, %v2842_v54 }
 0x602   :  { %4008 = vpow2.f32 %v2990_v11  ;;  %v2029_v14 = vadd.f32 %v2013_v22, %v1929_v48  ;;  %v5360_v22 = vld [vmem:[%s5559_s9 + $0x60] sm:$0xff] }
 0x603   :  { %v2726_v5 = vpop.permute.xlu1 %2725  ;;  %4010 = vpow2.f32 %v2077_v24  ;;  %v1862_v43 = vadd.f32 %v1846_v23, %v1746_v39 }
 0x604   :  { %v2759_v19 = vmul.f32 %v4839_v63, %v2726_v5  ;;  %4012 = vpow2.f32 %v2243_v29  ;;  %v4003_v52 = vpop.eup %4002  ;;  %v5368_v49 = vpop.permute.xlu0 %2897 }
 0x605   :  { %4014 = vpow2.f32 %v2245_v34  ;;  %v1930_v15 = vmul.f32 %v4001_v44, %v1862_v43  ;;  %v2350_v34 = vmul.f32 %v4887_v46, %v2317_v32  ;;  %v1699_v44 = vmul.f32 %v5610_v16, %v5360_v22 }
 0x606   :  { %v2775_v27 = vadd.f32 %v2759_v19, %v2675_v57  ;;  %v2460_v57 = vmul.f32 %v4725_v26, %v5360_v22 }
 0x607   :  { %v4005_v50 = vpop.eup %4004 }
 0x608   :  { %v1981_v12 = vpop.permute.xlu1 %1980  ;;  %v2843_v40 = vmul.f32 %v4003_v52, %v2775_v27  ;;  %v4007_v7 = vpop.eup %4006  ;;  %v2097_v35 = vmul.f32 %v4005_v50, %v2029_v14  ;;  %v2488_v14 = vmul.f32 1.442695, %v2460_v57  ;;  %v1727_v50 = vmul.f32 1.442695, %v1699_v44 }
 0x609   :  { %v2014_v9 = vmul.f32 %v4853_v10, %v1981_v12  ;;  %v3010_v55 = vmul.f32 %v4007_v7, %v2942_v30  ;;  %v2461_v12 = vmul.f32 %v4725_v26, %v5365_v36  ;;  %v5377_v30 = vpop.permute.xlu0 %2152 }
 0x60a   :  { %v2197_v11 = vadd.f32 %v2181_v28, %v2097_v35  ;;  %4016 = vpow2.f32 %v2488_v14  ;;  %v1883_v28 = vmul.f32 %v4777_v62, %v5360_v22 }
 0x60b   :  { %v2030_v61 = vadd.f32 %v2014_v9, %v1930_v15  ;;  %v3110_v24 = vadd.f32 %v3094_v58, %v3010_v55  ;;  %v2490_v9 = vmul.f32 1.442695, %v2461_v12  ;;  %v1700_v15 = vmul.f32 %v5610_v16, %v5365_v36 }
 0x60c   :  { %v4009_v21 = vpop.eup %4008  ;;  %v2796_v55 = vmul.f32 %v4781_v8, %v5360_v22  ;;  %v1884_v58 = vmul.f32 %v4777_v62, %v5365_v36 }
 0x60d   :  { %v2894_v60 = vpop.permute.xlu1 %2893  ;;  %v4011_v17 = vpop.eup %4010  ;;  %4018 = vpow2.f32 %v2490_v9 }
 0x60e   :  { %v2927_v59 = vmul.f32 %v4859_v33, %v2894_v60  ;;  %v2098_v38 = vmul.f32 %v4011_v17, %v2030_v61  ;;  %v4013_v23 = vpop.eup %4012  ;;  %v2628_v60 = vmul.f32 %v4761_v41, %v5360_v22  ;;  %4020 = vpow2.f32 %v1727_v50 }
 0x60f   :  { %v4015_v4 = vpop.eup %4014  ;;  %v2265_v56 = vmul.f32 %v4013_v23, %v2197_v11  ;;  %v2658_v61 = vmul.f32 1.442695, %v2629_v18  ;;  %v1913_v32 = vmul.f32 1.442695, %v1884_v58  ;;  %v2219_v50 = vmul.f32 %v4827_v42, %v5360_v22 }
 0x610   :  { %v2943_v2 = vadd.f32 %v2927_v59, %v2843_v40  ;;  %v1729_v40 = vmul.f32 1.442695, %v1700_v15  ;;  %v5385_v59 = vpop.permute.xlu0 %3065  ;;  %v2656_v7 = vmul.f32 1.442695, %v2628_v60 }
 0x611   :  { %v2365_v3 = vadd.f32 %v2349_v6, %v2265_v56 }
 0x612   :  { %v3011_v37 = vmul.f32 %v4009_v21, %v2943_v2  ;;  %v2149_v5 = vpop.permute.xlu1 %2148  ;;  %4022 = vpow2.f32 %v1729_v40  ;;  %v1911_v2 = vmul.f32 1.442695, %v1883_v28 }
 0x613   :  { %v2182_v20 = vmul.f32 %v4871_v45, %v2149_v5  ;;  %4024 = vpow2.f32 %v2656_v7  ;;  %v2797_v5 = vmul.f32 %v4781_v8, %v5365_v36 }
 0x614   :  { %v3111_v51 = vadd.f32 %v3095_v53, %v3011_v37  ;;  %v4017_v17 = vpop.eup %4016  ;;  %v2566_v53 = vpop.permute.xlu0 %2565  ;;  %4026 = vpow2.f32 %v2658_v61  ;;  %v2824_v37 = vmul.f32 1.442695, %v2796_v55 }
 0x615   :  { %v2198_v29 = vadd.f32 %v2182_v20, %v2098_v38  ;;  %v2051_v20 = vmul.f32 %v4799_v31, %v5360_v22  ;;  %4028 = vpow2.f32 %v1911_v2  ;;  %v2220_v2 = vmul.f32 %v4827_v42, %v5365_v36 }
 0x616   :  { %v3632_v19 = vpack.c.bf16 %v3111_v51, %v3110_v24  ;;  %v2593_v24 = vmul.f32 %v4814_v1, %v2566_v53  ;;  %v2508_v51 = vmul.f32 0.0, %v4017_v17  ;;  %4030 = vpow2.f32 %v2824_v37 }
 0x617   :  { %v2266_v48 = vmul.f32 %v4015_v4, %v2198_v29  ;;  %v2562_v39 = vpop.permute.xlu1 %2561  ;;  %v4019_v11 = vpop.eup %4018  ;;  %v2826_v29 = vmul.f32 1.442695, %v2797_v5  ;;  %v2964_v4 = vmul.f32 %v4806_v47, %v5360_v22  ;;  %v2079_v56 = vmul.f32 1.442695, %v2051_v20 }
 0x618   :  { %3633 = vmatpush3.bf16.msra.mxu0 %v3632_v19  ;;  %v2592_v38 = vmul.f32 %v4814_v1, %v2562_v39  ;;  %v2509_v23 = vmul.f32 0.0, %v4019_v11  ;;  %v4021_v19 = vpop.eup %4020  ;;  %4032 = vpow2.f32 %v1913_v32  ;;  %v2734_v14 = vpop.permute.xlu0 %2733  ;;  %v2247_v5 = vmul.f32 1.442695, %v2219_v50 }
 0x619   :  { %v2366_v54 = vadd.f32 %v2350_v34, %v2266_v48  ;;  %3634 = vmatprep.subr.bf16.mxu0 %v5603_v13  ;;  %v2052_v48 = vmul.f32 %v4799_v31, %v5365_v36  ;;  %v1747_v9 = vmul.f32 0.0, %v4021_v19  ;;  %4034 = vpow2.f32 %v2826_v29 }
 0x61a   :  { %v2608_v34 = vadd.f32 %v2592_v38, %v2508_v51  ;;  %v2609_v57 = vadd.f32 %v2593_v24, %v2509_v23  ;;  %v2992_v15 = vmul.f32 1.442695, %v2964_v4  ;;  %4036 = vpow2.f32 %v2079_v56 }
 0x61b   :  { %v3608_v43 = vpack.c.bf16 %v2366_v54, %v2365_v3  ;;  %v2965_v3 = vmul.f32 %v4806_v47, %v5365_v36  ;;  %v2081_v18 = vmul.f32 1.442695, %v2052_v48  ;;  %v2249_v51 = vmul.f32 1.442695, %v2220_v2 }
 0x61c   :  { %v1814_v27 = vpop.permute.xlu1 %1813  ;;  %v4023_v54 = vpop.eup %4022  ;;  %4038 = vpow2.f32 %v2992_v15  ;;  %v2928_v36 = vmul.f32 %v4859_v33, %v5368_v49  ;;  %v3096_v50 = vmul.f32 %v4875_v25, %v5385_v59 }
 0x61d   :  { %3609 = vmatpush3.bf16.msra.mxu1 %v3608_v43  ;;  %v1847_v39 = vmul.f32 %v4835_v0, %v1814_v27  ;;  %v4025_v43 = vpop.eup %4024  ;;  %v1748_v28 = vmul.f32 0.0, %v4023_v54  ;;  %v2994_v61 = vmul.f32 1.442695, %v2965_v3  ;;  %4040 = vpow2.f32 %v2081_v18 }
 0x61e   :  { %3610 = vmatprep.subr.bf16.mxu1 %v5603_v13  ;;  %v2676_v60 = vmul.f32 %v4025_v43, %v2608_v34  ;;  %v4027_v40 = vpop.eup %4026 }
 0x61f   :  { %v1863_v7 = vadd.f32 %v1847_v39, %v1747_v9  ;;  %v2677_v55 = vmul.f32 %v4027_v40, %v2609_v57  ;;  %v4029_v37 = vpop.eup %4028  ;;  %4042 = vpow2.f32 %v2994_v61 }
 0x620   :  { %v4031_v22 = vpop.eup %4030  ;;  %4044 = vpow2.f32 %v2247_v5 }
 0x621   :  { %v2730_v52 = vpop.permute.xlu1 %2729  ;;  %v1931_v11 = vmul.f32 %v4029_v37, %v1863_v7  ;;  %4046 = vpow2.f32 %v2249_v51 }
 0x622   :  { %v2760_v12 = vmul.f32 %v4839_v63, %v2730_v52  ;;  %v2761_v52 = vmul.f32 %v4839_v63, %v2734_v14  ;;  %v4033_v20 = vpop.eup %4032 }
 0x623   :  { %v4035_v4 = vpop.eup %4034 }
 0x624   :  { %v2776_v58 = vadd.f32 %v2760_v12, %v2676_v60  ;;  %v2777_v32 = vadd.f32 %v2761_v52, %v2677_v55  ;;  %v4037_v19 = vpop.eup %4036  ;;  %v2183_v12 = vmul.f32 %v4871_v45, %v5377_v30 }
 0x626   :  { %v1985_v35 = vpop.permute.xlu1 %1984  ;;  %v2844_v24 = vmul.f32 %v4031_v22, %v2776_v58  ;;  %v2845_v56 = vmul.f32 %v4035_v4, %v2777_v32  ;;  %v4039_v57 = vpop.eup %4038 }
 0x627   :  { %v2015_v17 = vmul.f32 %v4853_v10, %v1985_v35  ;;  %v4041_v14 = vpop.eup %4040 }
 0x628   :  { %v2944_v34 = vadd.f32 %v2928_v36, %v2844_v24 }
 0x629   :  { %v2031_v23 = vadd.f32 %v2015_v17, %v1931_v11  ;;  %v4043_v9 = vpop.eup %4042  ;;  %v5435_v11 = vld [vmem:[%s5559_s9 + $0x70] sm:$0xff] }
 0x62a   :  { %v3012_v49 = vmul.f32 %v4039_v57, %v2944_v34  ;;  %v4045_v7 = vpop.eup %4044  ;;  %v1701_v36 = vmul.f32 %v5610_v16, %v5435_v11 }
 0x62b   :  { %v5393_v21 = vpop.permute.xlu1 %2320  ;;  %v2099_v39 = vmul.f32 %v4037_v19, %v2031_v23  ;;  %v4047_v30 = vpop.eup %4046 }
 0x62c   :  { %v2351_v2 = vmul.f32 %v4887_v46, %v5393_v21  ;;  %v5440_v21 = vld [vmem:[%s5559_s9 + $0x78] sm:$0xff]  ;;  %v1731_v19 = vmul.f32 1.442695, %v1701_v36 }
 0x62d   :  { %v2463_v32 = vmul.f32 %v4725_v26, %v5440_v21  ;;  %v1702_v24 = vmul.f32 %v5610_v16, %v5440_v21  ;;  %v2798_v16 = vmul.f32 %v4781_v8, %v5435_v11  ;;  %v2054_v57 = vmul.f32 %v4799_v31, %v5440_v21 }
 0x630   :  { %v1819_v6 = vpop.permute.xlu1 %1818 }
 0x631   :  { %v1848_v44 = vmul.f32 %v4835_v0, %v1819_v6 }
 0x633   :  { %v1864_v53 = vadd.f32 %v1848_v44, %v1748_v28  ;;  %v2199_v44 = vadd.f32 %v2183_v12, %v2099_v39  ;;  %v3112_v28 = vadd.f32 %v3096_v50, %v3012_v49  ;;  %v2799_v12 = vmul.f32 %v4781_v8, %v5440_v21 }
 0x635   :  { %v1989_v27 = vpop.permute.xlu1 %1988  ;;  %v1932_v6 = vmul.f32 %v4033_v20, %v1864_v53  ;;  %v2267_v55 = vmul.f32 %v4045_v7, %v2199_v44  ;;  %v2830_v7 = vmul.f32 1.442695, %v2799_v12 }
 0x636   :  { %v2016_v29 = vmul.f32 %v4853_v10, %v1989_v27 }
 0x637   :  { %v2367_v37 = vadd.f32 %v2351_v2, %v2267_v55 }
 0x638   :  { %v2032_v3 = vadd.f32 %v2016_v29, %v1932_v6  ;;  %v2494_v6 = vmul.f32 1.442695, %v2463_v32  ;;  %v1733_v29 = vmul.f32 1.442695, %v1702_v24 }
 0x63a   :  { %v2902_v38 = vpop.permute.xlu1 %2901  ;;  %v2100_v15 = vmul.f32 %v4041_v14, %v2032_v3  ;;  %v1885_v3 = vmul.f32 %v4777_v62, %v5435_v11  ;;  %v2828_v14 = vmul.f32 1.442695, %v2798_v16 }
 0x63b   :  { %v2929_v35 = vmul.f32 %v4859_v33, %v2902_v38  ;;  %v2462_v38 = vmul.f32 %v4725_v26, %v5435_v11  ;;  %v2631_v26 = vmul.f32 %v4761_v41, %v5440_v21 }
 0x63c   :  { %v1915_v44 = vmul.f32 1.442695, %v1885_v3 }
 0x63d   :  { %v2945_v54 = vadd.f32 %v2929_v35, %v2845_v56  ;;  %v2492_v51 = vmul.f32 1.442695, %v2462_v38  ;;  %v2570_v35 = vpop.permute.xlu0 %2569  ;;  %v1886_v56 = vmul.f32 %v4777_v62, %v5440_v21  ;;  %v2966_v62 = vmul.f32 %v4806_v47, %v5435_v11 }
 0x63f   :  { %v2157_v48 = vpop.permute.xlu1 %2156  ;;  %v3013_v27 = vmul.f32 %v4043_v9, %v2945_v54  ;;  %4048 = vpow2.f32 %v2492_v51  ;;  %v2594_v9 = vmul.f32 %v4814_v1, %v2570_v35  ;;  %v2221_v51 = vmul.f32 %v4827_v42, %v5435_v11 }
 0x640   :  { %v2184_v43 = vmul.f32 %v4871_v45, %v2157_v48  ;;  %4050 = vpow2.f32 %v2494_v6  ;;  %v2662_v48 = vmul.f32 1.442695, %v2631_v26 }
 0x641   :  { %4052 = vpow2.f32 %v1733_v29  ;;  %v5461_v39 = vpop.permute.xlu0 %3073 }
 0x642   :  { %v2200_v40 = vadd.f32 %v2184_v43, %v2100_v15  ;;  %4054 = vpow2.f32 %v1731_v19 }
 0x644   :  { %v3070_v60 = vpop.permute.xlu1 %3069  ;;  %v2268_v17 = vmul.f32 %v4047_v30, %v2200_v40 }
 0x645   :  { %v3097_v18 = vmul.f32 %v4875_v25, %v3070_v60  ;;  %v1829_v15 = vpop.permute.xlu0 %1828  ;;  %v2053_v60 = vmul.f32 %v4799_v31, %v5435_v11 }
 0x646   :  { %v1850_v30 = vmul.f32 %v4835_v0, %v1829_v15 }
 0x647   :  { %v3113_v61 = vadd.f32 %v3097_v18, %v3013_v27  ;;  %v2085_v27 = vmul.f32 1.442695, %v2054_v57  ;;  %v2083_v31 = vmul.f32 1.442695, %v2053_v60 }
 0x649   :  { %v3635_v52 = vpack.c.bf16 %v3113_v61, %v3112_v28  ;;  %v2325_v58 = vpop.permute.xlu1 %2324  ;;  %v4049_v43 = vpop.eup %4048  ;;  %v2967_v28 = vmul.f32 %v4806_v47, %v5440_v21  ;;  %v2222_v47 = vmul.f32 %v4827_v42, %v5440_v21 }
 0x64a   :  { %v2352_v53 = vmul.f32 %v4887_v46, %v2325_v58  ;;  %v4051_v49 = vpop.eup %4050  ;;  %v2510_v40 = vmul.f32 0.0, %v4049_v43  ;;  %v2165_v12 = vpop.permute.xlu0 %2164 }
 0x64b   :  { %3636 = vmatpush3.bf16.msra.mxu0 %v3635_v52  ;;  %v4053_v18 = vpop.eup %4052  ;;  %v2511_v61 = vmul.f32 0.0, %v4051_v49  ;;  %v2996_v52 = vmul.f32 1.442695, %v2966_v62  ;;  %v2253_v35 = vmul.f32 1.442695, %v2222_v47 }
 0x64c   :  { %v2368_v59 = vadd.f32 %v2352_v53, %v2268_v17  ;;  %3637 = vmatprep.subr.bf16.mxu0 %v5603_v13  ;;  %v2610_v55 = vadd.f32 %v2594_v9, %v2510_v40  ;;  %v1750_v58 = vmul.f32 0.0, %v4053_v18  ;;  %v4055_v17 = vpop.eup %4054 }
 0x64d   :  { %v1749_v6 = vmul.f32 0.0, %v4055_v17 }
 0x64e   :  { %v3611_v5 = vpack.c.bf16 %v2368_v59, %v2367_v37  ;;  %v5430_v22 = vpop.permute.xlu1 %1823  ;;  %v1866_v32 = vadd.f32 %v1850_v30, %v1750_v58  ;;  %v2333_v30 = vpop.permute.xlu0 %2332 }
 0x64f   :  { %v2354_v17 = vmul.f32 %v4887_v46, %v2333_v30 }
 0x650   :  { %3612 = vmatpush3.bf16.msra.mxu1 %v3611_v5  ;;  %v1849_v5 = vmul.f32 %v4835_v0, %v5430_v22 }
 0x651   :  { %3613 = vmatprep.subr.bf16.mxu1 %v5603_v13  ;;  %v2630_v13 = vmul.f32 %v4761_v41, %v5435_v11  ;;  %v1917_v41 = vmul.f32 1.442695, %v1886_v56 }
 0x653   :  { %v2738_v20 = vpop.permute.xlu1 %2737  ;;  %v2660_v34 = vmul.f32 1.442695, %v2630_v13  ;;  %v1865_v13 = vadd.f32 %v1849_v5, %v1749_v6  ;;  %v3811_v5 = vld [vmem:[%s5560_s11] sm:$0xff]  }
 0x654   :  { %v2762_v53 = vmul.f32 %v4839_v63, %v2738_v20  ;;  %v3815_v6 = vld [vmem:[%s5560_s11 + $0x20] sm:$0xff]  }
 0x655   :  { %4056 = vpow2.f32 %v2660_v34  ;;  %v2251_v34 = vmul.f32 1.442695, %v2221_v51  ;;  %v3814_v51 = vld [vmem:[%s5560_s11 + $0x18] sm:$0xff]  }
 0x656   :  { %4058 = vpow2.f32 %v2662_v48 }
 0x657   :  { %4060 = vpow2.f32 %v1917_v41 }
 0x658   :  { %v5449_v23 = vpop.permute.xlu1 %1992  ;;  %4062 = vpow2.f32 %v2828_v14 }
 0x659   :  { %4064 = vpow2.f32 %v1915_v44  ;;  %v2017_v42 = vmul.f32 %v4853_v10, %v5449_v23 }
 0x65a   :  { %4066 = vpow2.f32 %v2085_v27 }
 0x65b   :  { %4068 = vpow2.f32 %v2830_v7 }
 0x65c   :  { %4070 = vpow2.f32 %v2996_v52 }
 0x65d   :  { %v5457_v4 = vpop.permute.xlu1 %2905  ;;  %4072 = vpow2.f32 %v2083_v31 }
 0x65e   :  { %v2930_v0 = vmul.f32 %v4859_v33, %v5457_v4 }
 0x65f   :  { %v4057_v59 = vpop.eup %4056 }
 0x660   :  { %v4059_v38 = vpop.eup %4058  ;;  %v2678_v24 = vmul.f32 %v4057_v59, %v2610_v55 }
 0x661   :  { %v4061_v21 = vpop.eup %4060 }
 0x662   :  { %v5467_v54 = vpop.permute.xlu1 %2160  ;;  %v2778_v36 = vadd.f32 %v2762_v53, %v2678_v24  ;;  %v1934_v22 = vmul.f32 %v4061_v21, %v1866_v32  ;;  %v4063_v56 = vpop.eup %4062  ;;  %v5612_v32 = vmov 0.0   ;;  %v3813_v24 = vld [vmem:[%s5560_s11 + $0x10] sm:$0xff]  }
 0x663   :  { %v4065_v48 = vpop.eup %4064  ;;  %v2185_v23 = vmul.f32 %v4871_v45, %v5467_v54 }
 0x664   :  { %v4067_v3 = vpop.eup %4066  ;;  %v1933_v41 = vmul.f32 %v4065_v48, %v1865_v13  ;;  %v5614_v13 = vld [vmem:[#allocation3_spill] sm:$0xff] }
 0x665   :  { %v4069_v57 = vpop.eup %4068 }
 0x666   :  { %v2033_v4 = vadd.f32 %v2017_v42, %v1933_v41  ;;  %v4071_v62 = vpop.eup %4070 }
 0x667   :  { %v2574_v50 = vpop.permute.xlu1 %2573  ;;  %v4073_v15 = vpop.eup %4072 }
 0x668   :  { %v2595_v8 = vmul.f32 %v4814_v1, %v2574_v50  ;;  %v2998_v1 = vmul.f32 1.442695, %v2967_v28  ;;  %v2101_v18 = vmul.f32 %v4073_v15, %v2033_v4  ;;  %v3098_v28 = vmul.f32 %v4875_v25, %v5461_v39 }
 0x66a   :  { %v2611_v2 = vadd.f32 %v2595_v8, %v2511_v61  ;;  %4074 = vpow2.f32 %v2998_v1  ;;  %v5611_v1 = vld [vmem:[#allocation4_spill] sm:$0xff] }
 0x66b   :  { %4076 = vpow2.f32 %v2253_v35  ;;  %v3116_v47 = vrot.slane %v5611_v1, 7 }
 0x66c   :  { %v2742_v37 = vpop.permute.xlu1 %2741  ;;  %v2679_v20 = vmul.f32 %v4059_v38, %v2611_v2  ;;  %4078 = vpow2.f32 %v2251_v34  ;;  %v2372_v38 = vrot.slane %v5611_v1, 3 }
 0x66d   :  { %v2763_v29 = vmul.f32 %v4839_v63, %v2742_v37  ;;  %v2846_v63 = vmul.f32 %v4063_v56, %v2778_v36  ;;  %v3371_v56 = vld [vmem:[%s5561_s10] ss:$0 sm:$0xff] }
 0x66f   :  { %v2779_v11 = vadd.f32 %v2763_v29, %v2679_v20  ;;  %v2946_v43 = vadd.f32 %v2930_v0, %v2846_v63  ;;  %v5613_v20 = vld [vmem:[#allocation2_spill] sm:$0xff]  ;;  %v3195_v0 = vrot.slane %v5614_v13, 6 }
 0x670   :  { %v3207_v29 = vsub.f32 0.0, %v5613_v20 }
 0x671   :  { %v1997_v26 = vpop.permute.xlu1 %1996  ;;  %v2847_v9 = vmul.f32 %v4069_v57, %v2779_v11  ;;  %v3014_v27 = vmul.f32 %v4071_v62, %v2946_v43 }
 0x672   :  { %v2018_v19 = vmul.f32 %v4853_v10, %v1997_v26  ;;  %v2186_v10 = vmul.f32 %v4871_v45, %v2165_v12  ;;  %v3208_v36 = vmul.f32 1.442695, %v3207_v29  ;;  %v3193_v26 = vrot.slane %v5614_v13, 3 }
 0x673   :  { %v3114_v52 = vadd.f32 %v3098_v28, %v3014_v27  ;;  %v3379_v28 = vld [vmem:[%s5563_s13] ss:$0 sm:$0xff] }
 0x674   :  { %v2034_v16 = vadd.f32 %v2018_v19, %v1934_v22  ;;  %v4075_v50 = vpop.eup %4074  ;;  %4080 = vpow2.f32 %v3208_v36  ;;  %v3197_v34 = vsel %vm910_vm6, %v3193_v26, %v3195_v0 }
 0x675   :  { %v4077_v55 = vpop.eup %4076  ;;  %v3205_v63 = vmul.f32 %v3371_v56, %v3197_v34 }
 0x676   :  { %v2910_v14 = vpop.permute.xlu1 %2909  ;;  %v2102_v49 = vmul.f32 %v4067_v3, %v2034_v16  ;;  %v4079_v2 = vpop.eup %4078 }
 0x677   :  { %v2931_v44 = vmul.f32 %v4859_v33, %v2910_v14  ;;  %v2201_v33 = vadd.f32 %v2185_v23, %v2101_v18 }
 0x678   :  { %v2202_v40 = vadd.f32 %v2186_v10, %v2102_v49 }
 0x679   :  { %v2947_v60 = vadd.f32 %v2931_v44, %v2847_v9  ;;  %v2269_v53 = vmul.f32 %v4079_v2, %v2201_v33 }
 0x67a   :  { %v2270_v31 = vmul.f32 %v4077_v55, %v2202_v40 }
 0x67b   :  { %v3078_v8 = vpop.permute.xlu1 %3077  ;;  %v3015_v7 = vmul.f32 %v4075_v50, %v2947_v60 }
 0x67c   :  { %v3099_v61 = vmul.f32 %v4875_v25, %v3078_v8  ;;  %v2370_v59 = vadd.f32 %v2354_v17, %v2270_v31  ;;  %v3378_v8 = vld [vmem:[%s5562_s12] ss:$0 sm:$0xff] }
 0x67e   :  { %v3115_v58 = vadd.f32 %v3099_v61, %v3015_v7  ;;  %v4081_v35 = vpop.eup %4080 }
 0x67f   :  { %v3210_v21 = vadd.f32 1.0, %v4081_v35 }
 0x680   :  { %v3638_v45 = vpack.c.bf16 %v3115_v58, %v3114_v52  ;;  %v2329_v54 = vpop.permute.xlu1 %2328 }
 0x681   :  { %v2353_v37 = vmul.f32 %v4887_v46, %v2329_v54  ;;  %v3812_v46 = vld [vmem:[%s5560_s11 + $0x8] sm:$0xff]   ;;  %4082 = vrcp.f32 %v3210_v21 }
 0x682   :  { %3639 = vmatpush3.bf16.msra.mxu0 %v3638_v45 }
 0x683   :  { %v2369_v39 = vadd.f32 %v2353_v37, %v2269_v53 }
 0x685   :  { %v3614_v25 = vpack.c.bf16 %v2370_v59, %v2369_v39  ;;  %3568 = vmatmul.mubr.f32.vlgmr.msra.gmra.mrb[16].mxu0 %v3116_v47 }
 0x687   :  { %3615 = vmatpush3.bf16.msra.mxu1 %v3614_v25 }
 0x688   :  { %3570 = vmatprep.subr.bf16.mxu1 %v5612_v32 }
 0x68a   :  { %3533 = vmatmul.mubr.f32.vlgmr.msra.gmra.mrb[6].mxu1 %v2372_v38 }
 0x68b   :  { %3571 = vmatpush3.bf16.msra.mxu1 %v3811_v5  ;;  %3580 = vmatprep.mubr.msk.bf16.mxu1 %vm4087_vm3, %v5612_v32  ;;  %v4083_v42 = vpop.eup %4082 }
 0x68c   :  { %3572 = vmatprep.subr.bf16.mxu1 %v5612_v32  ;;  %v3213_v41 = vmul.f32 %v4083_v42, %v5613_v20 }
 0x68f   :  { %3573 = vmatpush3.bf16.msra.mxu1 %v3812_v46 }
 0x690   :  { %3574 = vmatprep.subr.bf16.mxu1 %v5612_v32 }
 0x693   :  { %3575 = vmatpush3.bf16.msra.mxu1 %v3813_v24 }
 0x694   :  { %3576 = vmatprep.subr.bf16.mxu1 %v5612_v32 }
 0x697   :  { %3577 = vmatpush3.bf16.msra.mxu1 %v3814_v51 }
 0x698   :  { %3578 = vmatprep.subr.bf16.mxu1 %v5612_v32 }
 0x69b   :  { %3579 = vmatpush3.bf16.msra.mxu1 %v3815_v6 }
 0x758   :  { %v3184_v22 = vpop.f32.mrb[16].mxu0 }
 0x759   :  { %v3569_v19 = vpop.f32.mrb[17].mxu0  ;;  %v3189_v11 = vrot.slane %v3184_v22, 7 }
 0x75d   :  { %v2440_v48 = vpop.f32.mrb[6].mxu1 }
 0x75e   :  { %v3191_v16 = vsel %vm910_vm6, %v2440_v48, %v3189_v11  ;;  %v3534_v3 = vpop.f32.mrb[7].mxu1 }
 0x75f   :  { %v3206_v57 = vadd.f32 %v3205_v63, %v3191_v16 }
 0x761   :  { %v3214_v12 = vmul.f32 %v3213_v41, %v3206_v57 }
 0x763   :  { %v3215_v43 = vpack.c.bf16 %v3214_v12, %v3214_v12 }
 0x765   :  { %3581 = vmatmul.mubr.msk.bf16.vlgmr.msra.gmra.mrb[8].mxu1 %vm1455_vm11, %v3215_v43 }
 0x838   :  { %v3293_v14 = vpop.f32.mrb[8].mxu1 }
 0x839   :  { %v3582_v4 = vpop.f32.mrb[9].mxu1  ;;  %v3302_v49 = vsel %vm3301_vm13, %v3293_v14, 0.0 }
 0x83a   :  { %3303 = vadd.xlane.f32.xlu1 %v3302_v49  ;;  %v3296_v9 = vpop.f32.mrb[10].mxu1 }
 0x83b   :  { %v3583_v44 = vpop.f32.mrb[11].mxu1 }
 0x8c7   :  { %v3304_v62 = vpop.xlane.xlu1 %3303 }
 0x8c8   :  { %v3306_v15 = vmul.f32 0.025, %v3304_v62 }
 0x8ca   :  { %v3307_v10 = vsub.f32 %v3293_v14, %v3306_v15 }
 0x8cc   :  { %v3308_v23 = vmul.f32 %v3307_v10, %v3307_v10 }
 0x8ce   :  { %v3309_v60 = vsel %vm3301_vm13, %v3308_v23, 0.0 }
 0x8cf   :  { %3310 = vadd.xlane.f32.xlu0 %v3309_v60 }
 0x95c   :  { %v3311_v50 = vpop.xlane.xlu0 %3310 }
 0x95d   :  { %v3312_v27 = vmul.f32 0.025, %v3311_v50 }
 0x95f   :  { %v3313_v18 = vadd.f32 1e-05, %v3312_v27 }
 0x961   :  { %4084 = vrsqrt.f32 %v3313_v18 }
 0x96b   :  { %v4085_v40 = vpop.eup %4084 }
 0x96c   :  { %v3315_v7 = vmul.f32 %v4085_v40, %v3307_v10 }
 0x96e   :  { %v3322_v61 = vmul.f32 %v3378_v8, %v3315_v7 }
 0x970   :  { %v3329_v33 = vadd.f32 %v3379_v28, %v3322_v61 }
 0x972   :  { %3330 = vst.msk [vmem:[%s5564_s14] sm:$0x3] %vm3301_vm13, %v3329_v33 }

</bundles_post_ra>
